<compile_context>
chip_gen: v7x
topology: tpu7x:2x2x1
jax: 0.10.0
libtpu: 0.0.40
codegen_flags: <defaults>
</compile_context>

<pallas_src>
import math
from functools import partial

import jax
import jax.numpy as jnp
from jax.experimental import pallas as pl
from jax.experimental.pallas import tpu as pltpu


def _rup(n, m=128):
    return ((n + m - 1) // m) * m


# -----------------------------------------------------------------------------
# Pallas kernel
# -----------------------------------------------------------------------------
def _fclstm_kernel(nlayers, seq_len, BP, HP, *refs):
    if nlayers > 1:
        (x_ref, wx_ref, wh0_ref, wr_ref, b_ref, wd_ref, bd_ref,
         out_ref, gx_ref) = refs
    else:
        (x_ref, wx_ref, wh0_ref, b_ref, wd_ref, bd_ref,
         out_ref, gx_ref) = refs
        wr_ref = None

    GP = 4 * HP

    # ---- hoisted input projection: one (seq_len*BP, XP) @ (XP, GP) matmul for
    # all timesteps, with the layer-0 bias folded in; result lives in VMEM.
    gx = jnp.dot(x_ref[...].astype(jnp.bfloat16), wx_ref[...],
                 preferred_element_type=jnp.float32)
    gx_ref[...] = gx + jnp.broadcast_to(b_ref[0], gx.shape)

    # ---- hoisted per-layer bias broadcasts for layers > 0 (emitted once, not
    # once per unrolled (t, l) iteration).
    b_bc = [jnp.broadcast_to(b_ref[l], (BP, GP)) for l in range(1, nlayers)]

    # carried state as SSA values (packed layout: [h_t | h_v | h_a | 0], HP lanes)
    h = [jnp.zeros((BP, HP), jnp.float32) for _ in range(nlayers)]
    c = [jnp.zeros((BP, HP), jnp.float32) for _ in range(nlayers)]

    for t in range(seq_len):
        h_last_prev = h[nlayers - 1]        # previous step's last-layer packed h
        layer_in = None
        for l in range(nlayers):
            if l == 0:
                zh = jnp.concatenate([h_last_prev, h[0]], axis=-1)
                pre = gx_ref[pl.ds(t * BP, BP), :]      # x-proj + bias, hoisted
                w = wh0_ref[...]                         # (2*HP, GP) bf16
            else:
                zh = jnp.concatenate([layer_in, h[l]], axis=-1)
                pre = b_bc[l - 1]
                w = wr_ref[l - 1]                        # (2*HP, GP) bf16
            gates = jnp.dot(zh.astype(jnp.bfloat16), w,
                            preferred_element_type=jnp.float32) + pre
            # gate layout: [i | f | o | g], each block HP lanes (128-aligned)
            sig = jax.nn.sigmoid(gates[:, 0:3 * HP])
            g_g = jnp.tanh(gates[:, 3 * HP:4 * HP])
            i_g = sig[:, 0:HP]
            f_g = sig[:, HP:2 * HP]
            o_g = sig[:, 2 * HP:3 * HP]
            c_new = f_g * c[l] + i_g * g_g
            h_new = o_g * jnp.tanh(c_new)
            c[l] = c_new
            h[l] = h_new
            layer_in = h_new

    # decoder: VPU multiply + lane reduction (no N=1 MXU matmul), runs once.
    wrow = wd_ref[...]                                   # (1, HP) f32
    out = jnp.sum(h[nlayers - 1] * wrow, axis=-1, keepdims=True) + bd_ref[...]
    out_ref[...] = jnp.broadcast_to(out, out_ref.shape).astype(out_ref.dtype)


# -----------------------------------------------------------------------------
# Parameter construction (deterministic, PyTorch-equivalent shapes)
# -----------------------------------------------------------------------------
def init_params(key, nlayers, text_size, visual_size, acc_size, Ht, Hv, Ha):
    def lstm_params(k, in0, H):
        layers = []
        bound = 1.0 / math.sqrt(H)
        for l in range(nlayers):
            in_l = in0 if l == 0 else H
            k, k1, k2, k3, k4 = jax.random.split(k, 5)
            w_ih = jax.random.uniform(k1, (4 * H, in_l), jnp.float32, -bound, bound)
            w_hh = jax.random.uniform(k2, (4 * H, H), jnp.float32, -bound, bound)
            b_ih = jax.random.uniform(k3, (4 * H,), jnp.float32, -bound, bound)
            b_hh = jax.random.uniform(k4, (4 * H,), jnp.float32, -bound, bound)
            layers.append((w_ih, w_hh, b_ih, b_hh))
        return layers

    kt, kv, ka, kd = jax.random.split(key, 4)
    params = {
        "t": lstm_params(kt, text_size + Hv + Ha, Ht),
        "v": lstm_params(kv, visual_size + Ht + Ha, Hv),
        "a": lstm_params(ka, acc_size + Ht + Hv, Ha),
    }
    # decoder: xavier_normal with (fan_in, fan_out) = (1, Ht+Hv+Ha), bias = 0
    std = math.sqrt(2.0 / (1 + Ht + Hv + Ha))
    params["dec_w"] = std * jax.random.normal(kd, (1, Ht + Hv + Ha), jnp.float32)
    params["dec_b"] = jnp.zeros((1,), jnp.float32)
    return params


# -----------------------------------------------------------------------------
# Weight slab construction (block-diagonal, lane-padded, gate order [i,f,o,g])
# -----------------------------------------------------------------------------
def _build_slabs(params, feats, Hs, nlayers, XP, HP):
    T, V, A = feats
    Ht, Hv, Ha = Hs
    GP = 4 * HP
    h_off = [0, Ht, Ht + Hv]
    x_off = [0, T, T + V]
    gate_pos = [0, 1, 3, 2]          # torch [i,f,g,o] -> our blocks [i,f,o,g]
    mods = ["t", "v", "a"]
    cross = [(1, 2), (0, 2), (0, 1)]  # modality m's layer-0 input uses h of these

    def gate_slice(m, pos):
        return slice(pos * HP + h_off[m], pos * HP + h_off[m] + Hs[m])

    def scatter(dst, row_slice, m, w):     # w: (nrows, 4H_m), torch gate order
        H = Hs[m]
        for tg in range(4):
            dst = dst.at[row_slice, gate_slice(m, gate_pos[tg])].set(
                w[:, tg * H:(tg + 1) * H])
        return dst

    def scatter_bias(dst, m, b):           # b: (4H_m,), torch gate order
        H = Hs[m]
        for tg in range(4):
            dst = dst.at[0, gate_slice(m, gate_pos[tg])].set(b[tg * H:(tg + 1) * H])
        return dst

    # ---- layer 0: rows = [x-pack (XP) | prev-step last-layer h (HP) | own layer-0 h (HP)]
    w0 = jnp.zeros((XP + 2 * HP, GP), jnp.float32)
    b0 = jnp.zeros((1, GP), jnp.float32)
    biases = []
    for m in range(3):
        w_ih, w_hh, b_ih, b_hh = params[mods[m]][0]
        wT = jnp.transpose(w_ih)           # (in_m, 4H_m)
        fm = feats[m]
        # own modality input features
        w0 = scatter(w0, slice(x_off[m], x_off[m] + fm), m, wT[0:fm])
        # cross-modal last-layer hiddens (cat order matches the torch module)
        s1, s2 = cross[m]
        r = fm
        w0 = scatter(w0, slice(XP + h_off[s1], XP + h_off[s1] + Hs[s1]),
                     m, wT[r:r + Hs[s1]])
        r += Hs[s1]
        w0 = scatter(w0, slice(XP + h_off[s2], XP + h_off[s2] + Hs[s2]),
                     m, wT[r:r + Hs[s2]])
        # own layer-0 recurrent weights
        w0 = scatter(w0, slice(XP + HP + h_off[m], XP + HP + h_off[m] + Hs[m]),
                     m, jnp.transpose(w_hh))
        b0 = scatter_bias(b0, m, b_ih + b_hh)
    biases.append(b0)

    # ---- layers l > 0: rows = [prev-layer h (HP) | own-layer h (HP)]
    wrest = None
    if nlayers > 1:
        slabs = []
        for l in range(1, nlayers):
            wl = jnp.zeros((2 * HP, GP), jnp.float32)
            bl = jnp.zeros((1, GP), jnp.float32)
            for m in range(3):
                w_ih, w_hh, b_ih, b_hh = params[mods[m]][l]
                wl = scatter(wl, slice(h_off[m], h_off[m] + Hs[m]),
                             m, jnp.transpose(w_ih))
                wl = scatter(wl, slice(HP + h_off[m], HP + h_off[m] + Hs[m]),
                             m, jnp.transpose(w_hh))
                bl = scatter_bias(bl, m, b_ih + b_hh)
            slabs.append(wl)
            biases.append(bl)
        wrest = jnp.stack(slabs)           # (nlayers-1, 2HP, GP)

    b_all = jnp.stack(biases)              # (nlayers, 1, GP)

    Hsum = Ht + Hv + Ha
    wd = jnp.zeros((1, HP), jnp.float32).at[0, 0:Hsum].set(params["dec_w"][0])
    bd = params["dec_b"].reshape(1, 1).astype(jnp.float32)
    return w0, wrest, b_all, wd, bd


# -----------------------------------------------------------------------------
# Wrapper
# -----------------------------------------------------------------------------
def fclstm_pallas(t_in, v_in, a_in, params, nlayers, Ht, Hv, Ha):
    B, seq_len, T = t_in.shape
    V = v_in.shape[-1]
    A = a_in.shape[-1]
    HP = _rup(Ht + Hv + Ha)
    XP = _rup(T + V + A)
    GP = 4 * HP
    BP = _rup(B, 8)                        # pad batch to the 8-sublane tile

    # time-major, lane/batch-padded packed modality inputs, flattened so the
    # hoisted x-projection is a single (seq_len*BP, XP) @ (XP, GP) matmul.
    x_all = jnp.zeros((seq_len, BP, XP), jnp.float32)
    x_all = x_all.at[:, :B, 0:T].set(
        jnp.transpose(t_in, (1, 0, 2)).astype(jnp.float32))
    x_all = x_all.at[:, :B, T:T + V].set(
        jnp.transpose(v_in, (1, 0, 2)).astype(jnp.float32))
    x_all = x_all.at[:, :B, T + V:T + V + A].set(
        jnp.transpose(a_in, (1, 0, 2)).astype(jnp.float32))
    x_all = x_all.reshape(seq_len * BP, XP)

    w0, wrest, b_all, wd, bd = _build_slabs(
        params, (T, V, A), (Ht, Hv, Ha), nlayers, XP, HP)

    # split layer-0 slab into x-rows / recurrent rows; weights go to bf16
    # (MXU-native); biases, decoder row and h/c state stay f32.
    wx = w0[:XP].astype(jnp.bfloat16)                  # (XP, GP)
    wh0 = w0[XP:].astype(jnp.bfloat16)                 # (2*HP, GP)
    wrest_bf = wrest.astype(jnp.bfloat16) if nlayers > 1 else None

    inputs = [x_all, wx, wh0] + ([wrest_bf] if nlayers > 1 else []) \
        + [b_all, wd, bd]
    in_specs = [pl.BlockSpec(arr.shape, lambda i, nd=arr.ndim: (0,) * nd)
                for arr in inputs]
    out_specs = pl.BlockSpec((BP, 128), lambda i: (0, 0))

    flops = int(2 * seq_len * BP * XP * GP
                + seq_len * nlayers * 2 * BP * (2 * HP) * GP
                + 2 * BP * HP)
    transcend = int(seq_len * nlayers * BP * 5 * HP)
    bytes_acc = int(sum(int(a.size) * a.dtype.itemsize for a in inputs)
                    + BP * 128 * 4)

    kernel = partial(_fclstm_kernel, nlayers, seq_len, BP, HP)
    out = pl.pallas_call(
        kernel,
        out_shape=jax.ShapeDtypeStruct((BP, 128), jnp.float32),
        grid_spec=pltpu.PrefetchScalarGridSpec(
            num_scalar_prefetch=0,
            grid=(1,),
            in_specs=in_specs,
            out_specs=out_specs,
            scratch_shapes=[pltpu.VMEM((seq_len * BP, GP), jnp.float32)],
        ),
        compiler_params=pltpu.CompilerParams(
            dimension_semantics=("arbitrary",)),
        cost_estimate=pl.CostEstimate(
            flops=flops, transcendentals=transcend, bytes_accessed=bytes_acc),
    )(*inputs)
    return out[:B, 0:1]


# -----------------------------------------------------------------------------
# Pure-JAX reference (mirrors the PyTorch forward, eval-mode dropout)
# -----------------------------------------------------------------------------
def fclstm_reference(t_in, v_in, a_in, params, nlayers, Ht, Hv, Ha):
    B = t_in.shape[0]
    seq_len = t_in.shape[1]

    def zeros(H):
        return jnp.zeros((nlayers, B, H), jnp.float32)

    th, tc = zeros(Ht), zeros(Ht)
    vh, vc = zeros(Hv), zeros(Hv)
    ah, ac = zeros(Ha), zeros(Ha)

    def lstm(x, layers, h, c):
        H = h.shape[-1]
        inp = x
        hs, cs = [], []
        for l, (w_ih, w_hh, b_ih, b_hh) in enumerate(layers):
            gates = inp @ w_ih.T + h[l] @ w_hh.T + b_ih + b_hh
            i_g = jax.nn.sigmoid(gates[:, :H])
            f_g = jax.nn.sigmoid(gates[:, H:2 * H])
            g_g = jnp.tanh(gates[:, 2 * H:3 * H])
            o_g = jax.nn.sigmoid(gates[:, 3 * H:])
            c_new = f_g * c[l] + i_g * g_g
            h_new = o_g * jnp.tanh(c_new)
            hs.append(h_new)
            cs.append(c_new)
            inp = h_new
        return jnp.stack(hs), jnp.stack(cs)

    t_in = t_in.astype(jnp.float32)
    v_in = v_in.astype(jnp.float32)
    a_in = a_in.astype(jnp.float32)
    for i in range(seq_len):
        ht_f, hv_f, ha_f = th[-1], vh[-1], ah[-1]
        xt = jnp.concatenate([t_in[:, i, :], hv_f, ha_f], axis=-1)
        xv = jnp.concatenate([v_in[:, i, :], ht_f, ha_f], axis=-1)
        xa = jnp.concatenate([a_in[:, i, :], ht_f, hv_f], axis=-1)
        th, tc = lstm(xt, params["t"], th, tc)
        vh, vc = lstm(xv, params["v"], vh, vc)
        ah, ac = lstm(xa, params["a"], ah, ac)

    hidden = jnp.concatenate([th[-1], vh[-1], ah[-1]], axis=-1)
    return hidden @ params["dec_w"].T + params["dec_b"]


# -----------------------------------------------------------------------------
if __name__ == "__main__":
    B = 2
    seq_len = 6
    text_size, visual_size, acc_size = 12, 20, 8
    Ht, Hv, Ha = 16, 24, 8
    nlayers = 2

    key = jax.random.PRNGKey(0)
    kp, kt, kv, ka = jax.random.split(key, 4)
    params = init_params(kp, nlayers, text_size, visual_size, acc_size, Ht, Hv, Ha)

    t_in = jax.random.normal(kt, (B, seq_len, text_size), jnp.float32)
    v_in = jax.random.normal(kv, (B, seq_len, visual_size), jnp.float32)
    a_in = jax.random.normal(ka, (B, seq_len, acc_size), jnp.float32)

    out = fclstm_pallas(t_in, v_in, a_in, params, nlayers, Ht, Hv, Ha)
    out = jax.block_until_ready(out)

    ref = fclstm_reference(t_in, v_in, a_in, params, nlayers, Ht, Hv, Ha)
    ref = jax.block_until_ready(ref)

    assert out.shape == (B, 1), out.shape
    # bf16 weight slabs -> slightly looser tolerance than pure-f32.
    assert jnp.allclose(out, ref, rtol=3e-2, atol=3e-2), (out, ref)
    print("KERNEL_OK")
</pallas_src>

<mosaic_0001>
module attributes {stable_mosaic.version = 11 : i64} {
  func.func @_fclstm_kernel(%arg0: i32, %arg1: memref<48x128xf32, #tpu.memory_space<vmem>>, %arg2: memref<128x512xbf16, #tpu.memory_space<vmem>>, %arg3: memref<256x512xbf16, #tpu.memory_space<vmem>>, %arg4: memref<1x256x512xbf16, #tpu.memory_space<vmem>>, %arg5: memref<2x1x512xf32, #tpu.memory_space<vmem>>, %arg6: memref<1x128xf32, #tpu.memory_space<vmem>>, %arg7: memref<1x1xf32, #tpu.memory_space<vmem>>, %arg8: memref<8x128xf32, #tpu.memory_space<vmem>>, %arg9: memref<48x512xf32, #tpu.memory_space<vmem>>) attributes {dimension_semantics = [#tpu.dimension_semantics<arbitrary>], iteration_bounds = array<i64: 1>, scalar_prefetch = 0 : i64, scratch_operands = 1 : i64, tpu.core_type = #tpu.core_type<tc>, window_params = [{pipeline_mode = #tpu.pipeline_mode<synchronous>, transform_indices = @transform_0, window_bounds = array<i64: 48, 128>}, {pipeline_mode = #tpu.pipeline_mode<synchronous>, transform_indices = @transform_1, window_bounds = array<i64: 128, 512>}, {pipeline_mode = #tpu.pipeline_mode<synchronous>, transform_indices = @transform_2, window_bounds = array<i64: 256, 512>}, {pipeline_mode = #tpu.pipeline_mode<synchronous>, transform_indices = @transform_3, window_bounds = array<i64: 1, 256, 512>}, {pipeline_mode = #tpu.pipeline_mode<synchronous>, transform_indices = @transform_4, window_bounds = array<i64: 2, 1, 512>}, {pipeline_mode = #tpu.pipeline_mode<synchronous>, transform_indices = @transform_5, window_bounds = array<i64: 1, 128>}, {pipeline_mode = #tpu.pipeline_mode<synchronous>, transform_indices = @transform_6, window_bounds = array<i64: 1, 1>}, {pipeline_mode = #tpu.pipeline_mode<synchronous>, transform_indices = @transform_7, window_bounds = array<i64: 8, 128>}]} {
    %c0 = arith.constant 0 : index
    %c0_0 = arith.constant 0 : index
    %0 = vector.load %arg1[%c0, %c0_0] : memref<48x128xf32, #tpu.memory_space<vmem>>, vector<48x128xf32>
    %1 = arith.truncf %0 : vector<48x128xf32> to vector<48x128xbf16>
    %c0_1 = arith.constant 0 : index
    %c0_2 = arith.constant 0 : index
    %2 = vector.load %arg2[%c0_1, %c0_2] : memref<128x512xbf16, #tpu.memory_space<vmem>>, vector<128x512xbf16>
    %cst = arith.constant dense<0.000000e+00> : vector<48x512xf32>
    %3 = tpu.matmul %1, %2, %cst {dimension_numbers = #tpu.dot_dimension_numbers<[1], [0], [0], [1], [0, 0, 1, 1], [], []>} : vector<48x128xbf16>, vector<128x512xbf16>, vector<48x512xf32> -> vector<48x512xf32>
    %c0_3 = arith.constant 0 : index
    %c0_4 = arith.constant 0 : index
    %c0_5 = arith.constant 0 : index
    %4 = vector.load %arg5[%c0_3, %c0_4, %c0_5] : memref<2x1x512xf32, #tpu.memory_space<vmem>>, vector<1x1x512xf32>
    %5 = vector.shape_cast %4 : vector<1x1x512xf32> to vector<1x512xf32>
    %6 = vector.shape_cast %5 : vector<1x512xf32> to vector<1x512xf32>
    %7 = vector.broadcast %6 : vector<1x512xf32> to vector<48x512xf32>
    %8 = arith.addf %3, %7 : vector<48x512xf32>
    %c0_6 = arith.constant 0 : index
    %c0_7 = arith.constant 0 : index
    %9 = vector.load %arg9[%c0_6, %c0_7] : memref<48x512xf32, #tpu.memory_space<vmem>>, vector<48x512xf32>
    tpu.vector_store %arg9[%c0_6, %c0_7], %8 {strides = array<i32>} : memref<48x512xf32, #tpu.memory_space<vmem>>, vector<48x512xf32>,
    %c1 = arith.constant 1 : index
    %c0_8 = arith.constant 0 : index
    %c0_9 = arith.constant 0 : index
    %10 = vector.load %arg5[%c1, %c0_8, %c0_9] : memref<2x1x512xf32, #tpu.memory_space<vmem>>, vector<1x1x512xf32>
    %11 = vector.shape_cast %10 : vector<1x1x512xf32> to vector<1x512xf32>
    %12 = vector.shape_cast %11 : vector<1x512xf32> to vector<1x512xf32>
    %13 = vector.broadcast %12 : vector<1x512xf32> to vector<8x512xf32>
    %cst_10 = arith.constant 0.000000e+00 : f32
    %14 = vector.broadcast %cst_10 : f32 to vector<8x128xf32>
    %cst_11 = arith.constant 0.000000e+00 : f32
    %15 = vector.broadcast %cst_11 : f32 to vector<8x128xf32>
    %cst_12 = arith.constant 0.000000e+00 : f32
    %16 = vector.broadcast %cst_12 : f32 to vector<8x128xf32>
    %cst_13 = arith.constant 0.000000e+00 : f32
    %17 = vector.broadcast %cst_13 : f32 to vector<8x128xf32>
    %18 = tpu.concatenate %15, %14 in 1 : vector<8x128xf32>, vector<8x128xf32> -> vector<8x256xf32>
    %c0_14 = arith.constant 0 : index
    %c0_15 = arith.constant 0 : index
    %19 = vector.load %arg9[%c0_14, %c0_15] : memref<48x512xf32, #tpu.memory_space<vmem>>, vector<8x512xf32>
    %c0_16 = arith.constant 0 : index
    %c0_17 = arith.constant 0 : index
    %20 = vector.load %arg3[%c0_16, %c0_17] : memref<256x512xbf16, #tpu.memory_space<vmem>>, vector<256x512xbf16>
    %21 = arith.truncf %18 : vector<8x256xf32> to vector<8x256xbf16>
    %cst_18 = arith.constant dense<0.000000e+00> : vector<8x512xf32>
    %22 = tpu.matmul %21, %20, %cst_18 {dimension_numbers = #tpu.dot_dimension_numbers<[1], [0], [0], [1], [0, 0, 1, 1], [], []>} : vector<8x256xbf16>, vector<256x512xbf16>, vector<8x512xf32> -> vector<8x512xf32>
    %23 = arith.addf %22, %19 : vector<8x512xf32>
    %24 = vector.extract_strided_slice %23 {offsets = [0, 0], sizes = [8, 384], strides = [1, 1]} : vector<8x512xf32> to vector<8x384xf32>
    %25 = arith.negf %24 : vector<8x384xf32>
    %26 = math.exp %25 : vector<8x384xf32>
    %cst_19 = arith.constant 1.000000e+00 : f32
    %27 = vector.broadcast %cst_19 : f32 to vector<8x384xf32>
    %28 = arith.addf %27, %26 : vector<8x384xf32>
    %29 = arith.divf %27, %28 : vector<8x384xf32>
    %30 = vector.extract_strided_slice %23 {offsets = [0, 384], sizes = [8, 128], strides = [1, 1]} : vector<8x512xf32> to vector<8x128xf32>
    %31 = math.tanh %30 : vector<8x128xf32>
    %32 = vector.extract_strided_slice %29 {offsets = [0, 0], sizes = [8, 128], strides = [1, 1]} : vector<8x384xf32> to vector<8x128xf32>
    %33 = vector.extract_strided_slice %29 {offsets = [0, 128], sizes = [8, 128], strides = [1, 1]} : vector<8x384xf32> to vector<8x128xf32>
    %34 = vector.extract_strided_slice %29 {offsets = [0, 256], sizes = [8, 128], strides = [1, 1]} : vector<8x384xf32> to vector<8x128xf32>
    %35 = arith.mulf %33, %16 : vector<8x128xf32>
    %36 = arith.mulf %32, %31 : vector<8x128xf32>
    %37 = arith.addf %35, %36 : vector<8x128xf32>
    %38 = math.tanh %37 : vector<8x128xf32>
    %39 = arith.mulf %34, %38 : vector<8x128xf32>
    %40 = tpu.concatenate %39, %15 in 1 : vector<8x128xf32>, vector<8x128xf32> -> vector<8x256xf32>
    %c0_20 = arith.constant 0 : index
    %c0_21 = arith.constant 0 : index
    %c0_22 = arith.constant 0 : index
    %41 = vector.load %arg4[%c0_20, %c0_21, %c0_22] : memref<1x256x512xbf16, #tpu.memory_space<vmem>>, vector<1x256x512xbf16>
    %42 = vector.shape_cast %41 : vector<1x256x512xbf16> to vector<256x512xbf16>
    %43 = arith.truncf %40 : vector<8x256xf32> to vector<8x256xbf16>
    %cst_23 = arith.constant dense<0.000000e+00> : vector<8x512xf32>
    %44 = tpu.matmul %43, %42, %cst_23 {dimension_numbers = #tpu.dot_dimension_numbers<[1], [0], [0], [1], [0, 0, 1, 1], [], []>} : vector<8x256xbf16>, vector<256x512xbf16>, vector<8x512xf32> -> vector<8x512xf32>
    %45 = arith.addf %44, %13 : vector<8x512xf32>
    %46 = vector.extract_strided_slice %45 {offsets = [0, 0], sizes = [8, 384], strides = [1, 1]} : vector<8x512xf32> to vector<8x384xf32>
    %47 = arith.negf %46 : vector<8x384xf32>
    %48 = math.exp %47 : vector<8x384xf32>
    %cst_24 = arith.constant 1.000000e+00 : f32
    %49 = vector.broadcast %cst_24 : f32 to vector<8x384xf32>
    %50 = arith.addf %49, %48 : vector<8x384xf32>
    %51 = arith.divf %49, %50 : vector<8x384xf32>
    %52 = vector.extract_strided_slice %45 {offsets = [0, 384], sizes = [8, 128], strides = [1, 1]} : vector<8x512xf32> to vector<8x128xf32>
    %53 = math.tanh %52 : vector<8x128xf32>
    %54 = vector.extract_strided_slice %51 {offsets = [0, 0], sizes = [8, 128], strides = [1, 1]} : vector<8x384xf32> to vector<8x128xf32>
    %55 = vector.extract_strided_slice %51 {offsets = [0, 128], sizes = [8, 128], strides = [1, 1]} : vector<8x384xf32> to vector<8x128xf32>
    %56 = vector.extract_strided_slice %51 {offsets = [0, 256], sizes = [8, 128], strides = [1, 1]} : vector<8x384xf32> to vector<8x128xf32>
    %57 = arith.mulf %55, %17 : vector<8x128xf32>
    %58 = arith.mulf %54, %53 : vector<8x128xf32>
    %59 = arith.addf %57, %58 : vector<8x128xf32>
    %60 = math.tanh %59 : vector<8x128xf32>
    %61 = arith.mulf %56, %60 : vector<8x128xf32>
    %62 = tpu.concatenate %61, %39 in 1 : vector<8x128xf32>, vector<8x128xf32> -> vector<8x256xf32>
    %c8 = arith.constant 8 : index
    %c0_25 = arith.constant 0 : index
    %63 = vector.load %arg9[%c8, %c0_25] : memref<48x512xf32, #tpu.memory_space<vmem>>, vector<8x512xf32>
    %c0_26 = arith.constant 0 : index
    %c0_27 = arith.constant 0 : index
    %64 = vector.load %arg3[%c0_26, %c0_27] : memref<256x512xbf16, #tpu.memory_space<vmem>>, vector<256x512xbf16>
    %65 = arith.truncf %62 : vector<8x256xf32> to vector<8x256xbf16>
    %cst_28 = arith.constant dense<0.000000e+00> : vector<8x512xf32>
    %66 = tpu.matmul %65, %64, %cst_28 {dimension_numbers = #tpu.dot_dimension_numbers<[1], [0], [0], [1], [0, 0, 1, 1], [], []>} : vector<8x256xbf16>, vector<256x512xbf16>, vector<8x512xf32> -> vector<8x512xf32>
    %67 = arith.addf %66, %63 : vector<8x512xf32>
    %68 = vector.extract_strided_slice %67 {offsets = [0, 0], sizes = [8, 384], strides = [1, 1]} : vector<8x512xf32> to vector<8x384xf32>
    %69 = arith.negf %68 : vector<8x384xf32>
    %70 = math.exp %69 : vector<8x384xf32>
    %cst_29 = arith.constant 1.000000e+00 : f32
    %71 = vector.broadcast %cst_29 : f32 to vector<8x384xf32>
    %72 = arith.addf %71, %70 : vector<8x384xf32>
    %73 = arith.divf %71, %72 : vector<8x384xf32>
    %74 = vector.extract_strided_slice %67 {offsets = [0, 384], sizes = [8, 128], strides = [1, 1]} : vector<8x512xf32> to vector<8x128xf32>
    %75 = math.tanh %74 : vector<8x128xf32>
    %76 = vector.extract_strided_slice %73 {offsets = [0, 0], sizes = [8, 128], strides = [1, 1]} : vector<8x384xf32> to vector<8x128xf32>
    %77 = vector.extract_strided_slice %73 {offsets = [0, 128], sizes = [8, 128], strides = [1, 1]} : vector<8x384xf32> to vector<8x128xf32>
    %78 = vector.extract_strided_slice %73 {offsets = [0, 256], sizes = [8, 128], strides = [1, 1]} : vector<8x384xf32> to vector<8x128xf32>
    %79 = arith.mulf %77, %37 : vector<8x128xf32>
    %80 = arith.mulf %76, %75 : vector<8x128xf32>
    %81 = arith.addf %79, %80 : vector<8x128xf32>
    %82 = math.tanh %81 : vector<8x128xf32>
    %83 = arith.mulf %78, %82 : vector<8x128xf32>
    %84 = tpu.concatenate %83, %61 in 1 : vector<8x128xf32>, vector<8x128xf32> -> vector<8x256xf32>
    %c0_30 = arith.constant 0 : index
    %c0_31 = arith.constant 0 : index
    %c0_32 = arith.constant 0 : index
    %85 = vector.load %arg4[%c0_30, %c0_31, %c0_32] : memref<1x256x512xbf16, #tpu.memory_space<vmem>>, vector<1x256x512xbf16>
    %86 = vector.shape_cast %85 : vector<1x256x512xbf16> to vector<256x512xbf16>
    %87 = arith.truncf %84 : vector<8x256xf32> to vector<8x256xbf16>
    %cst_33 = arith.constant dense<0.000000e+00> : vector<8x512xf32>
    %88 = tpu.matmul %87, %86, %cst_33 {dimension_numbers = #tpu.dot_dimension_numbers<[1], [0], [0], [1], [0, 0, 1, 1], [], []>} : vector<8x256xbf16>, vector<256x512xbf16>, vector<8x512xf32> -> vector<8x512xf32>
    %89 = arith.addf %88, %13 : vector<8x512xf32>
    %90 = vector.extract_strided_slice %89 {offsets = [0, 0], sizes = [8, 384], strides = [1, 1]} : vector<8x512xf32> to vector<8x384xf32>
    %91 = arith.negf %90 : vector<8x384xf32>
    %92 = math.exp %91 : vector<8x384xf32>
    %cst_34 = arith.constant 1.000000e+00 : f32
    %93 = vector.broadcast %cst_34 : f32 to vector<8x384xf32>
    %94 = arith.addf %93, %92 : vector<8x384xf32>
    %95 = arith.divf %93, %94 : vector<8x384xf32>
    %96 = vector.extract_strided_slice %89 {offsets = [0, 384], sizes = [8, 128], strides = [1, 1]} : vector<8x512xf32> to vector<8x128xf32>
    %97 = math.tanh %96 : vector<8x128xf32>
    %98 = vector.extract_strided_slice %95 {offsets = [0, 0], sizes = [8, 128], strides = [1, 1]} : vector<8x384xf32> to vector<8x128xf32>
    %99 = vector.extract_strided_slice %95 {offsets = [0, 128], sizes = [8, 128], strides = [1, 1]} : vector<8x384xf32> to vector<8x128xf32>
    %100 = vector.extract_strided_slice %95 {offsets = [0, 256], sizes = [8, 128], strides = [1, 1]} : vector<8x384xf32> to vector<8x128xf32>
    %101 = arith.mulf %99, %59 : vector<8x128xf32>
    %102 = arith.mulf %98, %97 : vector<8x128xf32>
    %103 = arith.addf %101, %102 : vector<8x128xf32>
    %104 = math.tanh %103 : vector<8x128xf32>
    %105 = arith.mulf %100, %104 : vector<8x128xf32>
    %106 = tpu.concatenate %105, %83 in 1 : vector<8x128xf32>, vector<8x128xf32> -> vector<8x256xf32>
    %c16 = arith.constant 16 : index
    %c0_35 = arith.constant 0 : index
    %107 = vector.load %arg9[%c16, %c0_35] : memref<48x512xf32, #tpu.memory_space<vmem>>, vector<8x512xf32>
    %c0_36 = arith.constant 0 : index
    %c0_37 = arith.constant 0 : index
    %108 = vector.load %arg3[%c0_36, %c0_37] : memref<256x512xbf16, #tpu.memory_space<vmem>>, vector<256x512xbf16>
    %109 = arith.truncf %106 : vector<8x256xf32> to vector<8x256xbf16>
    %cst_38 = arith.constant dense<0.000000e+00> : vector<8x512xf32>
    %110 = tpu.matmul %109, %108, %cst_38 {dimension_numbers = #tpu.dot_dimension_numbers<[1], [0], [0], [1], [0, 0, 1, 1], [], []>} : vector<8x256xbf16>, vector<256x512xbf16>, vector<8x512xf32> -> vector<8x512xf32>
    %111 = arith.addf %110, %107 : vector<8x512xf32>
    %112 = vector.extract_strided_slice %111 {offsets = [0, 0], sizes = [8, 384], strides = [1, 1]} : vector<8x512xf32> to vector<8x384xf32>
    %113 = arith.negf %112 : vector<8x384xf32>
    %114 = math.exp %113 : vector<8x384xf32>
    %cst_39 = arith.constant 1.000000e+00 : f32
    %115 = vector.broadcast %cst_39 : f32 to vector<8x384xf32>
    %116 = arith.addf %115, %114 : vector<8x384xf32>
    %117 = arith.divf %115, %116 : vector<8x384xf32>
    %118 = vector.extract_strided_slice %111 {offsets = [0, 384], sizes = [8, 128], strides = [1, 1]} : vector<8x512xf32> to vector<8x128xf32>
    %119 = math.tanh %118 : vector<8x128xf32>
    %120 = vector.extract_strided_slice %117 {offsets = [0, 0], sizes = [8, 128], strides = [1, 1]} : vector<8x384xf32> to vector<8x128xf32>
    %121 = vector.extract_strided_slice %117 {offsets = [0, 128], sizes = [8, 128], strides = [1, 1]} : vector<8x384xf32> to vector<8x128xf32>
    %122 = vector.extract_strided_slice %117 {offsets = [0, 256], sizes = [8, 128], strides = [1, 1]} : vector<8x384xf32> to vector<8x128xf32>
    %123 = arith.mulf %121, %81 : vector<8x128xf32>
    %124 = arith.mulf %120, %119 : vector<8x128xf32>
    %125 = arith.addf %123, %124 : vector<8x128xf32>
    %126 = math.tanh %125 : vector<8x128xf32>
    %127 = arith.mulf %122, %126 : vector<8x128xf32>
    %128 = tpu.concatenate %127, %105 in 1 : vector<8x128xf32>, vector<8x128xf32> -> vector<8x256xf32>
    %c0_40 = arith.constant 0 : index
    %c0_41 = arith.constant 0 : index
    %c0_42 = arith.constant 0 : index
    %129 = vector.load %arg4[%c0_40, %c0_41, %c0_42] : memref<1x256x512xbf16, #tpu.memory_space<vmem>>, vector<1x256x512xbf16>
    %130 = vector.shape_cast %129 : vector<1x256x512xbf16> to vector<256x512xbf16>
    %131 = arith.truncf %128 : vector<8x256xf32> to vector<8x256xbf16>
    %cst_43 = arith.constant dense<0.000000e+00> : vector<8x512xf32>
    %132 = tpu.matmul %131, %130, %cst_43 {dimension_numbers = #tpu.dot_dimension_numbers<[1], [0], [0], [1], [0, 0, 1, 1], [], []>} : vector<8x256xbf16>, vector<256x512xbf16>, vector<8x512xf32> -> vector<8x512xf32>
    %133 = arith.addf %132, %13 : vector<8x512xf32>
    %134 = vector.extract_strided_slice %133 {offsets = [0, 0], sizes = [8, 384], strides = [1, 1]} : vector<8x512xf32> to vector<8x384xf32>
    %135 = arith.negf %134 : vector<8x384xf32>
    %136 = math.exp %135 : vector<8x384xf32>
    %cst_44 = arith.constant 1.000000e+00 : f32
    %137 = vector.broadcast %cst_44 : f32 to vector<8x384xf32>
    %138 = arith.addf %137, %136 : vector<8x384xf32>
    %139 = arith.divf %137, %138 : vector<8x384xf32>
    %140 = vector.extract_strided_slice %133 {offsets = [0, 384], sizes = [8, 128], strides = [1, 1]} : vector<8x512xf32> to vector<8x128xf32>
    %141 = math.tanh %140 : vector<8x128xf32>
    %142 = vector.extract_strided_slice %139 {offsets = [0, 0], sizes = [8, 128], strides = [1, 1]} : vector<8x384xf32> to vector<8x128xf32>
    %143 = vector.extract_strided_slice %139 {offsets = [0, 128], sizes = [8, 128], strides = [1, 1]} : vector<8x384xf32> to vector<8x128xf32>
    %144 = vector.extract_strided_slice %139 {offsets = [0, 256], sizes = [8, 128], strides = [1, 1]} : vector<8x384xf32> to vector<8x128xf32>
    %145 = arith.mulf %143, %103 : vector<8x128xf32>
    %146 = arith.mulf %142, %141 : vector<8x128xf32>
    %147 = arith.addf %145, %146 : vector<8x128xf32>
    %148 = math.tanh %147 : vector<8x128xf32>
    %149 = arith.mulf %144, %148 : vector<8x128xf32>
    %150 = tpu.concatenate %149, %127 in 1 : vector<8x128xf32>, vector<8x128xf32> -> vector<8x256xf32>
    %c24 = arith.constant 24 : index
    %c0_45 = arith.constant 0 : index
    %151 = vector.load %arg9[%c24, %c0_45] : memref<48x512xf32, #tpu.memory_space<vmem>>, vector<8x512xf32>
    %c0_46 = arith.constant 0 : index
    %c0_47 = arith.constant 0 : index
    %152 = vector.load %arg3[%c0_46, %c0_47] : memref<256x512xbf16, #tpu.memory_space<vmem>>, vector<256x512xbf16>
    %153 = arith.truncf %150 : vector<8x256xf32> to vector<8x256xbf16>
    %cst_48 = arith.constant dense<0.000000e+00> : vector<8x512xf32>
    %154 = tpu.matmul %153, %152, %cst_48 {dimension_numbers = #tpu.dot_dimension_numbers<[1], [0], [0], [1], [0, 0, 1, 1], [], []>} : vector<8x256xbf16>, vector<256x512xbf16>, vector<8x512xf32> -> vector<8x512xf32>
    %155 = arith.addf %154, %151 : vector<8x512xf32>
    %156 = vector.extract_strided_slice %155 {offsets = [0, 0], sizes = [8, 384], strides = [1, 1]} : vector<8x512xf32> to vector<8x384xf32>
    %157 = arith.negf %156 : vector<8x384xf32>
    %158 = math.exp %157 : vector<8x384xf32>
    %cst_49 = arith.constant 1.000000e+00 : f32
    %159 = vector.broadcast %cst_49 : f32 to vector<8x384xf32>
    %160 = arith.addf %159, %158 : vector<8x384xf32>
    %161 = arith.divf %159, %160 : vector<8x384xf32>
    %162 = vector.extract_strided_slice %155 {offsets = [0, 384], sizes = [8, 128], strides = [1, 1]} : vector<8x512xf32> to vector<8x128xf32>
    %163 = math.tanh %162 : vector<8x128xf32>
    %164 = vector.extract_strided_slice %161 {offsets = [0, 0], sizes = [8, 128], strides = [1, 1]} : vector<8x384xf32> to vector<8x128xf32>
    %165 = vector.extract_strided_slice %161 {offsets = [0, 128], sizes = [8, 128], strides = [1, 1]} : vector<8x384xf32> to vector<8x128xf32>
    %166 = vector.extract_strided_slice %161 {offsets = [0, 256], sizes = [8, 128], strides = [1, 1]} : vector<8x384xf32> to vector<8x128xf32>
    %167 = arith.mulf %165, %125 : vector<8x128xf32>
    %168 = arith.mulf %164, %163 : vector<8x128xf32>
    %169 = arith.addf %167, %168 : vector<8x128xf32>
    %170 = math.tanh %169 : vector<8x128xf32>
    %171 = arith.mulf %166, %170 : vector<8x128xf32>
    %172 = tpu.concatenate %171, %149 in 1 : vector<8x128xf32>, vector<8x128xf32> -> vector<8x256xf32>
    %c0_50 = arith.constant 0 : index
    %c0_51 = arith.constant 0 : index
    %c0_52 = arith.constant 0 : index
    %173 = vector.load %arg4[%c0_50, %c0_51, %c0_52] : memref<1x256x512xbf16, #tpu.memory_space<vmem>>, vector<1x256x512xbf16>
    %174 = vector.shape_cast %173 : vector<1x256x512xbf16> to vector<256x512xbf16>
    %175 = arith.truncf %172 : vector<8x256xf32> to vector<8x256xbf16>
    %cst_53 = arith.constant dense<0.000000e+00> : vector<8x512xf32>
    %176 = tpu.matmul %175, %174, %cst_53 {dimension_numbers = #tpu.dot_dimension_numbers<[1], [0], [0], [1], [0, 0, 1, 1], [], []>} : vector<8x256xbf16>, vector<256x512xbf16>, vector<8x512xf32> -> vector<8x512xf32>
    %177 = arith.addf %176, %13 : vector<8x512xf32>
    %178 = vector.extract_strided_slice %177 {offsets = [0, 0], sizes = [8, 384], strides = [1, 1]} : vector<8x512xf32> to vector<8x384xf32>
    %179 = arith.negf %178 : vector<8x384xf32>
    %180 = math.exp %179 : vector<8x384xf32>
    %cst_54 = arith.constant 1.000000e+00 : f32
    %181 = vector.broadcast %cst_54 : f32 to vector<8x384xf32>
    %182 = arith.addf %181, %180 : vector<8x384xf32>
    %183 = arith.divf %181, %182 : vector<8x384xf32>
    %184 = vector.extract_strided_slice %177 {offsets = [0, 384], sizes = [8, 128], strides = [1, 1]} : vector<8x512xf32> to vector<8x128xf32>
    %185 = math.tanh %184 : vector<8x128xf32>
    %186 = vector.extract_strided_slice %183 {offsets = [0, 0], sizes = [8, 128], strides = [1, 1]} : vector<8x384xf32> to vector<8x128xf32>
    %187 = vector.extract_strided_slice %183 {offsets = [0, 128], sizes = [8, 128], strides = [1, 1]} : vector<8x384xf32> to vector<8x128xf32>
    %188 = vector.extract_strided_slice %183 {offsets = [0, 256], sizes = [8, 128], strides = [1, 1]} : vector<8x384xf32> to vector<8x128xf32>
    %189 = arith.mulf %187, %147 : vector<8x128xf32>
    %190 = arith.mulf %186, %185 : vector<8x128xf32>
    %191 = arith.addf %189, %190 : vector<8x128xf32>
    %192 = math.tanh %191 : vector<8x128xf32>
    %193 = arith.mulf %188, %192 : vector<8x128xf32>
    %194 = tpu.concatenate %193, %171 in 1 : vector<8x128xf32>, vector<8x128xf32> -> vector<8x256xf32>
    %c32 = arith.constant 32 : index
    %c0_55 = arith.constant 0 : index
    %195 = vector.load %arg9[%c32, %c0_55] : memref<48x512xf32, #tpu.memory_space<vmem>>, vector<8x512xf32>
    %c0_56 = arith.constant 0 : index
    %c0_57 = arith.constant 0 : index
    %196 = vector.load %arg3[%c0_56, %c0_57] : memref<256x512xbf16, #tpu.memory_space<vmem>>, vector<256x512xbf16>
    %197 = arith.truncf %194 : vector<8x256xf32> to vector<8x256xbf16>
    %cst_58 = arith.constant dense<0.000000e+00> : vector<8x512xf32>
    %198 = tpu.matmul %197, %196, %cst_58 {dimension_numbers = #tpu.dot_dimension_numbers<[1], [0], [0], [1], [0, 0, 1, 1], [], []>} : vector<8x256xbf16>, vector<256x512xbf16>, vector<8x512xf32> -> vector<8x512xf32>
    %199 = arith.addf %198, %195 : vector<8x512xf32>
    %200 = vector.extract_strided_slice %199 {offsets = [0, 0], sizes = [8, 384], strides = [1, 1]} : vector<8x512xf32> to vector<8x384xf32>
    %201 = arith.negf %200 : vector<8x384xf32>
    %202 = math.exp %201 : vector<8x384xf32>
    %cst_59 = arith.constant 1.000000e+00 : f32
    %203 = vector.broadcast %cst_59 : f32 to vector<8x384xf32>
    %204 = arith.addf %203, %202 : vector<8x384xf32>
    %205 = arith.divf %203, %204 : vector<8x384xf32>
    %206 = vector.extract_strided_slice %199 {offsets = [0, 384], sizes = [8, 128], strides = [1, 1]} : vector<8x512xf32> to vector<8x128xf32>
    %207 = math.tanh %206 : vector<8x128xf32>
    %208 = vector.extract_strided_slice %205 {offsets = [0, 0], sizes = [8, 128], strides = [1, 1]} : vector<8x384xf32> to vector<8x128xf32>
    %209 = vector.extract_strided_slice %205 {offsets = [0, 128], sizes = [8, 128], strides = [1, 1]} : vector<8x384xf32> to vector<8x128xf32>
    %210 = vector.extract_strided_slice %205 {offsets = [0, 256], sizes = [8, 128], strides = [1, 1]} : vector<8x384xf32> to vector<8x128xf32>
    %211 = arith.mulf %209, %169 : vector<8x128xf32>
    %212 = arith.mulf %208, %207 : vector<8x128xf32>
    %213 = arith.addf %211, %212 : vector<8x128xf32>
    %214 = math.tanh %213 : vector<8x128xf32>
    %215 = arith.mulf %210, %214 : vector<8x128xf32>
    %216 = tpu.concatenate %215, %193 in 1 : vector<8x128xf32>, vector<8x128xf32> -> vector<8x256xf32>
    %c0_60 = arith.constant 0 : index
    %c0_61 = arith.constant 0 : index
    %c0_62 = arith.constant 0 : index
    %217 = vector.load %arg4[%c0_60, %c0_61, %c0_62] : memref<1x256x512xbf16, #tpu.memory_space<vmem>>, vector<1x256x512xbf16>
    %218 = vector.shape_cast %217 : vector<1x256x512xbf16> to vector<256x512xbf16>
    %219 = arith.truncf %216 : vector<8x256xf32> to vector<8x256xbf16>
    %cst_63 = arith.constant dense<0.000000e+00> : vector<8x512xf32>
    %220 = tpu.matmul %219, %218, %cst_63 {dimension_numbers = #tpu.dot_dimension_numbers<[1], [0], [0], [1], [0, 0, 1, 1], [], []>} : vector<8x256xbf16>, vector<256x512xbf16>, vector<8x512xf32> -> vector<8x512xf32>
    %221 = arith.addf %220, %13 : vector<8x512xf32>
    %222 = vector.extract_strided_slice %221 {offsets = [0, 0], sizes = [8, 384], strides = [1, 1]} : vector<8x512xf32> to vector<8x384xf32>
    %223 = arith.negf %222 : vector<8x384xf32>
    %224 = math.exp %223 : vector<8x384xf32>
    %cst_64 = arith.constant 1.000000e+00 : f32
    %225 = vector.broadcast %cst_64 : f32 to vector<8x384xf32>
    %226 = arith.addf %225, %224 : vector<8x384xf32>
    %227 = arith.divf %225, %226 : vector<8x384xf32>
    %228 = vector.extract_strided_slice %221 {offsets = [0, 384], sizes = [8, 128], strides = [1, 1]} : vector<8x512xf32> to vector<8x128xf32>
    %229 = math.tanh %228 : vector<8x128xf32>
    %230 = vector.extract_strided_slice %227 {offsets = [0, 0], sizes = [8, 128], strides = [1, 1]} : vector<8x384xf32> to vector<8x128xf32>
    %231 = vector.extract_strided_slice %227 {offsets = [0, 128], sizes = [8, 128], strides = [1, 1]} : vector<8x384xf32> to vector<8x128xf32>
    %232 = vector.extract_strided_slice %227 {offsets = [0, 256], sizes = [8, 128], strides = [1, 1]} : vector<8x384xf32> to vector<8x128xf32>
    %233 = arith.mulf %231, %191 : vector<8x128xf32>
    %234 = arith.mulf %230, %229 : vector<8x128xf32>
    %235 = arith.addf %233, %234 : vector<8x128xf32>
    %236 = math.tanh %235 : vector<8x128xf32>
    %237 = arith.mulf %232, %236 : vector<8x128xf32>
    %238 = tpu.concatenate %237, %215 in 1 : vector<8x128xf32>, vector<8x128xf32> -> vector<8x256xf32>
    %c40 = arith.constant 40 : index
    %c0_65 = arith.constant 0 : index
    %239 = vector.load %arg9[%c40, %c0_65] : memref<48x512xf32, #tpu.memory_space<vmem>>, vector<8x512xf32>
    %c0_66 = arith.constant 0 : index
    %c0_67 = arith.constant 0 : index
    %240 = vector.load %arg3[%c0_66, %c0_67] : memref<256x512xbf16, #tpu.memory_space<vmem>>, vector<256x512xbf16>
    %241 = arith.truncf %238 : vector<8x256xf32> to vector<8x256xbf16>
    %cst_68 = arith.constant dense<0.000000e+00> : vector<8x512xf32>
    %242 = tpu.matmul %241, %240, %cst_68 {dimension_numbers = #tpu.dot_dimension_numbers<[1], [0], [0], [1], [0, 0, 1, 1], [], []>} : vector<8x256xbf16>, vector<256x512xbf16>, vector<8x512xf32> -> vector<8x512xf32>
    %243 = arith.addf %242, %239 : vector<8x512xf32>
    %244 = vector.extract_strided_slice %243 {offsets = [0, 0], sizes = [8, 384], strides = [1, 1]} : vector<8x512xf32> to vector<8x384xf32>
    %245 = arith.negf %244 : vector<8x384xf32>
    %246 = math.exp %245 : vector<8x384xf32>
    %cst_69 = arith.constant 1.000000e+00 : f32
    %247 = vector.broadcast %cst_69 : f32 to vector<8x384xf32>
    %248 = arith.addf %247, %246 : vector<8x384xf32>
    %249 = arith.divf %247, %248 : vector<8x384xf32>
    %250 = vector.extract_strided_slice %243 {offsets = [0, 384], sizes = [8, 128], strides = [1, 1]} : vector<8x512xf32> to vector<8x128xf32>
    %251 = math.tanh %250 : vector<8x128xf32>
    %252 = vector.extract_strided_slice %249 {offsets = [0, 0], sizes = [8, 128], strides = [1, 1]} : vector<8x384xf32> to vector<8x128xf32>
    %253 = vector.extract_strided_slice %249 {offsets = [0, 128], sizes = [8, 128], strides = [1, 1]} : vector<8x384xf32> to vector<8x128xf32>
    %254 = vector.extract_strided_slice %249 {offsets = [0, 256], sizes = [8, 128], strides = [1, 1]} : vector<8x384xf32> to vector<8x128xf32>
    %255 = arith.mulf %253, %213 : vector<8x128xf32>
    %256 = arith.mulf %252, %251 : vector<8x128xf32>
    %257 = arith.addf %255, %256 : vector<8x128xf32>
    %258 = math.tanh %257 : vector<8x128xf32>
    %259 = arith.mulf %254, %258 : vector<8x128xf32>
    %260 = tpu.concatenate %259, %237 in 1 : vector<8x128xf32>, vector<8x128xf32> -> vector<8x256xf32>
    %c0_70 = arith.constant 0 : index
    %c0_71 = arith.constant 0 : index
    %c0_72 = arith.constant 0 : index
    %261 = vector.load %arg4[%c0_70, %c0_71, %c0_72] : memref<1x256x512xbf16, #tpu.memory_space<vmem>>, vector<1x256x512xbf16>
    %262 = vector.shape_cast %261 : vector<1x256x512xbf16> to vector<256x512xbf16>
    %263 = arith.truncf %260 : vector<8x256xf32> to vector<8x256xbf16>
    %cst_73 = arith.constant dense<0.000000e+00> : vector<8x512xf32>
    %264 = tpu.matmul %263, %262, %cst_73 {dimension_numbers = #tpu.dot_dimension_numbers<[1], [0], [0], [1], [0, 0, 1, 1], [], []>} : vector<8x256xbf16>, vector<256x512xbf16>, vector<8x512xf32> -> vector<8x512xf32>
    %265 = arith.addf %264, %13 : vector<8x512xf32>
    %266 = vector.extract_strided_slice %265 {offsets = [0, 0], sizes = [8, 384], strides = [1, 1]} : vector<8x512xf32> to vector<8x384xf32>
    %267 = arith.negf %266 : vector<8x384xf32>
    %268 = math.exp %267 : vector<8x384xf32>
    %cst_74 = arith.constant 1.000000e+00 : f32
    %269 = vector.broadcast %cst_74 : f32 to vector<8x384xf32>
    %270 = arith.addf %269, %268 : vector<8x384xf32>
    %271 = arith.divf %269, %270 : vector<8x384xf32>
    %272 = vector.extract_strided_slice %265 {offsets = [0, 384], sizes = [8, 128], strides = [1, 1]} : vector<8x512xf32> to vector<8x128xf32>
    %273 = math.tanh %272 : vector<8x128xf32>
    %274 = vector.extract_strided_slice %271 {offsets = [0, 0], sizes = [8, 128], strides = [1, 1]} : vector<8x384xf32> to vector<8x128xf32>
    %275 = vector.extract_strided_slice %271 {offsets = [0, 128], sizes = [8, 128], strides = [1, 1]} : vector<8x384xf32> to vector<8x128xf32>
    %276 = vector.extract_strided_slice %271 {offsets = [0, 256], sizes = [8, 128], strides = [1, 1]} : vector<8x384xf32> to vector<8x128xf32>
    %277 = arith.mulf %275, %235 : vector<8x128xf32>
    %278 = arith.mulf %274, %273 : vector<8x128xf32>
    %279 = arith.addf %277, %278 : vector<8x128xf32>
    %280 = math.tanh %279 : vector<8x128xf32>
    %281 = arith.mulf %276, %280 : vector<8x128xf32>
    %c0_75 = arith.constant 0 : index
    %c0_76 = arith.constant 0 : index
    %282 = vector.load %arg6[%c0_75, %c0_76] : memref<1x128xf32, #tpu.memory_space<vmem>>, vector<1x128xf32>
    %283 = vector.broadcast %282 : vector<1x128xf32> to vector<8x128xf32>
    %284 = arith.mulf %281, %283 : vector<8x128xf32>
    %cst_77 = arith.constant dense<0.000000e+00> : vector<8xf32>
    %285 = vector.multi_reduction <add>, %284, %cst_77 [1] : vector<8x128xf32> to vector<8xf32>
    %286 = vector.shape_cast %285 : vector<8xf32> to vector<8x1xf32>
    %c0_78 = arith.constant 0 : index
    %c0_79 = arith.constant 0 : index
    %287 = vector.load %arg7[%c0_78, %c0_79] : memref<1x1xf32, #tpu.memory_space<vmem>>, vector<1x1xf32>
    %288 = vector.broadcast %287 : vector<1x1xf32> to vector<8x1xf32>
    %289 = arith.addf %286, %288 : vector<8x1xf32>
    %290 = vector.shape_cast %289 : vector<8x1xf32> to vector<8x1xf32>
    %291 = vector.broadcast %290 : vector<8x1xf32> to vector<8x128xf32>
    %c0_80 = arith.constant 0 : index
    %c0_81 = arith.constant 0 : index
    %292 = vector.load %arg8[%c0_80, %c0_81] : memref<8x128xf32, #tpu.memory_space<vmem>>, vector<8x128xf32>
    tpu.vector_store %arg8[%c0_80, %c0_81], %291 {strides = array<i32>} : memref<8x128xf32, #tpu.memory_space<vmem>>, vector<8x128xf32>,
    return
  }
  func.func @transform_0(%arg0: i32) -> (i32, i32) {
    %c0_i32 = arith.constant 0 : i32
    %c0_i32_0 = arith.constant 0 : i32
    %c0_i32_1 = arith.constant 0 : i32
    return %c0_i32, %c0_i32_0 : i32, i32
  }
  func.func @transform_1(%arg0: i32) -> (i32, i32) {
    %c0_i32 = arith.constant 0 : i32
    %c0_i32_0 = arith.constant 0 : i32
    %c0_i32_1 = arith.constant 0 : i32
    return %c0_i32, %c0_i32_0 : i32, i32
  }
  func.func @transform_2(%arg0: i32) -> (i32, i32) {
    %c0_i32 = arith.constant 0 : i32
    %c0_i32_0 = arith.constant 0 : i32
    %c0_i32_1 = arith.constant 0 : i32
    return %c0_i32, %c0_i32_0 : i32, i32
  }
  func.func @transform_3(%arg0: i32) -> (i32, i32, i32) {
    %c0_i32 = arith.constant 0 : i32
    %c0_i32_0 = arith.constant 0 : i32
    %c0_i32_1 = arith.constant 0 : i32
    %c0_i32_2 = arith.constant 0 : i32
    return %c0_i32, %c0_i32_0, %c0_i32_1 : i32, i32, i32
  }
  func.func @transform_4(%arg0: i32) -> (i32, i32, i32) {
    %c0_i32 = arith.constant 0 : i32
    %c0_i32_0 = arith.constant 0 : i32
    %c0_i32_1 = arith.constant 0 : i32
    %c0_i32_2 = arith.constant 0 : i32
    return %c0_i32, %c0_i32_0, %c0_i32_1 : i32, i32, i32
  }
  func.func @transform_5(%arg0: i32) -> (i32, i32) {
    %c0_i32 = arith.constant 0 : i32
    %c0_i32_0 = arith.constant 0 : i32
    %c0_i32_1 = arith.constant 0 : i32
    return %c0_i32, %c0_i32_0 : i32, i32
  }
  func.func @transform_6(%arg0: i32) -> (i32, i32) {
    %c0_i32 = arith.constant 0 : i32
    %c0_i32_0 = arith.constant 0 : i32
    %c0_i32_1 = arith.constant 0 : i32
    return %c0_i32, %c0_i32_0 : i32, i32
  }
  func.func @transform_7(%arg0: i32) -> (i32, i32) {
    %c0_i32 = arith.constant 0 : i32
    %c0_i32_0 = arith.constant 0 : i32
    %c0_i32_1 = arith.constant 0 : i32
    return %c0_i32, %c0_i32_0 : i32, i32
  }
}

</mosaic_0001>

<bundles_post_ra>
// kernel: tpu_custom_call.1
= control target key start
LH: loop header
LB: loop body
LE: loop exit
PB: predicated region body
PF: predicated region fallthrough
CT: control target
= control target key end

     0   :  { %s5067_s0 = inlined_call_operand.hbm [shape: f32[48,128], index: 0, kind: input, shape index: {}]   ;;  %s5068_s1 = inlined_call_operand.hbm [shape: bf16[128,512], index: 1, kind: input, shape index: {}]   ;;  %s5069_s2 = inlined_call_operand.hbm [shape: bf16[256,512], index: 2, kind: input, shape index: {}]   ;;  %s5070_s3 = inlined_call_operand.hbm [shape: bf16[1,256,512], index: 3, kind: input, shape index: {}]   ;;  %s5071_s4 = inlined_call_operand.vmem [shape: f32[2,1,512], index: 4, kind: input, shape index: {}]   ;;  %s5072_s5 = inlined_call_operand.vmem [shape: f32[1,128], index: 5, kind: input, shape index: {}]   ;;  %s5073_s6 = inlined_call_operand.<no memory space> [shape: f32[1,1], index: 6, kind: input, shape index: {}]   ;;  %s5074_s7 = inlined_call_operand.hbm [shape: f32[8,128], index: 7, kind: output, shape index: {}]  }
   0x1   :  { %v12_v0 = vstv %s5073_s6 }
   0x2   :  { %13 = vst [vmem:[#allocation3] sm:$0x1] %v12_v0 }
   0x3   :  { %14 = vsyncpa [#allocation5], 0 }
   0x4   :  { %15 = vsyncpa [#allocation8], 0 }
   0x5   :  { %16 = vsyncpa [#allocation11], 0 }
   0x6   :  { %17 = vsyncpa [#allocation6], 0  ;;  %s3599_s26 = smov [#allocation7]   ;;  %s3481_s30 = scalar_lea.hbm %s5068_s1, 4096 }
   0x7   :  { %s35_s27 = sshll.u32 %s3599_s26, 4  ;;  %p3482_p0 = scmp.ne.s32.totalorder %s5068_s1, %s3481_s30  ;;  %s36_s27 = int_to_ptr.vmem [resolvable:$true] %s35_s27 }
   0x8   :  { %p3485_p1 = scmp.lt.u32.totalorder %s3481_s30, %s5068_s1 }
   0xa   :  { %p3487_p2 = pnand %p3485_p1, %p3482_p0 }
   0xc   :  { %3490 = shalt.err (!%p3487_p2)
}
   0xd   :  { %s3491_s6 = scalar_lea.vmem %s36_s27, 4096  ;;  %p3496_p4 = scmp.lt.s32.totalorder %s36_s27, %s36_s27 }
   0xe   :  { %p3492_p3 = scmp.ne.s32.totalorder %s36_s27, %s3491_s6  ;;  %p3497_p5 = scmp.lt.s32.totalorder %s3491_s6, %s3491_s6 }
  0x10   :  { %p3498_p6 = por %p3497_p5, %p3496_p4 }
  0x12   :  { %p3499_p7 = pnand %p3498_p6, %p3492_p3 }
  0x14   :  { %3502 = shalt.err (!%p3499_p7)
}
  0x15   :  { %s3600_s12 = smov 256   ;;  %s3601_s13 = smov 16  }
  0x16   :  { %41 = dma.hbm_to_vmem [thread:$0]  %s5068_s1, 4096, %s36_s27, [#allocation8], %s3600_s12, %s3600_s12, %s3601_s13  }
  0x17   :  { %s3602_s16 = smov [#allocation4]   ;;  %s3503_s20 = scalar_lea.hbm %s5067_s0, 768 }
  0x18   :  { %s23_s17 = sshll.u32 %s3602_s16, 4  ;;  %p3504_p8 = scmp.ne.s32.totalorder %s5067_s0, %s3503_s20  ;;  %s24_s17 = int_to_ptr.vmem [resolvable:$true] %s23_s17 }
  0x19   :  { %p3507_p9 = scmp.lt.u32.totalorder %s3503_s20, %s5067_s0 }
  0x1b   :  { %p3509_p10 = pnand %p3507_p9, %p3504_p8 }
  0x1d   :  { %3512 = shalt.err (!%p3509_p10)
}
  0x1e   :  { %s3513_s25 = scalar_lea.vmem %s24_s17, 768  ;;  %p3518_p12 = scmp.lt.s32.totalorder %s24_s17, %s24_s17 }
  0x1f   :  { %p3514_p11 = scmp.ne.s32.totalorder %s24_s17, %s3513_s25  ;;  %p3519_p13 = scmp.lt.s32.totalorder %s3513_s25, %s3513_s25 }
  0x21   :  { %p3520_p0 = por %p3519_p13, %p3518_p12 }
  0x23   :  { %p3521_p1 = pnand %p3520_p0, %p3514_p11 }
  0x25   :  { %3524 = shalt.err (!%p3521_p1)
}
  0x26   :  { %s3603_s1 = smov 128   ;;  %s3604_s26 = smov 8  }
  0x27   :  { %29 = dma.hbm_to_vmem [thread:$0]  %s5067_s0, 768, %s24_s17, [#allocation5], %s3603_s1, %s3603_s1, %s3604_s26  }
  0x28   :  { %s3605_s29 = smov [#allocation9]   ;;  %s3606_s8 = smov [#allocation10]  }
  0x29   :  { %s47_s30 = sshll.u32 %s3605_s29, 4  ;;  %s59_s9 = sshll.u32 %s3606_s8, 4  ;;  %s48_s30 = int_to_ptr.vmem [resolvable:$true] %s47_s30  ;;  %s3680_s9 = int_to_ptr.vmem [resolvable:$true] %s59_s9 }
  0x2a   :  { %s3525_s6 = scalar_lea.hbm %s5069_s2, 8192 }
  0x2b   :  { %p3526_p2 = scmp.ne.s32.totalorder %s5069_s2, %s3525_s6  ;;  %p3529_p3 = scmp.lt.u32.totalorder %s3525_s6, %s5069_s2 }
  0x2d   :  { %p3531_p4 = pnand %p3529_p3, %p3526_p2 }
  0x2f   :  { %3534 = shalt.err (!%p3531_p4)
}
  0x30   :  { %s3535_s0 = scalar_lea.vmem %s48_s30, 8192  ;;  %p3540_p6 = scmp.lt.s32.totalorder %s48_s30, %s48_s30 }
  0x31   :  { %p3536_p5 = scmp.ne.s32.totalorder %s48_s30, %s3535_s0  ;;  %p3541_p7 = scmp.lt.s32.totalorder %s3535_s0, %s3535_s0 }
  0x33   :  { %p3542_p8 = por %p3541_p7, %p3540_p6 }
  0x35   :  { %p3543_p9 = pnand %p3542_p8, %p3536_p5 }
  0x37   :  { %3546 = shalt.err (!%p3543_p9)
}
  0x38   :  { %53 = dma.hbm_to_vmem [thread:$0]  %s5069_s2, 8192, %s48_s30, [#allocation8], %s3600_s12, %s3600_s12, %s3601_s13  }
  0x39   :  { %s3547_s22 = scalar_lea.hbm %s5070_s3, 8192 }
  0x3a   :  { %p3548_p10 = scmp.ne.s32.totalorder %s5070_s3, %s3547_s22  ;;  %p3551_p11 = scmp.lt.u32.totalorder %s3547_s22, %s5070_s3 }
  0x3c   :  { %p3553_p12 = pnand %p3551_p11, %p3548_p10 }
  0x3e   :  { %3556 = shalt.err (!%p3553_p12)
}
  0x3f   :  { %s3557_s26 = scalar_lea.vmem %s3680_s9, 8192  ;;  %p3562_p0 = scmp.lt.s32.totalorder %s3680_s9, %s3680_s9 }
  0x40   :  { %p3558_p13 = scmp.ne.s32.totalorder %s3680_s9, %s3557_s26  ;;  %p3563_p1 = scmp.lt.s32.totalorder %s3557_s26, %s3557_s26 }
  0x42   :  { %p3564_p2 = por %p3563_p1, %p3562_p0 }
  0x44   :  { %p3565_p3 = pnand %p3564_p2, %p3558_p13 }
  0x46   :  { %3568 = shalt.err (!%p3565_p3)
}
  0x47   :  { %65 = dma.hbm_to_vmem [thread:$0]  %s5070_s3, 8192, %s3680_s9, [#allocation11], %s3600_s12, %s3600_s12, %s3601_s13  }
  0x48   :  { %3591 = dma.done.wait [#allocation5], 768  }
  0x49   :  { %3592 = vsyncadd [#allocation5], 4294966528 }
  0x4a   :  { %3593 = dma.done.wait [#allocation8], 12288  }
  0x4b   :  { %3594 = vsyncadd [#allocation8], 4294955008 }
  0x4c   :  { %3595 = dma.done.wait [#allocation11], 8192  }
  0x4d   :  { %3596 = vsyncadd [#allocation11], 4294959104  ;;  %v3607_v1 = vmov 0   ;;  %v2809_v2 = vld [vmem:[#allocation7 + $0x4] ss:$16 sps:$4 sm:$0xff]   ;;  %v86_v35 = vld [vmem:[#allocation4 + $0x8] sm:$0xff] }
  0x4e   :  { %340 = vmatprep.mubr.bf16.mxu0 %v3607_v1  ;;  %403 = vmatprep.mubr.bf16.mxu1 %v3607_v1  ;;  %v2811_v3 = vld [vmem:[#allocation7 + $0xc] ss:$16 sps:$4 sm:$0xff]   ;;  %v2813_v4 = vld [vmem:[#allocation7] ss:$16 sps:$4 sm:$0xff]   ;;  %v2814_v5 = vld [vmem:[#allocation7 + $0x8] ss:$16 sps:$4 sm:$0xff]  }
  0x4f   :  { %2808 = vset.pattern.permute.xlu0 %v3607_v1  ;;  %308 = vmatprep.subr.bf16.mxu0 %v2809_v2  ;;  %v2815_v6 = vld [vmem:[#allocation7 + $0x24] ss:$16 sps:$4 sm:$0xff]   ;;  %v2817_v7 = vld [vmem:[#allocation7 + $0x2c] ss:$16 sps:$4 sm:$0xff]   ;;  %v2819_v8 = vld [vmem:[#allocation7 + $0x20] ss:$16 sps:$4 sm:$0xff]  }
  0x50   :  { %371 = vmatprep.subr.bf16.mxu1 %v2811_v3  ;;  %309 = vmatpush1.bf16.msra.mxu0 %v2813_v4  ;;  %v2820_v9 = vld [vmem:[#allocation7 + $0x28] ss:$16 sps:$4 sm:$0xff]   ;;  %v2821_v10 = vld [vmem:[#allocation7 + $0x44] ss:$16 sps:$4 sm:$0xff]   ;;  %v2823_v11 = vld [vmem:[#allocation7 + $0x4c] ss:$16 sps:$4 sm:$0xff]  }
  0x51   :  { %372 = vmatpush1.bf16.msra.mxu1 %v2814_v5  ;;  %310 = vmatprep.subr.bf16.mxu0 %v2815_v6  ;;  %v2825_v12 = vld [vmem:[#allocation7 + $0x40] ss:$16 sps:$4 sm:$0xff]   ;;  %v2826_v13 = vld [vmem:[#allocation7 + $0x48] ss:$16 sps:$4 sm:$0xff]   ;;  %v2827_v14 = vld [vmem:[#allocation7 + $0x64] ss:$16 sps:$4 sm:$0xff]  }
  0x52   :  { %373 = vmatprep.subr.bf16.mxu1 %v2817_v7  ;;  %v2829_v15 = vld [vmem:[#allocation7 + $0x6c] ss:$16 sps:$4 sm:$0xff]   ;;  %v2831_v16 = vld [vmem:[#allocation7 + $0x60] ss:$16 sps:$4 sm:$0xff]   ;;  %v2832_v17 = vld [vmem:[#allocation7 + $0x68] ss:$16 sps:$4 sm:$0xff]  }
  0x53   :  { %v2833_v18 = vld [vmem:[#allocation7 + $0x84] ss:$16 sps:$4 sm:$0xff]   ;;  %v2835_v19 = vld [vmem:[#allocation7 + $0x8c] ss:$16 sps:$4 sm:$0xff]   ;;  %v2837_v20 = vld [vmem:[#allocation7 + $0x80] ss:$16 sps:$4 sm:$0xff]  }
  0x54   :  { %311 = vmatpush1.bf16.msra.mxu0 %v2819_v8  ;;  %v2838_v21 = vld [vmem:[#allocation7 + $0x88] ss:$16 sps:$4 sm:$0xff]   ;;  %v2839_v22 = vld [vmem:[#allocation7 + $0xa4] ss:$16 sps:$4 sm:$0xff]   ;;  %v2841_v23 = vld [vmem:[#allocation7 + $0xac] ss:$16 sps:$4 sm:$0xff]  }
  0x55   :  { %374 = vmatpush1.bf16.msra.mxu1 %v2820_v9  ;;  %312 = vmatprep.subr.bf16.mxu0 %v2821_v10  ;;  %v2843_v24 = vld [vmem:[#allocation7 + $0xa0] ss:$16 sps:$4 sm:$0xff]   ;;  %v2844_v25 = vld [vmem:[#allocation7 + $0xa8] ss:$16 sps:$4 sm:$0xff]   ;;  %v2845_v26 = vld [vmem:[#allocation7 + $0xc4] ss:$16 sps:$4 sm:$0xff]  }
  0x56   :  { %375 = vmatprep.subr.bf16.mxu1 %v2823_v11  ;;  %v2847_v27 = vld [vmem:[#allocation7 + $0xcc] ss:$16 sps:$4 sm:$0xff]   ;;  %v2849_v28 = vld [vmem:[#allocation7 + $0xc0] ss:$16 sps:$4 sm:$0xff]   ;;  %v2850_v29 = vld [vmem:[#allocation7 + $0xc8] ss:$16 sps:$4 sm:$0xff]  }
  0x57   :  { %v2851_v30 = vld [vmem:[#allocation7 + $0xe4] ss:$16 sps:$4 sm:$0xff]   ;;  %v2853_v31 = vld [vmem:[#allocation7 + $0xec] ss:$16 sps:$4 sm:$0xff]   ;;  %v2855_v32 = vld [vmem:[#allocation7 + $0xe0] ss:$16 sps:$4 sm:$0xff]  }
  0x58   :  { %313 = vmatpush1.bf16.msra.mxu0 %v2825_v12  ;;  %v2856_v33 = vld [vmem:[#allocation7 + $0xe8] ss:$16 sps:$4 sm:$0xff]   ;;  %v85_v34 = vld [vmem:[#allocation4] sm:$0xff]  ;;  %v3722_v37 = vld [vmem:[#allocation9 + $0xc] ss:$16 sps:$4 sm:$0xff]   ;;  %s3609_s30 = smov [#allocation12]  }
  0x59   :  { %376 = vmatpush1.bf16.msra.mxu1 %v2826_v13  ;;  %314 = vmatprep.subr.bf16.mxu0 %v2827_v14  ;;  %v3720_v36 = vld [vmem:[#allocation9 + $0x4] ss:$16 sps:$4 sm:$0xff]   ;;  %v91_v38 = vpack.c.bf16 %v86_v35, %v85_v34  ;;  %v3724_v39 = vld [vmem:[#allocation9] ss:$16 sps:$4 sm:$0xff]   ;;  %v3726_v40 = vld [vmem:[#allocation9 + $0x8] ss:$16 sps:$4 sm:$0xff]  }
  0x5a   :  { %377 = vmatprep.subr.bf16.mxu1 %v2829_v15  ;;  %v3728_v41 = vld [vmem:[#allocation9 + $0x24] ss:$16 sps:$4 sm:$0xff]   ;;  %v3732_v42 = vld [vmem:[#allocation9 + $0x2c] ss:$16 sps:$4 sm:$0xff]   ;;  %v3734_v43 = vld [vmem:[#allocation9 + $0x20] ss:$16 sps:$4 sm:$0xff]  }
  0x5b   :  { %v3738_v44 = vld [vmem:[#allocation9 + $0x28] ss:$16 sps:$4 sm:$0xff]   ;;  %v3742_v45 = vld [vmem:[#allocation9 + $0x44] ss:$16 sps:$4 sm:$0xff]   ;;  %v3744_v46 = vld [vmem:[#allocation9 + $0x4c] ss:$16 sps:$4 sm:$0xff]  }
  0x5c   :  { %315 = vmatpush1.bf16.msra.mxu0 %v2831_v16  ;;  %v3748_v47 = vld [vmem:[#allocation9 + $0x40] ss:$16 sps:$4 sm:$0xff]   ;;  %v3752_v48 = vld [vmem:[#allocation9 + $0x48] ss:$16 sps:$4 sm:$0xff]   ;;  %v3754_v49 = vld [vmem:[#allocation9 + $0x64] ss:$16 sps:$4 sm:$0xff]  }
  0x5d   :  { %378 = vmatpush1.bf16.msra.mxu1 %v2832_v17  ;;  %316 = vmatprep.subr.bf16.mxu0 %v2833_v18  ;;  %v3758_v50 = vld [vmem:[#allocation9 + $0x6c] ss:$16 sps:$4 sm:$0xff]   ;;  %v3760_v51 = vld [vmem:[#allocation9 + $0x60] ss:$16 sps:$4 sm:$0xff]   ;;  %v3764_v52 = vld [vmem:[#allocation9 + $0x68] ss:$16 sps:$4 sm:$0xff]  }
  0x5e   :  { %379 = vmatprep.subr.bf16.mxu1 %v2835_v19  ;;  %v3768_v53 = vld [vmem:[#allocation9 + $0x84] ss:$16 sps:$4 sm:$0xff]   ;;  %v3770_v54 = vld [vmem:[#allocation9 + $0x8c] ss:$16 sps:$4 sm:$0xff]   ;;  %v3772_v55 = vld [vmem:[#allocation9 + $0x80] ss:$16 sps:$4 sm:$0xff]  }
  0x5f   :  { %v3776_v56 = vld [vmem:[#allocation9 + $0x88] ss:$16 sps:$4 sm:$0xff]   ;;  %v3778_v57 = vld [vmem:[#allocation9 + $0xa4] ss:$16 sps:$4 sm:$0xff]   ;;  %v3782_v58 = vld [vmem:[#allocation9 + $0xac] ss:$16 sps:$4 sm:$0xff]  }
  0x60   :  { %317 = vmatpush1.bf16.msra.mxu0 %v2837_v20  ;;  %v3784_v59 = vld [vmem:[#allocation9 + $0xa0] ss:$16 sps:$4 sm:$0xff]   ;;  %v3786_v60 = vld [vmem:[#allocation9 + $0xa8] ss:$16 sps:$4 sm:$0xff]   ;;  %v3790_v61 = vld [vmem:[#allocation9 + $0xc4] ss:$16 sps:$4 sm:$0xff]  }
  0x61   :  { %380 = vmatpush1.bf16.msra.mxu1 %v2838_v21  ;;  %318 = vmatprep.subr.bf16.mxu0 %v2839_v22  ;;  %v3794_v62 = vld [vmem:[#allocation9 + $0xcc] ss:$16 sps:$4 sm:$0xff]   ;;  %v87_v63 = vld [vmem:[#allocation4 + $0x10] sm:$0xff]  ;;  %v3800_v4 = vld [vmem:[#allocation9 + $0xc8] ss:$16 sps:$4 sm:$0xff]   ;;  %v3608_v21 = vmov 0.0|0.0  }
  0x62   :  { %381 = vmatprep.subr.bf16.mxu1 %v2841_v23  ;;  %v88_v0 = vld [vmem:[#allocation4 + $0x18] sm:$0xff]  ;;  %v3796_v3 = vld [vmem:[#allocation9 + $0xc0] ss:$16 sps:$4 sm:$0xff]   ;;  %v3802_v5 = vld [vmem:[#allocation9 + $0xe4] ss:$16 sps:$4 sm:$0xff]   ;;  %s2587_s8 = sshll.u32 %s3609_s30, 4  ;;  %s2588_s8 = int_to_ptr.vmem [resolvable:$true] %s2587_s8 }
  0x63   :  { %v92_v2 = vpack.c.bf16 %v88_v0, %v87_v63  ;;  %v3806_v6 = vld [vmem:[#allocation9 + $0xec] ss:$16 sps:$4 sm:$0xff]   ;;  %v3808_v7 = vld [vmem:[#allocation9 + $0xe0] ss:$16 sps:$4 sm:$0xff]   ;;  %v3814_v10 = vld [vmem:[#allocation9 + $0xe8] ss:$16 sps:$4 sm:$0xff]   ;;  %p3574_p5 = scmp.lt.s32.totalorder %s2588_s8, %s2588_s8 }
  0x64   :  { %319 = vmatpush1.bf16.msra.mxu0 %v2843_v24  ;;  %v89_v8 = vld [vmem:[#allocation4 + $0x20] sm:$0xff]  ;;  %v90_v9 = vld [vmem:[#allocation4 + $0x28] sm:$0xff]  ;;  %s3569_s9 = scalar_lea.vmem %s2588_s8, 128 }
  0x65   :  { %382 = vmatpush1.bf16.msra.mxu1 %v2844_v25  ;;  %320 = vmatprep.subr.bf16.mxu0 %v2845_v26  ;;  %v3816_v11 = vld [vmem:[#allocation9 + $0x104] ss:$16 sps:$4 sm:$0xff]   ;;  %v3820_v12 = vld [vmem:[#allocation9 + $0x10c] ss:$16 sps:$4 sm:$0xff]   ;;  %v93_v13 = vpack.c.bf16 %v90_v9, %v89_v8  ;;  %v3822_v14 = vld [vmem:[#allocation9 + $0x100] ss:$16 sps:$4 sm:$0xff]   ;;  %p3570_p4 = scmp.ne.s32.totalorder %s2588_s8, %s3569_s9  ;;  %p3575_p6 = scmp.lt.s32.totalorder %s3569_s9, %s3569_s9 }
  0x66   :  { %383 = vmatprep.subr.bf16.mxu1 %v2847_v27  ;;  %v3830_v15 = vld [vmem:[#allocation9 + $0x124] ss:$16 sps:$4 sm:$0xff]   ;;  %v3832_v16 = vld [vmem:[#allocation9 + $0x12c] ss:$16 sps:$4 sm:$0xff]   ;;  %v3834_v17 = vld [vmem:[#allocation9 + $0x120] ss:$16 sps:$4 sm:$0xff]  }
  0x67   :  { %5371 = vst [vmem:[#allocation17_spill] sm:$0xff] %v3834_v17  ;;  %v3836_v18 = vld [vmem:[#allocation9 + $0x128] ss:$16 sps:$4 sm:$0xff]   ;;  %v3838_v19 = vld [vmem:[#allocation9 + $0x144] ss:$16 sps:$4 sm:$0xff]   ;;  %p3576_p7 = por %p3575_p6, %p3574_p5 }
  0x68   :  { %321 = vmatpush1.bf16.msra.mxu0 %v2849_v28  ;;  %5372 = vst [vmem:[#allocation18_spill] sm:$0xff] %v3836_v18  ;;  %5373 = vst [vmem:[#allocation19_spill] sm:$0xff] %v3838_v19  ;;  %v3840_v20 = vld [vmem:[#allocation9 + $0x14c] ss:$16 sps:$4 sm:$0xff]   ;;  %v3846_v22 = vld [vmem:[#allocation9 + $0x140] ss:$16 sps:$4 sm:$0xff]  }
  0x69   :  { %384 = vmatpush1.bf16.msra.mxu1 %v2850_v29  ;;  %322 = vmatprep.subr.bf16.mxu0 %v2851_v30  ;;  %5374 = vst [vmem:[#allocation20_spill] sm:$0xff] %v3840_v20  ;;  %5375 = vst [vmem:[#allocation21_spill] sm:$0xff] %v3846_v22  ;;  %v3848_v23 = vld [vmem:[#allocation9 + $0x148] ss:$16 sps:$4 sm:$0xff]   ;;  %v3850_v24 = vld [vmem:[#allocation9 + $0x164] ss:$16 sps:$4 sm:$0xff]   ;;  %p3577_p8 = pnand %p3576_p7, %p3570_p4 }
  0x6a   :  { %385 = vmatprep.subr.bf16.mxu1 %v2853_v31  ;;  %5376 = vst [vmem:[#allocation22_spill] sm:$0xff] %v3848_v23  ;;  %5377 = vst [vmem:[#allocation23_spill] sm:$0xff] %v3850_v24  ;;  %v3852_v25 = vld [vmem:[#allocation9 + $0x16c] ss:$16 sps:$4 sm:$0xff]   ;;  %v3858_v26 = vld [vmem:[#allocation9 + $0x160] ss:$16 sps:$4 sm:$0xff]  }
  0x6b   :  { %5378 = vst [vmem:[#allocation24_spill] sm:$0xff] %v3852_v25  ;;  %5379 = vst [vmem:[#allocation25_spill] sm:$0xff] %v3858_v26  ;;  %v3860_v27 = vld [vmem:[#allocation9 + $0x168] ss:$16 sps:$4 sm:$0xff]   ;;  %v3862_v28 = vld [vmem:[#allocation9 + $0x184] ss:$16 sps:$4 sm:$0xff]  }
  0x6c   :  { %323 = vmatpush1.bf16.msra.mxu0 %v2855_v32  ;;  %5380 = vst [vmem:[#allocation26_spill] sm:$0xff] %v3860_v27  ;;  %5381 = vst [vmem:[#allocation27_spill] sm:$0xff] %v3862_v28  ;;  %v3864_v29 = vld [vmem:[#allocation9 + $0x18c] ss:$16 sps:$4 sm:$0xff]   ;;  %v3870_v30 = vld [vmem:[#allocation9 + $0x180] ss:$16 sps:$4 sm:$0xff]  }
  0x6d   :  { %386 = vmatpush1.bf16.msra.mxu1 %v2856_v33  ;;  %870 = vmatprep.subr.bf16.mxu0 %v3720_v36  ;;  %5382 = vst [vmem:[#allocation28_spill] sm:$0xff] %v3864_v29  ;;  %5383 = vst [vmem:[#allocation29_spill] sm:$0xff] %v3870_v30  ;;  %v3872_v31 = vld [vmem:[#allocation9 + $0x188] ss:$16 sps:$4 sm:$0xff]   ;;  %v3874_v32 = vld [vmem:[#allocation9 + $0x1a4] ss:$16 sps:$4 sm:$0xff]  }
  0x6e   :  { %911 = vmatprep.subr.bf16.mxu1 %v3722_v37  ;;  %5384 = vst [vmem:[#allocation30_spill] sm:$0xff] %v3872_v31  ;;  %5385 = vst [vmem:[#allocation31_spill] sm:$0xff] %v3874_v32  ;;  %v3876_v33 = vld [vmem:[#allocation9 + $0x1ac] ss:$16 sps:$4 sm:$0xff]   ;;  %v3882_v34 = vld [vmem:[#allocation9 + $0x1a0] ss:$16 sps:$4 sm:$0xff]  }
  0x6f   :  { %341 = vmatmul.mubr.bf16.vlgmr.msra.gmra.mrb[0].mxu0 %v91_v38  ;;  %5386 = vst [vmem:[#allocation32_spill] sm:$0xff] %v3876_v33  ;;  %5387 = vst [vmem:[#allocation33_spill] sm:$0xff] %v3882_v34  ;;  %v3884_v35 = vld [vmem:[#allocation9 + $0x1a8] ss:$16 sps:$4 sm:$0xff]   ;;  %v3888_v63 = vld [vmem:[#allocation9 + $0x1cc] ss:$16 sps:$4 sm:$0xff]  }
  0x70   :  { %404 = vmatmul.mubr.bf16.vlgmr.msra.gmra.mrb[0].mxu1 %v91_v38  ;;  %871 = vmatpush1.bf16.msra.mxu0 %v3724_v39  ;;  %5388 = vst [vmem:[#allocation34_spill] sm:$0xff] %v3884_v35  ;;  %v3886_v38 = vld [vmem:[#allocation9 + $0x1c4] ss:$16 sps:$4 sm:$0xff]   ;;  %5390 = vst [vmem:[#allocation36_spill] sm:$0xff] %v3888_v63  ;;  %v3896_v0 = vld [vmem:[#allocation9 + $0x1c0] ss:$16 sps:$4 sm:$0xff]  }
  0x71   :  { %912 = vmatpush1.bf16.msra.mxu1 %v3726_v40  ;;  %872 = vmatprep.subr.bf16.mxu0 %v3728_v41  ;;  %5389 = vst [vmem:[#allocation35_spill] sm:$0xff] %v3886_v38  ;;  %5391 = vst [vmem:[#allocation37_spill] sm:$0xff] %v3896_v0  ;;  %v3902_v8 = vld [vmem:[#allocation9 + $0x1e4] ss:$16 sps:$4 sm:$0xff]   ;;  %v3904_v9 = vld [vmem:[#allocation9 + $0x1ec] ss:$16 sps:$4 sm:$0xff]  }
  0x72   :  { %913 = vmatprep.subr.bf16.mxu1 %v3732_v42  ;;  %350 = vmatprep.mubr.bf16.mxu0 %v3607_v1  ;;  %5393 = vst [vmem:[#allocation39_spill] sm:$0xff] %v3902_v8  ;;  %5394 = vst [vmem:[#allocation40_spill] sm:$0xff] %v3904_v9 }
  0x73   :  { %413 = vmatprep.mubr.bf16.mxu1 %v3607_v1 }
  0x74   :  { %873 = vmatpush1.bf16.msra.mxu0 %v3734_v43 }
  0x75   :  { %914 = vmatpush1.bf16.msra.mxu1 %v3738_v44  ;;  %874 = vmatprep.subr.bf16.mxu0 %v3742_v45 }
  0x76   :  { %915 = vmatprep.subr.bf16.mxu1 %v3744_v46 }
  0x77   :  { %351 = vmatmul.mubr.bf16.gmra.mrb[4].mxu0 %v92_v2 }
  0x78   :  { %875 = vmatpush1.bf16.msra.mxu0 %v3748_v47  ;;  %414 = vmatmul.mubr.bf16.gmra.mrb[4].mxu1 %v92_v2  ;;  %v3898_v2 = vld [vmem:[#allocation9 + $0x1c8] ss:$16 sps:$4 sm:$0xff]  }
  0x79   :  { %916 = vmatpush1.bf16.msra.mxu1 %v3752_v48  ;;  %876 = vmatprep.subr.bf16.mxu0 %v3754_v49  ;;  %5392 = vst [vmem:[#allocation38_spill] sm:$0xff] %v3898_v2 }
  0x7a   :  { %917 = vmatprep.subr.bf16.mxu1 %v3758_v50  ;;  %360 = vmatprep.mubr.bf16.mxu0 %v3607_v1 }
  0x7b   :  { %423 = vmatprep.mubr.bf16.mxu1 %v3607_v1  ;;  %v3826_v1 = vld [vmem:[#allocation9 + $0x108] ss:$16 sps:$4 sm:$0xff]  }
  0x7c   :  { %877 = vmatpush1.bf16.msra.mxu0 %v3760_v51 }
  0x7d   :  { %918 = vmatpush1.bf16.msra.mxu1 %v3764_v52  ;;  %878 = vmatprep.subr.bf16.mxu0 %v3768_v53 }
  0x7e   :  { %919 = vmatprep.subr.bf16.mxu1 %v3770_v54 }
  0x7f   :  { %361 = vmatmul.mubr.bf16.gmra.mrb[8].mxu0 %v93_v13 }
  0x80   :  { %879 = vmatpush1.bf16.msra.mxu0 %v3772_v55  ;;  %424 = vmatmul.mubr.bf16.gmra.mrb[8].mxu1 %v93_v13  ;;  %v3908_v13 = vld [vmem:[#allocation9 + $0x1e0] ss:$16 sps:$4 sm:$0xff]  }
  0x81   :  { %920 = vmatpush1.bf16.msra.mxu1 %v3776_v56  ;;  %880 = vmatprep.subr.bf16.mxu0 %v3778_v57  ;;  %5395 = vst [vmem:[#allocation41_spill] sm:$0xff] %v3908_v13 }
  0x82   :  { %921 = vmatprep.subr.bf16.mxu1 %v3782_v58  ;;  %902 = vmatprep.mubr.bf16.mxu0 %v3608_v21 }
  0x83   :  { %943 = vmatprep.mubr.bf16.mxu1 %v3608_v21 }
  0x84   :  { %881 = vmatpush1.bf16.msra.mxu0 %v3784_v59 }
  0x85   :  { %922 = vmatpush1.bf16.msra.mxu1 %v3786_v60  ;;  %882 = vmatprep.subr.bf16.mxu0 %v3790_v61 }
  0x86   :  { %923 = vmatprep.subr.bf16.mxu1 %v3794_v62 }
  0x88   :  { %883 = vmatpush1.bf16.msra.mxu0 %v3796_v3 }
  0x89   :  { %924 = vmatpush1.bf16.msra.mxu1 %v3800_v4  ;;  %884 = vmatprep.subr.bf16.mxu0 %v3802_v5 }
  0x8a   :  { %925 = vmatprep.subr.bf16.mxu1 %v3806_v6 }
  0x8c   :  { %885 = vmatpush1.bf16.msra.mxu0 %v3808_v7 }
  0x8d   :  { %926 = vmatpush1.bf16.msra.mxu1 %v3814_v10  ;;  %886 = vmatprep.subr.bf16.mxu0 %v3816_v11 }
  0x8e   :  { %927 = vmatprep.subr.bf16.mxu1 %v3820_v12 }
  0x90   :  { %887 = vmatpush1.bf16.msra.mxu0 %v3822_v14 }
  0x91   :  { %928 = vmatpush1.bf16.msra.mxu1 %v3826_v1  ;;  %888 = vmatprep.subr.bf16.mxu0 %v3830_v15 }
  0x92   :  { %929 = vmatprep.subr.bf16.mxu1 %v3832_v16 }
  0x94   :  { %889 = vmatpush1.bf16.msra.mxu0 %v3834_v17 }
  0x95   :  { %930 = vmatpush1.bf16.msra.mxu1 %v3836_v18  ;;  %890 = vmatprep.subr.bf16.mxu0 %v3838_v19 }
  0x96   :  { %931 = vmatprep.subr.bf16.mxu1 %v3840_v20 }
  0x98   :  { %891 = vmatpush1.bf16.msra.mxu0 %v3846_v22 }
  0x99   :  { %932 = vmatpush1.bf16.msra.mxu1 %v3848_v23  ;;  %892 = vmatprep.subr.bf16.mxu0 %v3850_v24 }
  0x9a   :  { %933 = vmatprep.subr.bf16.mxu1 %v3852_v25 }
  0x9c   :  { %893 = vmatpush1.bf16.msra.mxu0 %v3858_v26 }
  0x9d   :  { %934 = vmatpush1.bf16.msra.mxu1 %v3860_v27  ;;  %894 = vmatprep.subr.bf16.mxu0 %v3862_v28 }
  0x9e   :  { %935 = vmatprep.subr.bf16.mxu1 %v3864_v29 }
  0xa0   :  { %895 = vmatpush1.bf16.msra.mxu0 %v3870_v30 }
  0xa1   :  { %936 = vmatpush1.bf16.msra.mxu1 %v3872_v31  ;;  %896 = vmatprep.subr.bf16.mxu0 %v3874_v32 }
  0xa2   :  { %937 = vmatprep.subr.bf16.mxu1 %v3876_v33 }
  0xa4   :  { %897 = vmatpush1.bf16.msra.mxu0 %v3882_v34  ;;  %v3910_v34 = vld [vmem:[#allocation9 + $0x1e8] ss:$16 sps:$4 sm:$0xff]  }
  0xa5   :  { %938 = vmatpush1.bf16.msra.mxu1 %v3884_v35  ;;  %898 = vmatprep.subr.bf16.mxu0 %v3886_v38  ;;  %5396 = vst [vmem:[#allocation42_spill] sm:$0xff] %v3910_v34  ;;  %v3922_v38 = vld [vmem:[#allocation10 + $0x8] ss:$16 sps:$4 sm:$0xff]   ;;  %v3950_v35 = vld [vmem:[#allocation10 + $0x6c] ss:$16 sps:$4 sm:$0xff]  }
  0xa6   :  { %939 = vmatprep.subr.bf16.mxu1 %v3888_v63  ;;  %v3916_v63 = vld [vmem:[#allocation10 + $0x4] ss:$16 sps:$4 sm:$0xff]   ;;  %5400 = vst [vmem:[#allocation46_spill] sm:$0xff] %v3922_v38  ;;  %5410 = vst [vmem:[#allocation56_spill] sm:$0xff] %v3950_v35 }
  0xa7   :  { %5397 = vst [vmem:[#allocation43_spill] sm:$0xff] %v3916_v63 }
  0xa8   :  { %899 = vmatpush1.bf16.msra.mxu0 %v3896_v0  ;;  %v3918_v0 = vld [vmem:[#allocation10 + $0xc] ss:$16 sps:$4 sm:$0xff]  }
  0xa9   :  { %940 = vmatpush1.bf16.msra.mxu1 %v3898_v2  ;;  %900 = vmatprep.subr.bf16.mxu0 %v3902_v8  ;;  %5398 = vst [vmem:[#allocation44_spill] sm:$0xff] %v3918_v0  ;;  %v3920_v2 = vld [vmem:[#allocation10] ss:$16 sps:$4 sm:$0xff]   ;;  %v3948_v8 = vld [vmem:[#allocation10 + $0x64] ss:$16 sps:$4 sm:$0xff]  }
  0xaa   :  { %941 = vmatprep.subr.bf16.mxu1 %v3904_v9  ;;  %5399 = vst [vmem:[#allocation45_spill] sm:$0xff] %v3920_v2  ;;  %v3934_v9 = vld [vmem:[#allocation10 + $0x28] ss:$16 sps:$4 sm:$0xff]   ;;  %5409 = vst [vmem:[#allocation55_spill] sm:$0xff] %v3948_v8 }
  0xab   :  { %5404 = vst [vmem:[#allocation50_spill] sm:$0xff] %v3934_v9 }
  0xac   :  { %901 = vmatpush1.bf16.msra.mxu0 %v3908_v13  ;;  %v3930_v13 = vld [vmem:[#allocation10 + $0x2c] ss:$16 sps:$4 sm:$0xff]  }
  0xad   :  { %942 = vmatpush1.bf16.msra.mxu1 %v3910_v34  ;;  %1361 = vmatprep.subr.bf16.mxu0 %v3916_v63  ;;  %v3928_v34 = vld [vmem:[#allocation10 + $0x24] ss:$16 sps:$4 sm:$0xff]   ;;  %5402 = vst [vmem:[#allocation48_spill] sm:$0xff] %v3930_v13  ;;  %v3946_v63 = vld [vmem:[#allocation10 + $0x48] ss:$16 sps:$4 sm:$0xff]  }
  0xae   :  { %1402 = vmatprep.subr.bf16.mxu1 %v3918_v0  ;;  %5401 = vst [vmem:[#allocation47_spill] sm:$0xff] %v3928_v34  ;;  %v3940_v0 = vld [vmem:[#allocation10 + $0x44] ss:$16 sps:$4 sm:$0xff]   ;;  %5408 = vst [vmem:[#allocation54_spill] sm:$0xff] %v3946_v63 }
  0xaf   :  { %903 = vmatmul.mubr.bf16.vlgmr.msra.gmra.mrb[12].mxu0 %v3608_v21  ;;  %5405 = vst [vmem:[#allocation51_spill] sm:$0xff] %v3940_v0 }
  0xb0   :  { %944 = vmatmul.mubr.bf16.vlgmr.msra.gmra.mrb[12].mxu1 %v3608_v21  ;;  %1393 = vmatprep.mubr.bf16.mxu0 %v3608_v21 }
  0xb1   :  { %1434 = vmatprep.mubr.bf16.mxu1 %v3608_v21  ;;  %1362 = vmatpush1.bf16.msra.mxu0 %v3920_v2  ;;  %v3932_v21 = vld [vmem:[#allocation10 + $0x20] ss:$16 sps:$4 sm:$0xff]   ;;  %v3942_v2 = vld [vmem:[#allocation10 + $0x4c] ss:$16 sps:$4 sm:$0xff]  }
  0xb2   :  { %1403 = vmatpush1.bf16.msra.mxu1 %v3922_v38  ;;  %5403 = vst [vmem:[#allocation49_spill] sm:$0xff] %v3932_v21  ;;  %1363 = vmatprep.subr.bf16.mxu0 %v3928_v34  ;;  %5406 = vst [vmem:[#allocation52_spill] sm:$0xff] %v3942_v2  ;;  %v3944_v38 = vld [vmem:[#allocation10 + $0x40] ss:$16 sps:$4 sm:$0xff]   ;;  %v4082_v34 = vld [vmem:[#allocation10 + $0x1cc] ss:$16 sps:$4 sm:$0xff]  }
  0xb3   :  { %1404 = vmatprep.subr.bf16.mxu1 %v3930_v13  ;;  %5407 = vst [vmem:[#allocation53_spill] sm:$0xff] %v3944_v38  ;;  %v3964_v13 = vld [vmem:[#allocation10 + $0x84] ss:$16 sps:$4 sm:$0xff]   ;;  %5454 = vst [vmem:[#allocation100_spill] sm:$0xff] %v4082_v34 }
  0xb4   :  { %5413 = vst [vmem:[#allocation59_spill] sm:$0xff] %v3964_v13 }
  0xb5   :  { %1364 = vmatpush1.bf16.msra.mxu0 %v3932_v21  ;;  %v3958_v21 = vld [vmem:[#allocation10 + $0x68] ss:$16 sps:$4 sm:$0xff]  }
  0xb6   :  { %1405 = vmatpush1.bf16.msra.mxu1 %v3934_v9  ;;  %1365 = vmatprep.subr.bf16.mxu0 %v3940_v0  ;;  %v3956_v9 = vld [vmem:[#allocation10 + $0x60] ss:$16 sps:$4 sm:$0xff]   ;;  %5412 = vst [vmem:[#allocation58_spill] sm:$0xff] %v3958_v21  ;;  %v3966_v0 = vld [vmem:[#allocation10 + $0x8c] ss:$16 sps:$4 sm:$0xff]  }
  0xb7   :  { %1406 = vmatprep.subr.bf16.mxu1 %v3942_v2  ;;  %5411 = vst [vmem:[#allocation57_spill] sm:$0xff] %v3956_v9  ;;  %5414 = vst [vmem:[#allocation60_spill] sm:$0xff] %v3966_v0  ;;  %v3968_v2 = vld [vmem:[#allocation10 + $0x80] ss:$16 sps:$4 sm:$0xff]  }
  0xb8   :  { %5415 = vst [vmem:[#allocation61_spill] sm:$0xff] %v3968_v2 }
  0xb9   :  { %1366 = vmatpush1.bf16.msra.mxu0 %v3944_v38  ;;  %v3970_v38 = vld [vmem:[#allocation10 + $0x88] ss:$16 sps:$4 sm:$0xff]  }
  0xba   :  { %1407 = vmatpush1.bf16.msra.mxu1 %v3946_v63  ;;  %1367 = vmatprep.subr.bf16.mxu0 %v3948_v8  ;;  %5416 = vst [vmem:[#allocation62_spill] sm:$0xff] %v3970_v38  ;;  %v3982_v8 = vld [vmem:[#allocation10 + $0xa8] ss:$16 sps:$4 sm:$0xff]   ;;  %v4080_v63 = vld [vmem:[#allocation10 + $0x1c4] ss:$16 sps:$4 sm:$0xff]  }
  0xbb   :  { %1408 = vmatprep.subr.bf16.mxu1 %v3950_v35  ;;  %v3976_v35 = vld [vmem:[#allocation10 + $0xa4] ss:$16 sps:$4 sm:$0xff]   ;;  %5420 = vst [vmem:[#allocation66_spill] sm:$0xff] %v3982_v8  ;;  %5453 = vst [vmem:[#allocation99_spill] sm:$0xff] %v4080_v63 }
  0xbc   :  { %5417 = vst [vmem:[#allocation63_spill] sm:$0xff] %v3976_v35 }
  0xbd   :  { %1368 = vmatpush1.bf16.msra.mxu0 %v3956_v9  ;;  %v3978_v9 = vld [vmem:[#allocation10 + $0xac] ss:$16 sps:$4 sm:$0xff]  }
  0xbe   :  { %1409 = vmatpush1.bf16.msra.mxu1 %v3958_v21  ;;  %1369 = vmatprep.subr.bf16.mxu0 %v3964_v13  ;;  %5418 = vst [vmem:[#allocation64_spill] sm:$0xff] %v3978_v9  ;;  %v3980_v21 = vld [vmem:[#allocation10 + $0xa0] ss:$16 sps:$4 sm:$0xff]   ;;  %v3994_v13 = vld [vmem:[#allocation10 + $0xc8] ss:$16 sps:$4 sm:$0xff]  }
  0xbf   :  { %1410 = vmatprep.subr.bf16.mxu1 %v3966_v0  ;;  %5419 = vst [vmem:[#allocation65_spill] sm:$0xff] %v3980_v21  ;;  %v3988_v0 = vld [vmem:[#allocation10 + $0xc4] ss:$16 sps:$4 sm:$0xff]   ;;  %5424 = vst [vmem:[#allocation70_spill] sm:$0xff] %v3994_v13 }
  0xc0   :  { %5421 = vst [vmem:[#allocation67_spill] sm:$0xff] %v3988_v0 }
  0xc1   :  { %1370 = vmatpush1.bf16.msra.mxu0 %v3968_v2  ;;  %v3990_v2 = vld [vmem:[#allocation10 + $0xcc] ss:$16 sps:$4 sm:$0xff]  }
  0xc2   :  { %1411 = vmatpush1.bf16.msra.mxu1 %v3970_v38  ;;  %1371 = vmatprep.subr.bf16.mxu0 %v3976_v35  ;;  %5422 = vst [vmem:[#allocation68_spill] sm:$0xff] %v3990_v2  ;;  %v3992_v38 = vld [vmem:[#allocation10 + $0xc0] ss:$16 sps:$4 sm:$0xff]   ;;  %v4006_v35 = vld [vmem:[#allocation10 + $0xe8] ss:$16 sps:$4 sm:$0xff]  }
  0xc3   :  { %1412 = vmatprep.subr.bf16.mxu1 %v3978_v9  ;;  %5423 = vst [vmem:[#allocation69_spill] sm:$0xff] %v3992_v38  ;;  %v4000_v9 = vld [vmem:[#allocation10 + $0xe4] ss:$16 sps:$4 sm:$0xff]   ;;  %5428 = vst [vmem:[#allocation74_spill] sm:$0xff] %v4006_v35 }
  0xc4   :  { %5425 = vst [vmem:[#allocation71_spill] sm:$0xff] %v4000_v9 }
  0xc5   :  { %1372 = vmatpush1.bf16.msra.mxu0 %v3980_v21  ;;  %v4002_v21 = vld [vmem:[#allocation10 + $0xec] ss:$16 sps:$4 sm:$0xff]  }
  0xc6   :  { %1413 = vmatpush1.bf16.msra.mxu1 %v3982_v8  ;;  %1373 = vmatprep.subr.bf16.mxu0 %v3988_v0  ;;  %5426 = vst [vmem:[#allocation72_spill] sm:$0xff] %v4002_v21  ;;  %v4004_v8 = vld [vmem:[#allocation10 + $0xe0] ss:$16 sps:$4 sm:$0xff]   ;;  %v4018_v0 = vld [vmem:[#allocation10 + $0x108] ss:$16 sps:$4 sm:$0xff]  }
  0xc7   :  { %1414 = vmatprep.subr.bf16.mxu1 %v3990_v2  ;;  %5427 = vst [vmem:[#allocation73_spill] sm:$0xff] %v4004_v8  ;;  %v4012_v2 = vld [vmem:[#allocation10 + $0x104] ss:$16 sps:$4 sm:$0xff]   ;;  %5432 = vst [vmem:[#allocation78_spill] sm:$0xff] %v4018_v0 }
  0xc8   :  { %5429 = vst [vmem:[#allocation75_spill] sm:$0xff] %v4012_v2 }
  0xc9   :  { %1374 = vmatpush1.bf16.msra.mxu0 %v3992_v38  ;;  %v4014_v38 = vld [vmem:[#allocation10 + $0x10c] ss:$16 sps:$4 sm:$0xff]  }
  0xca   :  { %1415 = vmatpush1.bf16.msra.mxu1 %v3994_v13  ;;  %1375 = vmatprep.subr.bf16.mxu0 %v4000_v9  ;;  %5430 = vst [vmem:[#allocation76_spill] sm:$0xff] %v4014_v38  ;;  %v4016_v13 = vld [vmem:[#allocation10 + $0x100] ss:$16 sps:$4 sm:$0xff]   ;;  %v4030_v9 = vld [vmem:[#allocation10 + $0x128] ss:$16 sps:$4 sm:$0xff]  }
  0xcb   :  { %1416 = vmatprep.subr.bf16.mxu1 %v4002_v21  ;;  %5431 = vst [vmem:[#allocation77_spill] sm:$0xff] %v4016_v13  ;;  %v4024_v21 = vld [vmem:[#allocation10 + $0x124] ss:$16 sps:$4 sm:$0xff]   ;;  %5436 = vst [vmem:[#allocation82_spill] sm:$0xff] %v4030_v9 }
  0xcc   :  { %5433 = vst [vmem:[#allocation79_spill] sm:$0xff] %v4024_v21 }
  0xcd   :  { %1376 = vmatpush1.bf16.msra.mxu0 %v4004_v8  ;;  %v4026_v8 = vld [vmem:[#allocation10 + $0x12c] ss:$16 sps:$4 sm:$0xff]  }
  0xce   :  { %1417 = vmatpush1.bf16.msra.mxu1 %v4006_v35  ;;  %1377 = vmatprep.subr.bf16.mxu0 %v4012_v2  ;;  %5434 = vst [vmem:[#allocation80_spill] sm:$0xff] %v4026_v8  ;;  %v4028_v35 = vld [vmem:[#allocation10 + $0x120] ss:$16 sps:$4 sm:$0xff]   ;;  %v4042_v2 = vld [vmem:[#allocation10 + $0x148] ss:$16 sps:$4 sm:$0xff]  }
  0xcf   :  { %1418 = vmatprep.subr.bf16.mxu1 %v4014_v38  ;;  %5435 = vst [vmem:[#allocation81_spill] sm:$0xff] %v4028_v35  ;;  %v4036_v38 = vld [vmem:[#allocation10 + $0x144] ss:$16 sps:$4 sm:$0xff]   ;;  %5440 = vst [vmem:[#allocation86_spill] sm:$0xff] %v4042_v2 }
  0xd0   :  { %5437 = vst [vmem:[#allocation83_spill] sm:$0xff] %v4036_v38 }
  0xd1   :  { %1378 = vmatpush1.bf16.msra.mxu0 %v4016_v13  ;;  %v4038_v13 = vld [vmem:[#allocation10 + $0x14c] ss:$16 sps:$4 sm:$0xff]  }
  0xd2   :  { %1419 = vmatpush1.bf16.msra.mxu1 %v4018_v0  ;;  %1379 = vmatprep.subr.bf16.mxu0 %v4024_v21  ;;  %5438 = vst [vmem:[#allocation84_spill] sm:$0xff] %v4038_v13  ;;  %v4040_v0 = vld [vmem:[#allocation10 + $0x140] ss:$16 sps:$4 sm:$0xff]   ;;  %v4054_v21 = vld [vmem:[#allocation10 + $0x168] ss:$16 sps:$4 sm:$0xff]  }
  0xd3   :  { %1420 = vmatprep.subr.bf16.mxu1 %v4026_v8  ;;  %5439 = vst [vmem:[#allocation85_spill] sm:$0xff] %v4040_v0  ;;  %v4048_v8 = vld [vmem:[#allocation10 + $0x164] ss:$16 sps:$4 sm:$0xff]   ;;  %5444 = vst [vmem:[#allocation90_spill] sm:$0xff] %v4054_v21 }
  0xd4   :  { %5441 = vst [vmem:[#allocation87_spill] sm:$0xff] %v4048_v8 }
  0xd5   :  { %1380 = vmatpush1.bf16.msra.mxu0 %v4028_v35  ;;  %v4050_v35 = vld [vmem:[#allocation10 + $0x16c] ss:$16 sps:$4 sm:$0xff]  }
  0xd6   :  { %1421 = vmatpush1.bf16.msra.mxu1 %v4030_v9  ;;  %1381 = vmatprep.subr.bf16.mxu0 %v4036_v38  ;;  %5442 = vst [vmem:[#allocation88_spill] sm:$0xff] %v4050_v35  ;;  %v4052_v9 = vld [vmem:[#allocation10 + $0x160] ss:$16 sps:$4 sm:$0xff]   ;;  %v4066_v38 = vld [vmem:[#allocation10 + $0x188] ss:$16 sps:$4 sm:$0xff]  }
  0xd7   :  { %1422 = vmatprep.subr.bf16.mxu1 %v4038_v13  ;;  %5443 = vst [vmem:[#allocation89_spill] sm:$0xff] %v4052_v9  ;;  %v4060_v13 = vld [vmem:[#allocation10 + $0x184] ss:$16 sps:$4 sm:$0xff]   ;;  %5448 = vst [vmem:[#allocation94_spill] sm:$0xff] %v4066_v38 }
  0xd8   :  { %5445 = vst [vmem:[#allocation91_spill] sm:$0xff] %v4060_v13 }
  0xd9   :  { %1382 = vmatpush1.bf16.msra.mxu0 %v4040_v0  ;;  %v4062_v0 = vld [vmem:[#allocation10 + $0x18c] ss:$16 sps:$4 sm:$0xff]  }
  0xda   :  { %1423 = vmatpush1.bf16.msra.mxu1 %v4042_v2  ;;  %1383 = vmatprep.subr.bf16.mxu0 %v4048_v8  ;;  %5446 = vst [vmem:[#allocation92_spill] sm:$0xff] %v4062_v0  ;;  %v4064_v2 = vld [vmem:[#allocation10 + $0x180] ss:$16 sps:$4 sm:$0xff]   ;;  %v4078_v8 = vld [vmem:[#allocation10 + $0x1a8] ss:$16 sps:$4 sm:$0xff]  }
  0xdb   :  { %1424 = vmatprep.subr.bf16.mxu1 %v4050_v35  ;;  %5447 = vst [vmem:[#allocation93_spill] sm:$0xff] %v4064_v2  ;;  %v4072_v35 = vld [vmem:[#allocation10 + $0x1a4] ss:$16 sps:$4 sm:$0xff]   ;;  %5452 = vst [vmem:[#allocation98_spill] sm:$0xff] %v4078_v8 }
  0xdc   :  { %5449 = vst [vmem:[#allocation95_spill] sm:$0xff] %v4072_v35 }
  0xdd   :  { %1384 = vmatpush1.bf16.msra.mxu0 %v4052_v9  ;;  %v4074_v9 = vld [vmem:[#allocation10 + $0x1ac] ss:$16 sps:$4 sm:$0xff]  }
  0xde   :  { %1425 = vmatpush1.bf16.msra.mxu1 %v4054_v21  ;;  %1385 = vmatprep.subr.bf16.mxu0 %v4060_v13  ;;  %5450 = vst [vmem:[#allocation96_spill] sm:$0xff] %v4074_v9  ;;  %v4076_v21 = vld [vmem:[#allocation10 + $0x1a0] ss:$16 sps:$4 sm:$0xff]   ;;  %v4096_v13 = vld [vmem:[#allocation10 + $0x1ec] ss:$16 sps:$4 sm:$0xff]  }
  0xdf   :  { %1426 = vmatprep.subr.bf16.mxu1 %v4062_v0  ;;  %5451 = vst [vmem:[#allocation97_spill] sm:$0xff] %v4076_v21  ;;  %v4094_v0 = vld [vmem:[#allocation10 + $0x1e4] ss:$16 sps:$4 sm:$0xff]   ;;  %5458 = vst [vmem:[#allocation104_spill] sm:$0xff] %v4096_v13 }
  0xe0   :  { %5457 = vst [vmem:[#allocation103_spill] sm:$0xff] %v4094_v0 }
  0xe1   :  { %1386 = vmatpush1.bf16.msra.mxu0 %v4064_v2  ;;  %v4090_v2 = vld [vmem:[#allocation10 + $0x1c8] ss:$16 sps:$4 sm:$0xff]  }
  0xe2   :  { %1427 = vmatpush1.bf16.msra.mxu1 %v4066_v38  ;;  %1387 = vmatprep.subr.bf16.mxu0 %v4072_v35  ;;  %v4088_v38 = vld [vmem:[#allocation10 + $0x1c0] ss:$16 sps:$4 sm:$0xff]   ;;  %5456 = vst [vmem:[#allocation102_spill] sm:$0xff] %v4090_v2 }
  0xe3   :  { %1428 = vmatprep.subr.bf16.mxu1 %v4074_v9  ;;  %5455 = vst [vmem:[#allocation101_spill] sm:$0xff] %v4088_v38  ;;  %v4100_v9 = vld [vmem:[#allocation10 + $0x1e0] ss:$16 sps:$4 sm:$0xff]  }
  0xe4   :  { %5459 = vst [vmem:[#allocation105_spill] sm:$0xff] %v4100_v9 }
  0xe5   :  { %1388 = vmatpush1.bf16.msra.mxu0 %v4076_v21  ;;  %v4102_v21 = vld [vmem:[#allocation10 + $0x1e8] ss:$16 sps:$4 sm:$0xff]  }
  0xe6   :  { %1429 = vmatpush1.bf16.msra.mxu1 %v4078_v8  ;;  %1389 = vmatprep.subr.bf16.mxu0 %v4080_v63  ;;  %5460 = vst [vmem:[#allocation106_spill] sm:$0xff] %v4102_v21 }
  0xe7   :  { %1430 = vmatprep.subr.bf16.mxu1 %v4082_v34  ;;  %v128_v34 = vlaneseq }
  0xe9   :  { %1390 = vmatpush1.bf16.msra.mxu0 %v4088_v38  ;;  %v4110_v38 = vshrl.u32 %v128_v34, 7 }
  0xea   :  { %1431 = vmatpush1.bf16.msra.mxu1 %v4090_v2  ;;  %1391 = vmatprep.subr.bf16.mxu0 %v4094_v0  ;;  %v126_v0 = vld [vmem:[%s5071_s4] sm:$0xf] }
  0xeb   :  { %1432 = vmatprep.subr.bf16.mxu1 %v4096_v13  ;;  %5461 = vst [vmem:[#allocation107_spill] sm:$0xff] %v4110_v38  ;;  %v5172_v2 = vsub.s32 0, %v4110_v38  ;;  %v5174_v63 = vsub.s32 2, %v4110_v38  ;;  %v5177_v13 = vsub.s32 3, %v4110_v38 }
  0xed   :  { %1392 = vmatpush1.bf16.msra.mxu0 %v4100_v9  ;;  %v5180_v9 = vsub.s32 1, %v4110_v38  ;;  %v143_v8 = vrot.slane %v126_v0, %v5177_v13 }
  0xee   :  { %1433 = vmatpush1.bf16.msra.mxu1 %v4102_v21  ;;  %1472 = vmatprep.subr.bf16.mxu0 %v3720_v36  ;;  %v131_v36 = vrot.slane %v126_v0, %v5172_v2 }
  0xef   :  { %1513 = vmatprep.subr.bf16.mxu1 %v3722_v37  ;;  %v139_v37 = vrot.slane %v126_v0, %v5174_v63  ;;  %v135_v32 = vrot.slane %v126_v0, %v5180_v9 }
 0x142   :  { %v342_v34 = vpop.f32.mrb[0].mxu0 }
 0x143   :  { %v405_v21 = vpop.f32.mrb[0].mxu1  ;;  %v344_v35 = vpop.f32.mrb[1].mxu0 }
 0x144   :  { %v407_v33 = vpop.f32.mrb[1].mxu1  ;;  %v346_v31 = vpop.f32.mrb[2].mxu0 }
 0x145   :  { %v409_v30 = vpop.f32.mrb[2].mxu1  ;;  %v4127_v29 = vadd.f32 %v346_v31, %v131_v36  ;;  %v348_v28 = vpop.f32.mrb[3].mxu0  ;;  %v408_v38 = vadd.f32 %v407_v33, %v143_v8 }
 0x146   :  { %v4129_v27 = vadd.f32 %v409_v30, %v139_v37  ;;  %v411_v2 = vpop.f32.mrb[3].mxu1  ;;  %v4131_v26 = vadd.f32 %v348_v28, %v135_v32 }
 0x147   :  { %5462 = vst [vmem:[#allocation108_spill] sm:$0xff] %v4127_v29  ;;  %v4133_v63 = vadd.f32 %v411_v2, %v143_v8 }
 0x148   :  { %5463 = vst [vmem:[#allocation109_spill] sm:$0xff] %v4129_v27  ;;  %5464 = vst [vmem:[#allocation110_spill] sm:$0xff] %v4131_v26 }
 0x149   :  { %5465 = vst [vmem:[#allocation111_spill] sm:$0xff] %v4133_v63 }
 0x14a   :  { %v352_v25 = vpop.f32.mrb[4].mxu0 }
 0x14b   :  { %v415_v24 = vpop.f32.mrb[4].mxu1  ;;  %v4135_v13 = vadd.f32 %v352_v25, %v131_v36  ;;  %v354_v23 = vpop.f32.mrb[5].mxu0 }
 0x14c   :  { %v4137_v22 = vadd.f32 %v415_v24, %v139_v37  ;;  %v417_v0 = vpop.f32.mrb[5].mxu1  ;;  %v4139_v9 = vadd.f32 %v354_v23, %v135_v32  ;;  %v356_v31 = vpop.f32.mrb[6].mxu0 }
 0x14d   :  { %5466 = vst [vmem:[#allocation112_spill] sm:$0xff] %v4135_v13  ;;  %v4141_v29 = vadd.f32 %v417_v0, %v143_v8  ;;  %v419_v30 = vpop.f32.mrb[6].mxu1  ;;  %v4143_v27 = vadd.f32 %v356_v31, %v131_v36  ;;  %v358_v28 = vpop.f32.mrb[7].mxu0 }
 0x14e   :  { %5467 = vst [vmem:[#allocation113_spill] sm:$0xff] %v4137_v22  ;;  %5468 = vst [vmem:[#allocation114_spill] sm:$0xff] %v4139_v9  ;;  %v4145_v26 = vadd.f32 %v419_v30, %v139_v37  ;;  %v421_v2 = vpop.f32.mrb[7].mxu1  ;;  %v4147_v63 = vadd.f32 %v358_v28, %v135_v32 }
 0x14f   :  { %5469 = vst [vmem:[#allocation115_spill] sm:$0xff] %v4141_v29  ;;  %5470 = vst [vmem:[#allocation116_spill] sm:$0xff] %v4143_v27  ;;  %v4149_v25 = vadd.f32 %v421_v2, %v143_v8 }
 0x150   :  { %5471 = vst [vmem:[#allocation117_spill] sm:$0xff] %v4145_v26  ;;  %5472 = vst [vmem:[#allocation118_spill] sm:$0xff] %v4147_v63 }
 0x151   :  { %5473 = vst [vmem:[#allocation119_spill] sm:$0xff] %v4149_v25 }
 0x152   :  { %v362_v13 = vpop.f32.mrb[8].mxu0 }
 0x153   :  { %v425_v24 = vpop.f32.mrb[8].mxu1  ;;  %v4151_v22 = vadd.f32 %v362_v13, %v131_v36  ;;  %v364_v23 = vpop.f32.mrb[9].mxu0 }
 0x154   :  { %v4153_v9 = vadd.f32 %v425_v24, %v139_v37  ;;  %v427_v0 = vpop.f32.mrb[9].mxu1  ;;  %v4155_v29 = vadd.f32 %v364_v23, %v135_v32  ;;  %v366_v31 = vpop.f32.mrb[10].mxu0  ;;  %v406_v24 = vadd.f32 %v405_v21, %v139_v37 }
 0x155   :  { %5474 = vst [vmem:[#allocation120_spill] sm:$0xff] %v4151_v22  ;;  %v4157_v27 = vadd.f32 %v427_v0, %v143_v8  ;;  %v429_v30 = vpop.f32.mrb[10].mxu1  ;;  %v4159_v26 = vadd.f32 %v366_v31, %v131_v36  ;;  %v368_v28 = vpop.f32.mrb[11].mxu0  ;;  %v343_v22 = vadd.f32 %v342_v34, %v131_v36 }
 0x156   :  { %5475 = vst [vmem:[#allocation121_spill] sm:$0xff] %v4153_v9  ;;  %5476 = vst [vmem:[#allocation122_spill] sm:$0xff] %v4155_v29  ;;  %v4161_v63 = vadd.f32 %v429_v30, %v139_v37  ;;  %v431_v2 = vpop.f32.mrb[11].mxu1  ;;  %v4163_v25 = vadd.f32 %v368_v28, %v135_v32  ;;  %v345_v9 = vadd.f32 %v344_v35, %v135_v32 }
 0x157   :  { %5477 = vst [vmem:[#allocation123_spill] sm:$0xff] %v4157_v27  ;;  %5478 = vst [vmem:[#allocation124_spill] sm:$0xff] %v4159_v26  ;;  %v4165_v13 = vadd.f32 %v431_v2, %v143_v8 }
 0x158   :  { %5479 = vst [vmem:[#allocation125_spill] sm:$0xff] %v4161_v63  ;;  %5480 = vst [vmem:[#allocation126_spill] sm:$0xff] %v4163_v25 }
 0x159   :  { %5481 = vst [vmem:[#allocation127_spill] sm:$0xff] %v4165_v13  ;;  %v4453_v13 = vld [vmem:[#allocation9 + $0x14c] ss:$16 sps:$4 sm:$0xff]  }
 0x182   :  { %v904_v23 = vpop.f32.mrb[12].mxu0 }
 0x183   :  { %v945_v29 = vpop.f32.mrb[12].mxu1  ;;  %v905_v20 = vadd.f32 %v904_v23, %v343_v22  ;;  %v906_v27 = vpop.f32.mrb[13].mxu0 }
 0x184   :  { %v946_v0 = vadd.f32 %v945_v29, %v406_v24  ;;  %v947_v19 = vpop.f32.mrb[13].mxu1  ;;  %v907_v31 = vadd.f32 %v906_v27, %v345_v9  ;;  %v908_v18 = vpop.f32.mrb[14].mxu0 }
 0x185   :  { %v948_v26 = vadd.f32 %v947_v19, %v408_v38  ;;  %v949_v30 = vpop.f32.mrb[14].mxu1  ;;  %v2695_v63 = vmul.f32 -1.442695, %v905_v20  ;;  %v909_v17 = vpop.f32.mrb[15].mxu0 }
 0x186   :  { %v950_v28 = vpop.f32.mrb[15].mxu1  ;;  %v2696_v25 = vmul.f32 -1.442695, %v907_v31  ;;  %v2697_v36 = vmul.f32 -1.442695, %v946_v0 }
 0x187   :  { %3049 = vpow2.f32 %v2695_v63 }
 0x188   :  { %3051 = vpow2.f32 %v2696_v25 }
 0x189   :  { %3053 = vtanh.f32 %v948_v26 }
 0x18a   :  { %3055 = vpow2.f32 %v2697_v36 }
 0x191   :  { %v3050_v21 = vpop.eup %3049 }
 0x192   :  { %v961_v32 = vadd.f32 1.0, %v3050_v21  ;;  %v3052_v33 = vpop.eup %3051 }
 0x193   :  { %v962_v22 = vadd.f32 1.0, %v3052_v33  ;;  %v3054_v29 = vpop.eup %3053 }
 0x194   :  { %3057 = vrcp.f32 %v961_v32  ;;  %v3056_v27 = vpop.eup %3055 }
 0x195   :  { %3059 = vrcp.f32 %v962_v22  ;;  %v963_v20 = vadd.f32 1.0, %v3056_v27 }
 0x197   :  { %3061 = vrcp.f32 %v963_v20 }
 0x19e   :  { %v3058_v19 = vpop.eup %3057 }
 0x19f   :  { %v972_v18 = vmul.f32 %v3058_v19, %v3054_v29  ;;  %v3060_v35 = vpop.eup %3059 }
 0x1a0   :  { %v971_v17 = vmul.f32 0.0, %v3060_v35 }
 0x1a1   :  { %v3062_v63 = vpop.eup %3061 }
 0x1a2   :  { %v4167_v38 = vadd.f32 %v972_v18, %v971_v17 }
 0x1a4   :  { %3063 = vtanh.f32 %v4167_v38 }
 0x1ae   :  { %v3064_v8 = vpop.eup %3063 }
 0x1af   :  { %v975_v26 = vmul.f32 %v3064_v8, %v3062_v63 }
 0x1b1   :  { %v1040_v9 = vpack.c.bf16 %v975_v26, %v975_v26 }
 0x1b3   :  { %1394 = vmatmul.mubr.bf16.vlgmr.msra.gmra.mrb[16].mxu0 %v1040_v9  ;;  %1435 = vmatmul.mubr.bf16.vlgmr.msra.gmra.mrb[16].mxu1 %v1040_v9 }
 0x1b4   :  { %1504 = vmatprep.mubr.bf16.mxu0 %v1040_v9  ;;  %1545 = vmatprep.mubr.bf16.mxu1 %v1040_v9 }
 0x1b5   :  { %1473 = vmatpush1.bf16.msra.mxu0 %v3724_v39  ;;  %1514 = vmatpush1.bf16.msra.mxu1 %v3726_v40  ;;  %v5482_v39 = vld [vmem:[#allocation17_spill] sm:$0xff]  ;;  %v5483_v40 = vld [vmem:[#allocation18_spill] sm:$0xff] }
 0x1b6   :  { %1474 = vmatprep.subr.bf16.mxu0 %v3728_v41  ;;  %1515 = vmatprep.subr.bf16.mxu1 %v3732_v42  ;;  %v5484_v41 = vld [vmem:[#allocation19_spill] sm:$0xff]  ;;  %v5485_v42 = vld [vmem:[#allocation20_spill] sm:$0xff] }
 0x1b9   :  { %1475 = vmatpush1.bf16.msra.mxu0 %v3734_v43  ;;  %1516 = vmatpush1.bf16.msra.mxu1 %v3738_v44  ;;  %v5486_v43 = vld [vmem:[#allocation21_spill] sm:$0xff]  ;;  %v5487_v44 = vld [vmem:[#allocation22_spill] sm:$0xff] }
 0x1ba   :  { %1476 = vmatprep.subr.bf16.mxu0 %v3742_v45  ;;  %1517 = vmatprep.subr.bf16.mxu1 %v3744_v46  ;;  %v5488_v45 = vld [vmem:[#allocation23_spill] sm:$0xff]  ;;  %v5489_v46 = vld [vmem:[#allocation24_spill] sm:$0xff] }
 0x1bd   :  { %1477 = vmatpush1.bf16.msra.mxu0 %v3748_v47  ;;  %1518 = vmatpush1.bf16.msra.mxu1 %v3752_v48  ;;  %v5490_v47 = vld [vmem:[#allocation25_spill] sm:$0xff]  ;;  %v5491_v48 = vld [vmem:[#allocation26_spill] sm:$0xff] }
 0x1be   :  { %1478 = vmatprep.subr.bf16.mxu0 %v3754_v49  ;;  %1519 = vmatprep.subr.bf16.mxu1 %v3758_v50  ;;  %v5492_v49 = vld [vmem:[#allocation27_spill] sm:$0xff]  ;;  %v5493_v50 = vld [vmem:[#allocation28_spill] sm:$0xff] }
 0x1c1   :  { %1479 = vmatpush1.bf16.msra.mxu0 %v3760_v51  ;;  %1520 = vmatpush1.bf16.msra.mxu1 %v3764_v52  ;;  %v5494_v51 = vld [vmem:[#allocation29_spill] sm:$0xff]  ;;  %v5495_v52 = vld [vmem:[#allocation30_spill] sm:$0xff] }
 0x1c2   :  { %1480 = vmatprep.subr.bf16.mxu0 %v3768_v53  ;;  %1521 = vmatprep.subr.bf16.mxu1 %v3770_v54  ;;  %v5496_v53 = vld [vmem:[#allocation31_spill] sm:$0xff]  ;;  %v5497_v54 = vld [vmem:[#allocation32_spill] sm:$0xff] }
 0x1c5   :  { %1481 = vmatpush1.bf16.msra.mxu0 %v3772_v55  ;;  %1522 = vmatpush1.bf16.msra.mxu1 %v3776_v56  ;;  %v5498_v55 = vld [vmem:[#allocation33_spill] sm:$0xff]  ;;  %v5499_v56 = vld [vmem:[#allocation34_spill] sm:$0xff] }
 0x1c6   :  { %1482 = vmatprep.subr.bf16.mxu0 %v3778_v57  ;;  %1523 = vmatprep.subr.bf16.mxu1 %v3782_v58  ;;  %v5500_v57 = vld [vmem:[#allocation35_spill] sm:$0xff]  ;;  %v5501_v58 = vld [vmem:[#allocation36_spill] sm:$0xff] }
 0x1c7   :  { %5599 = vst [vmem:[#allocation35_spill] sm:$0xff] %v4453_v13 }
 0x1c9   :  { %1483 = vmatpush1.bf16.msra.mxu0 %v3784_v59  ;;  %1524 = vmatpush1.bf16.msra.mxu1 %v3786_v60  ;;  %v5502_v59 = vld [vmem:[#allocation37_spill] sm:$0xff]  ;;  %v5503_v60 = vld [vmem:[#allocation38_spill] sm:$0xff] }
 0x1ca   :  { %1484 = vmatprep.subr.bf16.mxu0 %v3790_v61  ;;  %1525 = vmatprep.subr.bf16.mxu1 %v3794_v62  ;;  %v5504_v61 = vld [vmem:[#allocation39_spill] sm:$0xff]  ;;  %v5505_v62 = vld [vmem:[#allocation40_spill] sm:$0xff] }
 0x1cd   :  { %1485 = vmatpush1.bf16.msra.mxu0 %v3796_v3  ;;  %1526 = vmatpush1.bf16.msra.mxu1 %v3800_v4  ;;  %v5506_v3 = vld [vmem:[#allocation41_spill] sm:$0xff]  ;;  %v5507_v4 = vld [vmem:[#allocation42_spill] sm:$0xff] }
 0x1ce   :  { %1486 = vmatprep.subr.bf16.mxu0 %v3802_v5  ;;  %1527 = vmatprep.subr.bf16.mxu1 %v3806_v6  ;;  %v5508_v5 = vld [vmem:[#allocation43_spill] sm:$0xff]  ;;  %v5509_v6 = vld [vmem:[#allocation44_spill] sm:$0xff] }
 0x1d1   :  { %1487 = vmatpush1.bf16.msra.mxu0 %v3808_v7  ;;  %1528 = vmatpush1.bf16.msra.mxu1 %v3814_v10  ;;  %v2630_v7 = vld [vmem:[%s5071_s4 + $0x4] sm:$0xf]  ;;  %v5510_v10 = vld [vmem:[#allocation107_spill] sm:$0xff] }
 0x1d2   :  { %1488 = vmatprep.subr.bf16.mxu0 %v3816_v11  ;;  %1529 = vmatprep.subr.bf16.mxu1 %v3820_v12  ;;  %v5511_v11 = vsub.s32 0, %v5510_v10  ;;  %v5513_v36 = vsub.s32 2, %v5510_v10  ;;  %v5514_v32 = vsub.s32 3, %v5510_v10 }
 0x1d4   :  { %v4239_v12 = vrot.slane %v2630_v7, %v5511_v11  ;;  %v4249_v21 = vrot.slane %v2630_v7, %v5513_v36  ;;  %v4253_v33 = vrot.slane %v2630_v7, %v5514_v32  ;;  %v5538_v11 = vld [vmem:[#allocation68_spill] sm:$0xff]  ;;  %v5552_v36 = vld [vmem:[#allocation82_spill] sm:$0xff]  ;;  %v5553_v32 = vld [vmem:[#allocation83_spill] sm:$0xff] }
 0x1d5   :  { %1489 = vmatpush1.bf16.msra.mxu0 %v3822_v14  ;;  %1530 = vmatpush1.bf16.msra.mxu1 %v3826_v1  ;;  %v5512_v14 = vsub.s32 1, %v5510_v10  ;;  %v5537_v10 = vld [vmem:[#allocation67_spill] sm:$0xff] }
 0x1d6   :  { %1490 = vmatprep.subr.bf16.mxu0 %v3830_v15  ;;  %1531 = vmatprep.subr.bf16.mxu1 %v3832_v16 }
 0x1d7   :  { %v4243_v1 = vrot.slane %v2630_v7, %v5512_v14  ;;  %v5536_v7 = vld [vmem:[#allocation66_spill] sm:$0xff]  ;;  %v5539_v14 = vld [vmem:[#allocation69_spill] sm:$0xff] }
 0x1d9   :  { %1491 = vmatpush1.bf16.msra.mxu0 %v5482_v39  ;;  %1532 = vmatpush1.bf16.msra.mxu1 %v5483_v40 }
 0x1da   :  { %1492 = vmatprep.subr.bf16.mxu0 %v5484_v41  ;;  %1533 = vmatprep.subr.bf16.mxu1 %v5485_v42 }
 0x1dd   :  { %1493 = vmatpush1.bf16.msra.mxu0 %v5486_v43  ;;  %1534 = vmatpush1.bf16.msra.mxu1 %v5487_v44 }
 0x1de   :  { %1494 = vmatprep.subr.bf16.mxu0 %v5488_v45  ;;  %1535 = vmatprep.subr.bf16.mxu1 %v5489_v46  ;;  %v5515_v46 = vld [vmem:[#allocation45_spill] sm:$0xff] }
 0x1e1   :  { %1495 = vmatpush1.bf16.msra.mxu0 %v5490_v47  ;;  %1536 = vmatpush1.bf16.msra.mxu1 %v5491_v48  ;;  %v5516_v47 = vld [vmem:[#allocation46_spill] sm:$0xff]  ;;  %v5517_v48 = vld [vmem:[#allocation47_spill] sm:$0xff] }
 0x1e2   :  { %1496 = vmatprep.subr.bf16.mxu0 %v5492_v49  ;;  %1537 = vmatprep.subr.bf16.mxu1 %v5493_v50  ;;  %v5518_v49 = vld [vmem:[#allocation48_spill] sm:$0xff]  ;;  %v5519_v50 = vld [vmem:[#allocation49_spill] sm:$0xff] }
 0x1e5   :  { %1497 = vmatpush1.bf16.msra.mxu0 %v5494_v51  ;;  %1538 = vmatpush1.bf16.msra.mxu1 %v5495_v52  ;;  %v5520_v51 = vld [vmem:[#allocation50_spill] sm:$0xff]  ;;  %v5521_v52 = vld [vmem:[#allocation51_spill] sm:$0xff] }
 0x1e6   :  { %1498 = vmatprep.subr.bf16.mxu0 %v5496_v53  ;;  %1539 = vmatprep.subr.bf16.mxu1 %v5497_v54  ;;  %v5522_v53 = vld [vmem:[#allocation52_spill] sm:$0xff]  ;;  %v5523_v54 = vld [vmem:[#allocation53_spill] sm:$0xff] }
 0x1e9   :  { %1499 = vmatpush1.bf16.msra.mxu0 %v5498_v55  ;;  %1540 = vmatpush1.bf16.msra.mxu1 %v5499_v56  ;;  %v5524_v55 = vld [vmem:[#allocation54_spill] sm:$0xff]  ;;  %v5525_v56 = vld [vmem:[#allocation55_spill] sm:$0xff] }
 0x1ea   :  { %1500 = vmatprep.subr.bf16.mxu0 %v5500_v57  ;;  %1541 = vmatprep.subr.bf16.mxu1 %v5501_v58  ;;  %v5526_v57 = vld [vmem:[#allocation56_spill] sm:$0xff]  ;;  %v5527_v58 = vld [vmem:[#allocation57_spill] sm:$0xff] }
 0x1ed   :  { %1501 = vmatpush1.bf16.msra.mxu0 %v5502_v59  ;;  %1542 = vmatpush1.bf16.msra.mxu1 %v5503_v60  ;;  %v5528_v59 = vld [vmem:[#allocation58_spill] sm:$0xff]  ;;  %v5529_v60 = vld [vmem:[#allocation59_spill] sm:$0xff] }
 0x1ee   :  { %1502 = vmatprep.subr.bf16.mxu0 %v5504_v61  ;;  %1543 = vmatprep.subr.bf16.mxu1 %v5505_v62  ;;  %v5530_v61 = vld [vmem:[#allocation60_spill] sm:$0xff]  ;;  %v5531_v62 = vld [vmem:[#allocation61_spill] sm:$0xff] }
 0x1f1   :  { %1503 = vmatpush1.bf16.msra.mxu0 %v5506_v3  ;;  %1544 = vmatpush1.bf16.msra.mxu1 %v5507_v4  ;;  %v5532_v3 = vld [vmem:[#allocation62_spill] sm:$0xff]  ;;  %v5533_v4 = vld [vmem:[#allocation63_spill] sm:$0xff] }
 0x1f2   :  { %1579 = vmatprep.subr.bf16.mxu0 %v5508_v5  ;;  %1620 = vmatprep.subr.bf16.mxu1 %v5509_v6  ;;  %v5534_v5 = vld [vmem:[#allocation64_spill] sm:$0xff]  ;;  %v5535_v6 = vld [vmem:[#allocation65_spill] sm:$0xff] }
 0x286   :  { %v1395_v15 = vpop.f32.mrb[16].mxu0  ;;  %v1436_v16 = vpop.f32.mrb[16].mxu1 }
 0x287   :  { %v1396_v37 = vadd.f32 %v1395_v15, %v4239_v12  ;;  %v1397_v34 = vpop.f32.mrb[17].mxu0  ;;  %v1438_v25 = vpop.f32.mrb[17].mxu1  ;;  %v1437_v22 = vadd.f32 %v1436_v16, %v4249_v21  ;;  %v5540_v15 = vld [vmem:[#allocation70_spill] sm:$0xff]  ;;  %v5541_v16 = vld [vmem:[#allocation71_spill] sm:$0xff] }
 0x288   :  { %v1398_v2 = vadd.f32 %v1397_v34, %v4243_v1  ;;  %v1399_v24 = vpop.f32.mrb[18].mxu0  ;;  %v1440_v23 = vpop.f32.mrb[18].mxu1  ;;  %v1439_v29 = vadd.f32 %v1438_v25, %v4253_v33  ;;  %v5543_v34 = vld [vmem:[#allocation73_spill] sm:$0xff]  ;;  %v5544_v25 = vld [vmem:[#allocation74_spill] sm:$0xff] }
 0x289   :  { %v2762_v0 = vmul.f32 -1.442695, %v1396_v37  ;;  %v1400_v31 = vpop.f32.mrb[19].mxu0  ;;  %v1441_v30 = vpop.f32.mrb[19].mxu1  ;;  %v2764_v27 = vmul.f32 -1.442695, %v1437_v22 }
 0x28a   :  { %v2763_v28 = vmul.f32 -1.442695, %v1398_v2  ;;  %v5542_v37 = vld [vmem:[#allocation72_spill] sm:$0xff]  ;;  %v5545_v2 = vld [vmem:[#allocation75_spill] sm:$0xff]  ;;  %v5547_v23 = vld [vmem:[#allocation77_spill] sm:$0xff] }
 0x28b   :  { %3065 = vpow2.f32 %v2762_v0  ;;  %v5546_v24 = vld [vmem:[#allocation76_spill] sm:$0xff]  ;;  %v5548_v0 = vld [vmem:[#allocation78_spill] sm:$0xff]  ;;  %v5549_v31 = vld [vmem:[#allocation79_spill] sm:$0xff] }
 0x28c   :  { %3067 = vpow2.f32 %v2763_v28  ;;  %v5550_v30 = vld [vmem:[#allocation80_spill] sm:$0xff]  ;;  %v5551_v28 = vld [vmem:[#allocation81_spill] sm:$0xff] }
 0x28d   :  { %3069 = vtanh.f32 %v1439_v29  ;;  %v5554_v22 = vld [vmem:[#allocation84_spill] sm:$0xff]  ;;  %v5555_v29 = vld [vmem:[#allocation85_spill] sm:$0xff] }
 0x28e   :  { %3071 = vpow2.f32 %v2764_v27  ;;  %v5556_v27 = vld [vmem:[#allocation86_spill] sm:$0xff] }
 0x295   :  { %v3066_v19 = vpop.eup %3065 }
 0x296   :  { %v1452_v18 = vadd.f32 1.0, %v3066_v19  ;;  %v3068_v35 = vpop.eup %3067  ;;  %v5557_v19 = vld [vmem:[#allocation87_spill] sm:$0xff] }
 0x297   :  { %v1453_v20 = vadd.f32 1.0, %v3068_v35  ;;  %v3070_v17 = vpop.eup %3069  ;;  %v5559_v35 = vld [vmem:[#allocation89_spill] sm:$0xff] }
 0x298   :  { %3073 = vrcp.f32 %v1452_v18  ;;  %v3072_v63 = vpop.eup %3071  ;;  %v5558_v18 = vld [vmem:[#allocation88_spill] sm:$0xff] }
 0x299   :  { %3075 = vrcp.f32 %v1453_v20  ;;  %v1454_v39 = vadd.f32 1.0, %v3072_v63  ;;  %v5560_v20 = vld [vmem:[#allocation90_spill] sm:$0xff]  ;;  %v5562_v63 = vld [vmem:[#allocation92_spill] sm:$0xff] }
 0x29b   :  { %3077 = vrcp.f32 %v1454_v39  ;;  %v5566_v39 = vld [vmem:[#allocation96_spill] sm:$0xff] }
 0x2a2   :  { %v3074_v8 = vpop.eup %3073 }
 0x2a3   :  { %v1463_v26 = vmul.f32 %v3074_v8, %v3070_v17  ;;  %v3076_v9 = vpop.eup %3075  ;;  %v5561_v17 = vld [vmem:[#allocation91_spill] sm:$0xff]  ;;  %v5563_v8 = vld [vmem:[#allocation93_spill] sm:$0xff] }
 0x2a4   :  { %v1462_v40 = vmul.f32 0.0, %v3076_v9  ;;  %v5565_v9 = vld [vmem:[#allocation95_spill] sm:$0xff] }
 0x2a5   :  { %v3078_v42 = vpop.eup %3077 }
 0x2a6   :  { %v4257_v41 = vadd.f32 %v1463_v26, %v1462_v40  ;;  %v5564_v26 = vld [vmem:[#allocation94_spill] sm:$0xff]  ;;  %v5567_v40 = vld [vmem:[#allocation97_spill] sm:$0xff] }
 0x2a8   :  { %3079 = vtanh.f32 %v4257_v41 }
 0x2b2   :  { %v3080_v43 = vpop.eup %3079 }
 0x2b3   :  { %v1466_v44 = vmul.f32 %v3080_v43, %v3078_v42  ;;  %v5568_v42 = vld [vmem:[#allocation98_spill] sm:$0xff]  ;;  %v5569_v43 = vld [vmem:[#allocation99_spill] sm:$0xff] }
 0x2b5   :  { %v1471_v45 = vpack.c.bf16 %v1466_v44, %v1466_v44  ;;  %v5570_v44 = vld [vmem:[#allocation100_spill] sm:$0xff] }
 0x2b7   :  { %1505 = vmatmul.mubr.bf16.vlgmr.msra.gmra.mrb[20].mxu0 %v1471_v45  ;;  %1546 = vmatmul.mubr.bf16.vlgmr.msra.gmra.mrb[20].mxu1 %v1471_v45 }
 0x2b8   :  { %1611 = vmatprep.mubr.bf16.mxu0 %v1471_v45  ;;  %1652 = vmatprep.mubr.bf16.mxu1 %v1471_v45  ;;  %v5571_v45 = vld [vmem:[#allocation101_spill] sm:$0xff] }
 0x2b9   :  { %1580 = vmatpush1.bf16.msra.mxu0 %v5515_v46  ;;  %1621 = vmatpush1.bf16.msra.mxu1 %v5516_v47  ;;  %v5572_v46 = vld [vmem:[#allocation102_spill] sm:$0xff]  ;;  %v5573_v47 = vld [vmem:[#allocation103_spill] sm:$0xff] }
 0x2ba   :  { %1581 = vmatprep.subr.bf16.mxu0 %v5517_v48  ;;  %1622 = vmatprep.subr.bf16.mxu1 %v5518_v49  ;;  %v5574_v48 = vld [vmem:[#allocation104_spill] sm:$0xff]  ;;  %v5575_v49 = vld [vmem:[#allocation105_spill] sm:$0xff] }
 0x2bd   :  { %1582 = vmatpush1.bf16.msra.mxu0 %v5519_v50  ;;  %1623 = vmatpush1.bf16.msra.mxu1 %v5520_v51  ;;  %v5576_v50 = vld [vmem:[#allocation106_spill] sm:$0xff] }
 0x2be   :  { %1583 = vmatprep.subr.bf16.mxu0 %v5521_v52  ;;  %1624 = vmatprep.subr.bf16.mxu1 %v5522_v53  ;;  %v4322_v51 = vld [vmem:[#allocation9 + $0x4] ss:$16 sps:$4 sm:$0xff]   ;;  %v4325_v52 = vld [vmem:[#allocation9 + $0xc] ss:$16 sps:$4 sm:$0xff]  }
 0x2bf   :  { %5577 = vst [vmem:[#allocation17_spill] sm:$0xff] %v4322_v51  ;;  %5578 = vst [vmem:[#allocation18_spill] sm:$0xff] %v4325_v52 }
 0x2c1   :  { %1584 = vmatpush1.bf16.msra.mxu0 %v5523_v54  ;;  %1625 = vmatpush1.bf16.msra.mxu1 %v5524_v55  ;;  %v5579_v55 = vld [vmem:[#allocation108_spill] sm:$0xff] }
 0x2c2   :  { %1585 = vmatprep.subr.bf16.mxu0 %v5525_v56  ;;  %1626 = vmatprep.subr.bf16.mxu1 %v5526_v57  ;;  %v5580_v57 = vld [vmem:[#allocation109_spill] sm:$0xff] }
 0x2c5   :  { %1586 = vmatpush1.bf16.msra.mxu0 %v5527_v58  ;;  %1627 = vmatpush1.bf16.msra.mxu1 %v5528_v59 }
 0x2c6   :  { %1587 = vmatprep.subr.bf16.mxu0 %v5529_v60  ;;  %1628 = vmatprep.subr.bf16.mxu1 %v5530_v61  ;;  %v5581_v61 = vld [vmem:[#allocation110_spill] sm:$0xff] }
 0x2c9   :  { %1588 = vmatpush1.bf16.msra.mxu0 %v5531_v62  ;;  %1629 = vmatpush1.bf16.msra.mxu1 %v5532_v3  ;;  %v5582_v3 = vld [vmem:[#allocation111_spill] sm:$0xff] }
 0x2ca   :  { %1589 = vmatprep.subr.bf16.mxu0 %v5533_v4  ;;  %1630 = vmatprep.subr.bf16.mxu1 %v5534_v5 }
 0x2cd   :  { %1590 = vmatpush1.bf16.msra.mxu0 %v5535_v6  ;;  %1631 = vmatpush1.bf16.msra.mxu1 %v5536_v7 }
 0x2ce   :  { %1591 = vmatprep.subr.bf16.mxu0 %v5537_v10  ;;  %1632 = vmatprep.subr.bf16.mxu1 %v5538_v11 }
 0x2d1   :  { %1592 = vmatpush1.bf16.msra.mxu0 %v5539_v14  ;;  %1633 = vmatpush1.bf16.msra.mxu1 %v5540_v15 }
 0x2d2   :  { %1593 = vmatprep.subr.bf16.mxu0 %v5541_v16  ;;  %1634 = vmatprep.subr.bf16.mxu1 %v5542_v37 }
 0x2d5   :  { %1594 = vmatpush1.bf16.msra.mxu0 %v5543_v34  ;;  %1635 = vmatpush1.bf16.msra.mxu1 %v5544_v25 }
 0x2d6   :  { %1595 = vmatprep.subr.bf16.mxu0 %v5545_v2  ;;  %1636 = vmatprep.subr.bf16.mxu1 %v5546_v24 }
 0x2d9   :  { %1596 = vmatpush1.bf16.msra.mxu0 %v5547_v23  ;;  %1637 = vmatpush1.bf16.msra.mxu1 %v5548_v0 }
 0x2da   :  { %1597 = vmatprep.subr.bf16.mxu0 %v5549_v31  ;;  %1638 = vmatprep.subr.bf16.mxu1 %v5550_v30 }
 0x2dd   :  { %1598 = vmatpush1.bf16.msra.mxu0 %v5551_v28  ;;  %1639 = vmatpush1.bf16.msra.mxu1 %v5552_v36 }
 0x2de   :  { %1599 = vmatprep.subr.bf16.mxu0 %v5553_v32  ;;  %1640 = vmatprep.subr.bf16.mxu1 %v5554_v22 }
 0x2e1   :  { %1600 = vmatpush1.bf16.msra.mxu0 %v5555_v29  ;;  %1641 = vmatpush1.bf16.msra.mxu1 %v5556_v27 }
 0x2e2   :  { %1601 = vmatprep.subr.bf16.mxu0 %v5557_v19  ;;  %1642 = vmatprep.subr.bf16.mxu1 %v5558_v18  ;;  %v4336_v19 = vld [vmem:[#allocation9] ss:$16 sps:$4 sm:$0xff]   ;;  %v4339_v18 = vld [vmem:[#allocation9 + $0x8] ss:$16 sps:$4 sm:$0xff]  }
 0x2e5   :  { %1602 = vmatpush1.bf16.msra.mxu0 %v5559_v35  ;;  %1643 = vmatpush1.bf16.msra.mxu1 %v5560_v20  ;;  %v4345_v35 = vld [vmem:[#allocation9 + $0x2c] ss:$16 sps:$4 sm:$0xff]   ;;  %v4348_v20 = vld [vmem:[#allocation9 + $0x20] ss:$16 sps:$4 sm:$0xff]  }
 0x2e6   :  { %1603 = vmatprep.subr.bf16.mxu0 %v5561_v17  ;;  %1644 = vmatprep.subr.bf16.mxu1 %v5562_v63 }
 0x2e9   :  { %1604 = vmatpush1.bf16.msra.mxu0 %v5563_v8  ;;  %1645 = vmatpush1.bf16.msra.mxu1 %v5564_v26 }
 0x2ea   :  { %1605 = vmatprep.subr.bf16.mxu0 %v5565_v9  ;;  %1646 = vmatprep.subr.bf16.mxu1 %v5566_v39 }
 0x2ed   :  { %1606 = vmatpush1.bf16.msra.mxu0 %v5567_v40  ;;  %1647 = vmatpush1.bf16.msra.mxu1 %v5568_v42 }
 0x2ee   :  { %1607 = vmatprep.subr.bf16.mxu0 %v5569_v43  ;;  %1648 = vmatprep.subr.bf16.mxu1 %v5570_v44 }
 0x2f1   :  { %1608 = vmatpush1.bf16.msra.mxu0 %v5571_v45  ;;  %1649 = vmatpush1.bf16.msra.mxu1 %v5572_v46 }
 0x2f2   :  { %1609 = vmatprep.subr.bf16.mxu0 %v5573_v47  ;;  %1650 = vmatprep.subr.bf16.mxu1 %v5574_v48 }
 0x2f5   :  { %1610 = vmatpush1.bf16.msra.mxu0 %v5575_v49  ;;  %1651 = vmatpush1.bf16.msra.mxu1 %v5576_v50 }
 0x2f6   :  { %1690 = vmatprep.subr.bf16.mxu0 %v4322_v51  ;;  %1731 = vmatprep.subr.bf16.mxu1 %v4325_v52 }
 0x38a   :  { %v1506_v53 = vpop.f32.mrb[20].mxu0  ;;  %v1547_v54 = vpop.f32.mrb[20].mxu1 }
 0x38b   :  { %v1507_v56 = vadd.f32 %v1506_v53, %v5579_v55  ;;  %v1548_v58 = vadd.f32 %v1547_v54, %v5580_v57  ;;  %v1508_v59 = vpop.f32.mrb[21].mxu0  ;;  %v1549_v60 = vpop.f32.mrb[21].mxu1  ;;  %v4351_v53 = vld [vmem:[#allocation9 + $0x28] ss:$16 sps:$4 sm:$0xff]   ;;  %v4354_v54 = vld [vmem:[#allocation9 + $0x44] ss:$16 sps:$4 sm:$0xff]  }
 0x38c   :  { %v1509_v62 = vadd.f32 %v1508_v59, %v5581_v61  ;;  %v1550_v4 = vadd.f32 %v1549_v60, %v5582_v3  ;;  %v1510_v5 = vpop.f32.mrb[22].mxu0  ;;  %v1551_v6 = vpop.f32.mrb[22].mxu1  ;;  %v4357_v55 = vld [vmem:[#allocation9 + $0x4c] ss:$16 sps:$4 sm:$0xff]   ;;  %v4363_v57 = vld [vmem:[#allocation9 + $0x48] ss:$16 sps:$4 sm:$0xff]  }
 0x38d   :  { %v2765_v7 = vmul.f32 -1.442695, %v1507_v56  ;;  %v1511_v10 = vpop.f32.mrb[23].mxu0  ;;  %v1552_v11 = vpop.f32.mrb[23].mxu1  ;;  %v2767_v15 = vmul.f32 -1.442695, %v1548_v58 }
 0x38e   :  { %v2766_v14 = vmul.f32 -1.442695, %v1509_v62  ;;  %v4360_v56 = vld [vmem:[#allocation9 + $0x40] ss:$16 sps:$4 sm:$0xff]   ;;  %v4366_v58 = vld [vmem:[#allocation9 + $0x64] ss:$16 sps:$4 sm:$0xff]  }
 0x38f   :  { %3081 = vpow2.f32 %v2765_v7  ;;  %v4369_v59 = vld [vmem:[#allocation9 + $0x6c] ss:$16 sps:$4 sm:$0xff]   ;;  %v4372_v60 = vld [vmem:[#allocation9 + $0x60] ss:$16 sps:$4 sm:$0xff]   ;;  %v4375_v61 = vld [vmem:[#allocation9 + $0x68] ss:$16 sps:$4 sm:$0xff]  }
 0x390   :  { %3083 = vpow2.f32 %v2766_v14  ;;  %v4378_v62 = vld [vmem:[#allocation9 + $0x84] ss:$16 sps:$4 sm:$0xff]   ;;  %v4381_v3 = vld [vmem:[#allocation9 + $0x8c] ss:$16 sps:$4 sm:$0xff]   ;;  %v4387_v5 = vld [vmem:[#allocation9 + $0x88] ss:$16 sps:$4 sm:$0xff]  }
 0x391   :  { %3085 = vtanh.f32 %v1550_v4  ;;  %v4384_v4 = vld [vmem:[#allocation9 + $0x80] ss:$16 sps:$4 sm:$0xff]   ;;  %v4390_v6 = vld [vmem:[#allocation9 + $0xa4] ss:$16 sps:$4 sm:$0xff]   ;;  %v4393_v7 = vld [vmem:[#allocation9 + $0xac] ss:$16 sps:$4 sm:$0xff]  }
 0x392   :  { %3087 = vpow2.f32 %v2767_v15  ;;  %v4396_v10 = vld [vmem:[#allocation9 + $0xa0] ss:$16 sps:$4 sm:$0xff]   ;;  %v4399_v11 = vld [vmem:[#allocation9 + $0xa8] ss:$16 sps:$4 sm:$0xff]   ;;  %v4402_v14 = vld [vmem:[#allocation9 + $0xc4] ss:$16 sps:$4 sm:$0xff]  }
 0x393   :  { %v4405_v15 = vld [vmem:[#allocation9 + $0xcc] ss:$16 sps:$4 sm:$0xff]  }
 0x394   :  { %5583 = vst [vmem:[#allocation19_spill] sm:$0xff] %v4405_v15 }
 0x399   :  { %v3082_v16 = vpop.eup %3081 }
 0x39a   :  { %v1563_v37 = vadd.f32 1.0, %v3082_v16  ;;  %v3084_v34 = vpop.eup %3083  ;;  %v4408_v16 = vld [vmem:[#allocation9 + $0xc0] ss:$16 sps:$4 sm:$0xff]  }
 0x39b   :  { %v1564_v25 = vadd.f32 1.0, %v3084_v34  ;;  %v3086_v2 = vpop.eup %3085  ;;  %5584 = vst [vmem:[#allocation20_spill] sm:$0xff] %v4408_v16  ;;  %v4414_v34 = vld [vmem:[#allocation9 + $0xe4] ss:$16 sps:$4 sm:$0xff]  }
 0x39c   :  { %3089 = vrcp.f32 %v1563_v37  ;;  %v3088_v24 = vpop.eup %3087  ;;  %v4411_v37 = vld [vmem:[#allocation9 + $0xc8] ss:$16 sps:$4 sm:$0xff]   ;;  %5586 = vst [vmem:[#allocation22_spill] sm:$0xff] %v4414_v34 }
 0x39d   :  { %3091 = vrcp.f32 %v1564_v25  ;;  %v1565_v30 = vadd.f32 1.0, %v3088_v24  ;;  %5585 = vst [vmem:[#allocation21_spill] sm:$0xff] %v4411_v37  ;;  %v4417_v25 = vld [vmem:[#allocation9 + $0xec] ss:$16 sps:$4 sm:$0xff]   ;;  %v4423_v24 = vld [vmem:[#allocation9 + $0xe8] ss:$16 sps:$4 sm:$0xff]  }
 0x39e   :  { %5587 = vst [vmem:[#allocation23_spill] sm:$0xff] %v4417_v25  ;;  %5589 = vst [vmem:[#allocation25_spill] sm:$0xff] %v4423_v24 }
 0x39f   :  { %3093 = vrcp.f32 %v1565_v30  ;;  %v4435_v30 = vld [vmem:[#allocation9 + $0x108] ss:$16 sps:$4 sm:$0xff]  }
 0x3a0   :  { %5593 = vst [vmem:[#allocation29_spill] sm:$0xff] %v4435_v30 }
 0x3a6   :  { %v3090_v23 = vpop.eup %3089 }
 0x3a7   :  { %v1574_v0 = vmul.f32 %v3090_v23, %v3086_v2  ;;  %v3092_v31 = vpop.eup %3091  ;;  %v4420_v2 = vld [vmem:[#allocation9 + $0xe0] ss:$16 sps:$4 sm:$0xff]   ;;  %v4426_v23 = vld [vmem:[#allocation9 + $0x104] ss:$16 sps:$4 sm:$0xff]  }
 0x3a8   :  { %v1573_v28 = vmul.f32 %v3092_v31, %v4167_v38  ;;  %v4342_v38 = vld [vmem:[#allocation9 + $0x24] ss:$16 sps:$4 sm:$0xff]   ;;  %5588 = vst [vmem:[#allocation24_spill] sm:$0xff] %v4420_v2  ;;  %5590 = vst [vmem:[#allocation26_spill] sm:$0xff] %v4426_v23  ;;  %v4432_v31 = vld [vmem:[#allocation9 + $0x100] ss:$16 sps:$4 sm:$0xff]  }
 0x3a9   :  { %v3094_v32 = vpop.eup %3093  ;;  %5592 = vst [vmem:[#allocation28_spill] sm:$0xff] %v4432_v31 }
 0x3aa   :  { %v4333_v36 = vadd.f32 %v1574_v0, %v1573_v28  ;;  %v4429_v0 = vld [vmem:[#allocation9 + $0x10c] ss:$16 sps:$4 sm:$0xff]   ;;  %v4438_v28 = vld [vmem:[#allocation9 + $0x124] ss:$16 sps:$4 sm:$0xff]  }
 0x3ab   :  { %5591 = vst [vmem:[#allocation27_spill] sm:$0xff] %v4429_v0  ;;  %5594 = vst [vmem:[#allocation30_spill] sm:$0xff] %v4438_v28 }
 0x3ac   :  { %3095 = vtanh.f32 %v4333_v36 }
 0x3b6   :  { %v3096_v22 = vpop.eup %3095 }
 0x3b7   :  { %v1577_v29 = vmul.f32 %v3096_v22, %v3094_v32  ;;  %v4441_v32 = vld [vmem:[#allocation9 + $0x12c] ss:$16 sps:$4 sm:$0xff]   ;;  %v4444_v22 = vld [vmem:[#allocation9 + $0x120] ss:$16 sps:$4 sm:$0xff]  }
 0x3b8   :  { %5595 = vst [vmem:[#allocation31_spill] sm:$0xff] %v4441_v32  ;;  %5596 = vst [vmem:[#allocation32_spill] sm:$0xff] %v4444_v22 }
 0x3b9   :  { %v1578_v27 = vpack.c.bf16 %v1577_v29, %v1577_v29  ;;  %v4447_v29 = vld [vmem:[#allocation9 + $0x128] ss:$16 sps:$4 sm:$0xff]  }
 0x3ba   :  { %5597 = vst [vmem:[#allocation33_spill] sm:$0xff] %v4447_v29 }
 0x3bb   :  { %1612 = vmatmul.mubr.bf16.vlgmr.msra.gmra.mrb[24].mxu0 %v1578_v27  ;;  %1653 = vmatmul.mubr.bf16.vlgmr.msra.gmra.mrb[24].mxu1 %v1578_v27 }
 0x3bc   :  { %1722 = vmatprep.mubr.bf16.mxu0 %v1578_v27  ;;  %1763 = vmatprep.mubr.bf16.mxu1 %v1578_v27  ;;  %v4450_v27 = vld [vmem:[#allocation9 + $0x144] ss:$16 sps:$4 sm:$0xff]  }
 0x3bd   :  { %1691 = vmatpush1.bf16.msra.mxu0 %v4336_v19  ;;  %1732 = vmatpush1.bf16.msra.mxu1 %v4339_v18  ;;  %5598 = vst [vmem:[#allocation34_spill] sm:$0xff] %v4450_v27 }
 0x3be   :  { %1692 = vmatprep.subr.bf16.mxu0 %v4342_v38  ;;  %1733 = vmatprep.subr.bf16.mxu1 %v4345_v35 }
 0x3c1   :  { %1693 = vmatpush1.bf16.msra.mxu0 %v4348_v20  ;;  %1734 = vmatpush1.bf16.msra.mxu1 %v4351_v53 }
 0x3c2   :  { %1694 = vmatprep.subr.bf16.mxu0 %v4354_v54  ;;  %1735 = vmatprep.subr.bf16.mxu1 %v4357_v55 }
 0x3c5   :  { %1695 = vmatpush1.bf16.msra.mxu0 %v4360_v56  ;;  %1736 = vmatpush1.bf16.msra.mxu1 %v4363_v57 }
 0x3c6   :  { %1696 = vmatprep.subr.bf16.mxu0 %v4366_v58  ;;  %1737 = vmatprep.subr.bf16.mxu1 %v4369_v59 }
 0x3c9   :  { %1697 = vmatpush1.bf16.msra.mxu0 %v4372_v60  ;;  %1738 = vmatpush1.bf16.msra.mxu1 %v4375_v61 }
 0x3ca   :  { %1698 = vmatprep.subr.bf16.mxu0 %v4378_v62  ;;  %1739 = vmatprep.subr.bf16.mxu1 %v4381_v3 }
 0x3cd   :  { %1699 = vmatpush1.bf16.msra.mxu0 %v4384_v4  ;;  %1740 = vmatpush1.bf16.msra.mxu1 %v4387_v5 }
 0x3ce   :  { %1700 = vmatprep.subr.bf16.mxu0 %v4390_v6  ;;  %1741 = vmatprep.subr.bf16.mxu1 %v4393_v7 }
 0x3d1   :  { %1701 = vmatpush1.bf16.msra.mxu0 %v4396_v10  ;;  %1742 = vmatpush1.bf16.msra.mxu1 %v4399_v11 }
 0x3d2   :  { %1702 = vmatprep.subr.bf16.mxu0 %v4402_v14  ;;  %1743 = vmatprep.subr.bf16.mxu1 %v4405_v15 }
 0x3d5   :  { %1703 = vmatpush1.bf16.msra.mxu0 %v4408_v16  ;;  %1744 = vmatpush1.bf16.msra.mxu1 %v4411_v37 }
 0x3d6   :  { %1704 = vmatprep.subr.bf16.mxu0 %v4414_v34  ;;  %1745 = vmatprep.subr.bf16.mxu1 %v4417_v25 }
 0x3d9   :  { %1705 = vmatpush1.bf16.msra.mxu0 %v4420_v2  ;;  %1746 = vmatpush1.bf16.msra.mxu1 %v4423_v24 }
 0x3da   :  { %1706 = vmatprep.subr.bf16.mxu0 %v4426_v23  ;;  %1747 = vmatprep.subr.bf16.mxu1 %v4429_v0 }
 0x3dd   :  { %1707 = vmatpush1.bf16.msra.mxu0 %v4432_v31  ;;  %1748 = vmatpush1.bf16.msra.mxu1 %v4435_v30 }
 0x3de   :  { %1708 = vmatprep.subr.bf16.mxu0 %v4438_v28  ;;  %1749 = vmatprep.subr.bf16.mxu1 %v4441_v32  ;;  %v4456_v28 = vld [vmem:[#allocation9 + $0x140] ss:$16 sps:$4 sm:$0xff]   ;;  %v4459_v32 = vld [vmem:[#allocation9 + $0x148] ss:$16 sps:$4 sm:$0xff]  }
 0x3df   :  { %5600 = vst [vmem:[#allocation36_spill] sm:$0xff] %v4456_v28  ;;  %5601 = vst [vmem:[#allocation37_spill] sm:$0xff] %v4459_v32 }
 0x3e1   :  { %1709 = vmatpush1.bf16.msra.mxu0 %v4444_v22  ;;  %1750 = vmatpush1.bf16.msra.mxu1 %v4447_v29  ;;  %v4462_v22 = vld [vmem:[#allocation9 + $0x164] ss:$16 sps:$4 sm:$0xff]   ;;  %v4465_v29 = vld [vmem:[#allocation9 + $0x16c] ss:$16 sps:$4 sm:$0xff]  }
 0x3e2   :  { %1710 = vmatprep.subr.bf16.mxu0 %v4450_v27  ;;  %1751 = vmatprep.subr.bf16.mxu1 %v4453_v13  ;;  %5602 = vst [vmem:[#allocation38_spill] sm:$0xff] %v4462_v22  ;;  %5603 = vst [vmem:[#allocation39_spill] sm:$0xff] %v4465_v29  ;;  %v4468_v27 = vld [vmem:[#allocation9 + $0x160] ss:$16 sps:$4 sm:$0xff]   ;;  %v4471_v13 = vld [vmem:[#allocation9 + $0x168] ss:$16 sps:$4 sm:$0xff]  }
 0x3e3   :  { %5604 = vst [vmem:[#allocation40_spill] sm:$0xff] %v4468_v27  ;;  %5605 = vst [vmem:[#allocation41_spill] sm:$0xff] %v4471_v13 }
 0x3e5   :  { %1711 = vmatpush1.bf16.msra.mxu0 %v4456_v28  ;;  %1752 = vmatpush1.bf16.msra.mxu1 %v4459_v32  ;;  %v4474_v28 = vld [vmem:[#allocation9 + $0x184] ss:$16 sps:$4 sm:$0xff]   ;;  %v4477_v32 = vld [vmem:[#allocation9 + $0x18c] ss:$16 sps:$4 sm:$0xff]  }
 0x3e6   :  { %1712 = vmatprep.subr.bf16.mxu0 %v4462_v22  ;;  %1753 = vmatprep.subr.bf16.mxu1 %v4465_v29  ;;  %5606 = vst [vmem:[#allocation42_spill] sm:$0xff] %v4474_v28  ;;  %5607 = vst [vmem:[#allocation43_spill] sm:$0xff] %v4477_v32  ;;  %v4480_v22 = vld [vmem:[#allocation9 + $0x180] ss:$16 sps:$4 sm:$0xff]   ;;  %v4483_v29 = vld [vmem:[#allocation9 + $0x188] ss:$16 sps:$4 sm:$0xff]  }
 0x3e7   :  { %5608 = vst [vmem:[#allocation44_spill] sm:$0xff] %v4480_v22  ;;  %5609 = vst [vmem:[#allocation107_spill] sm:$0xff] %v4483_v29 }
 0x3e9   :  { %1713 = vmatpush1.bf16.msra.mxu0 %v4468_v27  ;;  %1754 = vmatpush1.bf16.msra.mxu1 %v4471_v13  ;;  %v4486_v27 = vld [vmem:[#allocation9 + $0x1a4] ss:$16 sps:$4 sm:$0xff]   ;;  %v4489_v13 = vld [vmem:[#allocation9 + $0x1ac] ss:$16 sps:$4 sm:$0xff]  }
 0x3ea   :  { %1714 = vmatprep.subr.bf16.mxu0 %v4474_v28  ;;  %1755 = vmatprep.subr.bf16.mxu1 %v4477_v32  ;;  %5610 = vst [vmem:[#allocation45_spill] sm:$0xff] %v4486_v27  ;;  %5611 = vst [vmem:[#allocation46_spill] sm:$0xff] %v4489_v13  ;;  %v4492_v28 = vld [vmem:[#allocation9 + $0x1a0] ss:$16 sps:$4 sm:$0xff]   ;;  %v4495_v32 = vld [vmem:[#allocation9 + $0x1a8] ss:$16 sps:$4 sm:$0xff]  }
 0x3eb   :  { %5612 = vst [vmem:[#allocation47_spill] sm:$0xff] %v4492_v28  ;;  %5613 = vst [vmem:[#allocation48_spill] sm:$0xff] %v4495_v32 }
 0x3ed   :  { %1715 = vmatpush1.bf16.msra.mxu0 %v4480_v22  ;;  %1756 = vmatpush1.bf16.msra.mxu1 %v4483_v29  ;;  %v4498_v22 = vld [vmem:[#allocation9 + $0x1c4] ss:$16 sps:$4 sm:$0xff]   ;;  %v4501_v29 = vld [vmem:[#allocation9 + $0x1cc] ss:$16 sps:$4 sm:$0xff]  }
 0x3ee   :  { %1716 = vmatprep.subr.bf16.mxu0 %v4486_v27  ;;  %1757 = vmatprep.subr.bf16.mxu1 %v4489_v13  ;;  %5614 = vst [vmem:[#allocation49_spill] sm:$0xff] %v4498_v22  ;;  %5615 = vst [vmem:[#allocation50_spill] sm:$0xff] %v4501_v29  ;;  %v4504_v27 = vld [vmem:[#allocation9 + $0x1c0] ss:$16 sps:$4 sm:$0xff]   ;;  %v4507_v13 = vld [vmem:[#allocation9 + $0x1c8] ss:$16 sps:$4 sm:$0xff]  }
 0x3ef   :  { %5616 = vst [vmem:[#allocation51_spill] sm:$0xff] %v4504_v27  ;;  %5617 = vst [vmem:[#allocation52_spill] sm:$0xff] %v4507_v13 }
 0x3f1   :  { %1717 = vmatpush1.bf16.msra.mxu0 %v4492_v28  ;;  %1758 = vmatpush1.bf16.msra.mxu1 %v4495_v32  ;;  %v4510_v28 = vld [vmem:[#allocation9 + $0x1e4] ss:$16 sps:$4 sm:$0xff]   ;;  %v4513_v32 = vld [vmem:[#allocation9 + $0x1ec] ss:$16 sps:$4 sm:$0xff]  }
 0x3f2   :  { %1718 = vmatprep.subr.bf16.mxu0 %v4498_v22  ;;  %1759 = vmatprep.subr.bf16.mxu1 %v4501_v29  ;;  %5618 = vst [vmem:[#allocation53_spill] sm:$0xff] %v4510_v28  ;;  %5619 = vst [vmem:[#allocation54_spill] sm:$0xff] %v4513_v32  ;;  %v4516_v22 = vld [vmem:[#allocation9 + $0x1e0] ss:$16 sps:$4 sm:$0xff]   ;;  %v4519_v29 = vld [vmem:[#allocation9 + $0x1e8] ss:$16 sps:$4 sm:$0xff]  }
 0x3f3   :  { %5620 = vst [vmem:[#allocation55_spill] sm:$0xff] %v4516_v22  ;;  %5621 = vst [vmem:[#allocation56_spill] sm:$0xff] %v4519_v29 }
 0x3f5   :  { %1719 = vmatpush1.bf16.msra.mxu0 %v4504_v27  ;;  %1760 = vmatpush1.bf16.msra.mxu1 %v4507_v13  ;;  %v4522_v27 = vld [vmem:[#allocation10 + $0x4] ss:$16 sps:$4 sm:$0xff]   ;;  %v4525_v13 = vld [vmem:[#allocation10 + $0xc] ss:$16 sps:$4 sm:$0xff]  }
 0x3f6   :  { %1720 = vmatprep.subr.bf16.mxu0 %v4510_v28  ;;  %1761 = vmatprep.subr.bf16.mxu1 %v4513_v32  ;;  %5622 = vst [vmem:[#allocation57_spill] sm:$0xff] %v4522_v27  ;;  %5623 = vst [vmem:[#allocation58_spill] sm:$0xff] %v4525_v13 }
 0x3f9   :  { %1721 = vmatpush1.bf16.msra.mxu0 %v4516_v22  ;;  %1762 = vmatpush1.bf16.msra.mxu1 %v4519_v29 }
 0x3fa   :  { %1797 = vmatprep.subr.bf16.mxu0 %v4522_v27  ;;  %1838 = vmatprep.subr.bf16.mxu1 %v4525_v13 }
 0x48e   :  { %v1613_v28 = vpop.f32.mrb[24].mxu0  ;;  %v1654_v30 = vpop.f32.mrb[24].mxu1 }
 0x48f   :  { %v1614_v32 = vadd.f32 %v1613_v28, %v4239_v12  ;;  %v1615_v31 = vpop.f32.mrb[25].mxu0  ;;  %v1656_v0 = vpop.f32.mrb[25].mxu1  ;;  %v1655_v27 = vadd.f32 %v1654_v30, %v4249_v21 }
 0x490   :  { %v1616_v22 = vadd.f32 %v1615_v31, %v4243_v1  ;;  %v1617_v23 = vpop.f32.mrb[26].mxu0  ;;  %v1658_v24 = vpop.f32.mrb[26].mxu1  ;;  %v1657_v13 = vadd.f32 %v1656_v0, %v4253_v33 }
 0x491   :  { %v2768_v2 = vmul.f32 -1.442695, %v1614_v32  ;;  %v1618_v29 = vpop.f32.mrb[27].mxu0  ;;  %v1659_v25 = vpop.f32.mrb[27].mxu1  ;;  %v2770_v37 = vmul.f32 -1.442695, %v1655_v27 }
 0x492   :  { %v2769_v34 = vmul.f32 -1.442695, %v1616_v22  ;;  %v4539_v29 = vld [vmem:[#allocation10 + $0x8] ss:$16 sps:$4 sm:$0xff]   ;;  %v4545_v27 = vld [vmem:[#allocation10 + $0x2c] ss:$16 sps:$4 sm:$0xff]  }
 0x493   :  { %3097 = vpow2.f32 %v2768_v2 }
 0x494   :  { %3099 = vpow2.f32 %v2769_v34 }
 0x495   :  { %3101 = vtanh.f32 %v1657_v13 }
 0x496   :  { %3103 = vpow2.f32 %v2770_v37 }
 0x49d   :  { %v3098_v16 = vpop.eup %3097 }
 0x49e   :  { %v1670_v15 = vadd.f32 1.0, %v3098_v16  ;;  %v3100_v28 = vpop.eup %3099 }
 0x49f   :  { %v1671_v31 = vadd.f32 1.0, %v3100_v28  ;;  %v3102_v24 = vpop.eup %3101  ;;  %v4548_v28 = vld [vmem:[#allocation10 + $0x20] ss:$16 sps:$4 sm:$0xff]  }
 0x4a0   :  { %3105 = vrcp.f32 %v1670_v15  ;;  %v3104_v23 = vpop.eup %3103  ;;  %v4536_v15 = vld [vmem:[#allocation10] ss:$16 sps:$4 sm:$0xff]  }
 0x4a1   :  { %3107 = vrcp.f32 %v1671_v31  ;;  %v1672_v2 = vadd.f32 1.0, %v3104_v23  ;;  %v4551_v31 = vld [vmem:[#allocation10 + $0x28] ss:$16 sps:$4 sm:$0xff]   ;;  %v4557_v23 = vld [vmem:[#allocation10 + $0x4c] ss:$16 sps:$4 sm:$0xff]  }
 0x4a3   :  { %3109 = vrcp.f32 %v1672_v2  ;;  %v4569_v2 = vld [vmem:[#allocation10 + $0x6c] ss:$16 sps:$4 sm:$0xff]  }
 0x4a4   :  { %5625 = vst [vmem:[#allocation60_spill] sm:$0xff] %v4569_v2 }
 0x4aa   :  { %v3106_v32 = vpop.eup %3105 }
 0x4ab   :  { %v1681_v25 = vmul.f32 %v3106_v32, %v3102_v24  ;;  %v3108_v22 = vpop.eup %3107  ;;  %v4554_v24 = vld [vmem:[#allocation10 + $0x44] ss:$16 sps:$4 sm:$0xff]   ;;  %v4560_v32 = vld [vmem:[#allocation10 + $0x40] ss:$16 sps:$4 sm:$0xff]  }
 0x4ac   :  { %v1680_v34 = vmul.f32 %v3108_v22, %v4257_v41  ;;  %v4542_v41 = vld [vmem:[#allocation10 + $0x24] ss:$16 sps:$4 sm:$0xff]  }
 0x4ad   :  { %v3110_v16 = vpop.eup %3109  ;;  %v4566_v22 = vld [vmem:[#allocation10 + $0x64] ss:$16 sps:$4 sm:$0xff]  }
 0x4ae   :  { %v4533_v30 = vadd.f32 %v1681_v25, %v1680_v34  ;;  %v4563_v25 = vld [vmem:[#allocation10 + $0x48] ss:$16 sps:$4 sm:$0xff]   ;;  %5624 = vst [vmem:[#allocation59_spill] sm:$0xff] %v4566_v22  ;;  %v4572_v34 = vld [vmem:[#allocation10 + $0x60] ss:$16 sps:$4 sm:$0xff]  }
 0x4af   :  { %5626 = vst [vmem:[#allocation61_spill] sm:$0xff] %v4572_v34 }
 0x4b0   :  { %3111 = vtanh.f32 %v4533_v30 }
 0x4ba   :  { %v3112_v13 = vpop.eup %3111 }
 0x4bb   :  { %v1684_v0 = vmul.f32 %v3112_v13, %v3110_v16  ;;  %v4575_v16 = vld [vmem:[#allocation10 + $0x68] ss:$16 sps:$4 sm:$0xff]   ;;  %v4578_v13 = vld [vmem:[#allocation10 + $0x84] ss:$16 sps:$4 sm:$0xff]  }
 0x4bc   :  { %5627 = vst [vmem:[#allocation62_spill] sm:$0xff] %v4575_v16  ;;  %5628 = vst [vmem:[#allocation63_spill] sm:$0xff] %v4578_v13 }
 0x4bd   :  { %v1689_v37 = vpack.c.bf16 %v1684_v0, %v1684_v0  ;;  %v4581_v0 = vld [vmem:[#allocation10 + $0x8c] ss:$16 sps:$4 sm:$0xff]  }
 0x4be   :  { %5629 = vst [vmem:[#allocation64_spill] sm:$0xff] %v4581_v0 }
 0x4bf   :  { %1723 = vmatmul.mubr.bf16.vlgmr.msra.gmra.mrb[28].mxu0 %v1689_v37  ;;  %1764 = vmatmul.mubr.bf16.vlgmr.msra.gmra.mrb[28].mxu1 %v1689_v37 }
 0x4c0   :  { %1829 = vmatprep.mubr.bf16.mxu0 %v1689_v37  ;;  %1870 = vmatprep.mubr.bf16.mxu1 %v1689_v37  ;;  %v4584_v37 = vld [vmem:[#allocation10 + $0x80] ss:$16 sps:$4 sm:$0xff]  }
 0x4c1   :  { %1798 = vmatpush1.bf16.msra.mxu0 %v4536_v15  ;;  %1839 = vmatpush1.bf16.msra.mxu1 %v4539_v29  ;;  %5630 = vst [vmem:[#allocation65_spill] sm:$0xff] %v4584_v37 }
 0x4c2   :  { %1799 = vmatprep.subr.bf16.mxu0 %v4542_v41  ;;  %1840 = vmatprep.subr.bf16.mxu1 %v4545_v27 }
 0x4c5   :  { %1800 = vmatpush1.bf16.msra.mxu0 %v4548_v28  ;;  %1841 = vmatpush1.bf16.msra.mxu1 %v4551_v31 }
 0x4c6   :  { %1801 = vmatprep.subr.bf16.mxu0 %v4554_v24  ;;  %1842 = vmatprep.subr.bf16.mxu1 %v4557_v23 }
 0x4c9   :  { %1802 = vmatpush1.bf16.msra.mxu0 %v4560_v32  ;;  %1843 = vmatpush1.bf16.msra.mxu1 %v4563_v25 }
 0x4ca   :  { %1803 = vmatprep.subr.bf16.mxu0 %v4566_v22  ;;  %1844 = vmatprep.subr.bf16.mxu1 %v4569_v2  ;;  %v4587_v2 = vld [vmem:[#allocation10 + $0x88] ss:$16 sps:$4 sm:$0xff]  }
 0x4cb   :  { %5631 = vst [vmem:[#allocation66_spill] sm:$0xff] %v4587_v2 }
 0x4cd   :  { %1804 = vmatpush1.bf16.msra.mxu0 %v4572_v34  ;;  %1845 = vmatpush1.bf16.msra.mxu1 %v4575_v16  ;;  %v4590_v34 = vld [vmem:[#allocation10 + $0xa4] ss:$16 sps:$4 sm:$0xff]   ;;  %v4593_v16 = vld [vmem:[#allocation10 + $0xac] ss:$16 sps:$4 sm:$0xff]  }
 0x4ce   :  { %1805 = vmatprep.subr.bf16.mxu0 %v4578_v13  ;;  %1846 = vmatprep.subr.bf16.mxu1 %v4581_v0  ;;  %5632 = vst [vmem:[#allocation67_spill] sm:$0xff] %v4590_v34  ;;  %5633 = vst [vmem:[#allocation68_spill] sm:$0xff] %v4593_v16  ;;  %v4596_v13 = vld [vmem:[#allocation10 + $0xa0] ss:$16 sps:$4 sm:$0xff]   ;;  %v4599_v0 = vld [vmem:[#allocation10 + $0xa8] ss:$16 sps:$4 sm:$0xff]  }
 0x4cf   :  { %5634 = vst [vmem:[#allocation69_spill] sm:$0xff] %v4596_v13  ;;  %5635 = vst [vmem:[#allocation70_spill] sm:$0xff] %v4599_v0 }
 0x4d1   :  { %1806 = vmatpush1.bf16.msra.mxu0 %v4584_v37  ;;  %1847 = vmatpush1.bf16.msra.mxu1 %v4587_v2  ;;  %v4602_v37 = vld [vmem:[#allocation10 + $0xc4] ss:$16 sps:$4 sm:$0xff]   ;;  %v4605_v2 = vld [vmem:[#allocation10 + $0xcc] ss:$16 sps:$4 sm:$0xff]  }
 0x4d2   :  { %1807 = vmatprep.subr.bf16.mxu0 %v4590_v34  ;;  %1848 = vmatprep.subr.bf16.mxu1 %v4593_v16  ;;  %5636 = vst [vmem:[#allocation71_spill] sm:$0xff] %v4602_v37  ;;  %5637 = vst [vmem:[#allocation72_spill] sm:$0xff] %v4605_v2  ;;  %v4608_v34 = vld [vmem:[#allocation10 + $0xc0] ss:$16 sps:$4 sm:$0xff]   ;;  %v4611_v16 = vld [vmem:[#allocation10 + $0xc8] ss:$16 sps:$4 sm:$0xff]  }
 0x4d3   :  { %5638 = vst [vmem:[#allocation73_spill] sm:$0xff] %v4608_v34  ;;  %5639 = vst [vmem:[#allocation74_spill] sm:$0xff] %v4611_v16 }
 0x4d5   :  { %1808 = vmatpush1.bf16.msra.mxu0 %v4596_v13  ;;  %1849 = vmatpush1.bf16.msra.mxu1 %v4599_v0  ;;  %v4614_v13 = vld [vmem:[#allocation10 + $0xe4] ss:$16 sps:$4 sm:$0xff]   ;;  %v4617_v0 = vld [vmem:[#allocation10 + $0xec] ss:$16 sps:$4 sm:$0xff]  }
 0x4d6   :  { %1809 = vmatprep.subr.bf16.mxu0 %v4602_v37  ;;  %1850 = vmatprep.subr.bf16.mxu1 %v4605_v2  ;;  %5640 = vst [vmem:[#allocation75_spill] sm:$0xff] %v4614_v13  ;;  %5641 = vst [vmem:[#allocation76_spill] sm:$0xff] %v4617_v0  ;;  %v4620_v37 = vld [vmem:[#allocation10 + $0xe0] ss:$16 sps:$4 sm:$0xff]   ;;  %v4623_v2 = vld [vmem:[#allocation10 + $0xe8] ss:$16 sps:$4 sm:$0xff]  }
 0x4d7   :  { %5642 = vst [vmem:[#allocation77_spill] sm:$0xff] %v4620_v37  ;;  %5643 = vst [vmem:[#allocation78_spill] sm:$0xff] %v4623_v2 }
 0x4d9   :  { %1810 = vmatpush1.bf16.msra.mxu0 %v4608_v34  ;;  %1851 = vmatpush1.bf16.msra.mxu1 %v4611_v16  ;;  %v4626_v34 = vld [vmem:[#allocation10 + $0x104] ss:$16 sps:$4 sm:$0xff]   ;;  %v4629_v16 = vld [vmem:[#allocation10 + $0x10c] ss:$16 sps:$4 sm:$0xff]  }
 0x4da   :  { %1811 = vmatprep.subr.bf16.mxu0 %v4614_v13  ;;  %1852 = vmatprep.subr.bf16.mxu1 %v4617_v0  ;;  %5644 = vst [vmem:[#allocation79_spill] sm:$0xff] %v4626_v34  ;;  %5645 = vst [vmem:[#allocation80_spill] sm:$0xff] %v4629_v16  ;;  %v4632_v13 = vld [vmem:[#allocation10 + $0x100] ss:$16 sps:$4 sm:$0xff]   ;;  %v4635_v0 = vld [vmem:[#allocation10 + $0x108] ss:$16 sps:$4 sm:$0xff]  }
 0x4db   :  { %5646 = vst [vmem:[#allocation81_spill] sm:$0xff] %v4632_v13  ;;  %5647 = vst [vmem:[#allocation82_spill] sm:$0xff] %v4635_v0 }
 0x4dd   :  { %1812 = vmatpush1.bf16.msra.mxu0 %v4620_v37  ;;  %1853 = vmatpush1.bf16.msra.mxu1 %v4623_v2  ;;  %v4638_v37 = vld [vmem:[#allocation10 + $0x124] ss:$16 sps:$4 sm:$0xff]   ;;  %v4641_v2 = vld [vmem:[#allocation10 + $0x12c] ss:$16 sps:$4 sm:$0xff]  }
 0x4de   :  { %1813 = vmatprep.subr.bf16.mxu0 %v4626_v34  ;;  %1854 = vmatprep.subr.bf16.mxu1 %v4629_v16  ;;  %5648 = vst [vmem:[#allocation83_spill] sm:$0xff] %v4638_v37  ;;  %5649 = vst [vmem:[#allocation84_spill] sm:$0xff] %v4641_v2  ;;  %v4644_v34 = vld [vmem:[#allocation10 + $0x120] ss:$16 sps:$4 sm:$0xff]   ;;  %v4647_v16 = vld [vmem:[#allocation10 + $0x128] ss:$16 sps:$4 sm:$0xff]  }
 0x4df   :  { %5650 = vst [vmem:[#allocation85_spill] sm:$0xff] %v4644_v34  ;;  %5651 = vst [vmem:[#allocation86_spill] sm:$0xff] %v4647_v16 }
 0x4e1   :  { %1814 = vmatpush1.bf16.msra.mxu0 %v4632_v13  ;;  %1855 = vmatpush1.bf16.msra.mxu1 %v4635_v0  ;;  %v4650_v13 = vld [vmem:[#allocation10 + $0x144] ss:$16 sps:$4 sm:$0xff]   ;;  %v4653_v0 = vld [vmem:[#allocation10 + $0x14c] ss:$16 sps:$4 sm:$0xff]  }
 0x4e2   :  { %1815 = vmatprep.subr.bf16.mxu0 %v4638_v37  ;;  %1856 = vmatprep.subr.bf16.mxu1 %v4641_v2  ;;  %5652 = vst [vmem:[#allocation87_spill] sm:$0xff] %v4650_v13  ;;  %5653 = vst [vmem:[#allocation88_spill] sm:$0xff] %v4653_v0  ;;  %v4656_v37 = vld [vmem:[#allocation10 + $0x140] ss:$16 sps:$4 sm:$0xff]   ;;  %v4659_v2 = vld [vmem:[#allocation10 + $0x148] ss:$16 sps:$4 sm:$0xff]  }
 0x4e3   :  { %5654 = vst [vmem:[#allocation89_spill] sm:$0xff] %v4656_v37  ;;  %5655 = vst [vmem:[#allocation90_spill] sm:$0xff] %v4659_v2 }
 0x4e5   :  { %1816 = vmatpush1.bf16.msra.mxu0 %v4644_v34  ;;  %1857 = vmatpush1.bf16.msra.mxu1 %v4647_v16  ;;  %v4662_v34 = vld [vmem:[#allocation10 + $0x164] ss:$16 sps:$4 sm:$0xff]   ;;  %v4665_v16 = vld [vmem:[#allocation10 + $0x16c] ss:$16 sps:$4 sm:$0xff]  }
 0x4e6   :  { %1817 = vmatprep.subr.bf16.mxu0 %v4650_v13  ;;  %1858 = vmatprep.subr.bf16.mxu1 %v4653_v0  ;;  %5656 = vst [vmem:[#allocation91_spill] sm:$0xff] %v4662_v34  ;;  %5657 = vst [vmem:[#allocation92_spill] sm:$0xff] %v4665_v16  ;;  %v4668_v13 = vld [vmem:[#allocation10 + $0x160] ss:$16 sps:$4 sm:$0xff]   ;;  %v4671_v0 = vld [vmem:[#allocation10 + $0x168] ss:$16 sps:$4 sm:$0xff]  }
 0x4e7   :  { %5658 = vst [vmem:[#allocation93_spill] sm:$0xff] %v4668_v13  ;;  %5659 = vst [vmem:[#allocation94_spill] sm:$0xff] %v4671_v0 }
 0x4e9   :  { %1818 = vmatpush1.bf16.msra.mxu0 %v4656_v37  ;;  %1859 = vmatpush1.bf16.msra.mxu1 %v4659_v2 }
 0x4ea   :  { %1819 = vmatprep.subr.bf16.mxu0 %v4662_v34  ;;  %1860 = vmatprep.subr.bf16.mxu1 %v4665_v16 }
 0x4ed   :  { %1820 = vmatpush1.bf16.msra.mxu0 %v4668_v13  ;;  %1861 = vmatpush1.bf16.msra.mxu1 %v4671_v0 }
 0x4ee   :  { %1821 = vmatprep.subr.bf16.mxu0 %v5561_v17  ;;  %1862 = vmatprep.subr.bf16.mxu1 %v5562_v63 }
 0x4f1   :  { %1822 = vmatpush1.bf16.msra.mxu0 %v5563_v8  ;;  %1863 = vmatpush1.bf16.msra.mxu1 %v5564_v26  ;;  %v5660_v8 = vld [vmem:[#allocation112_spill] sm:$0xff] }
 0x4f2   :  { %1823 = vmatprep.subr.bf16.mxu0 %v5565_v9  ;;  %1864 = vmatprep.subr.bf16.mxu1 %v5566_v39  ;;  %v5661_v9 = vld [vmem:[#allocation113_spill] sm:$0xff] }
 0x4f5   :  { %1824 = vmatpush1.bf16.msra.mxu0 %v5567_v40  ;;  %1865 = vmatpush1.bf16.msra.mxu1 %v5568_v42 }
 0x4f6   :  { %1825 = vmatprep.subr.bf16.mxu0 %v5569_v43  ;;  %1866 = vmatprep.subr.bf16.mxu1 %v5570_v44  ;;  %v5662_v43 = vld [vmem:[#allocation114_spill] sm:$0xff] }
 0x4f9   :  { %1826 = vmatpush1.bf16.msra.mxu0 %v5571_v45  ;;  %1867 = vmatpush1.bf16.msra.mxu1 %v5572_v46  ;;  %v5663_v45 = vld [vmem:[#allocation115_spill] sm:$0xff] }
 0x4fa   :  { %1827 = vmatprep.subr.bf16.mxu0 %v5573_v47  ;;  %1868 = vmatprep.subr.bf16.mxu1 %v5574_v48 }
 0x4fd   :  { %1828 = vmatpush1.bf16.msra.mxu0 %v5575_v49  ;;  %1869 = vmatpush1.bf16.msra.mxu1 %v5576_v50 }
 0x4fe   :  { %1908 = vmatprep.subr.bf16.mxu0 %v4322_v51  ;;  %1949 = vmatprep.subr.bf16.mxu1 %v4325_v52 }
 0x592   :  { %v1724_v17 = vpop.f32.mrb[28].mxu0  ;;  %v1765_v63 = vpop.f32.mrb[28].mxu1 }
 0x593   :  { %v1725_v26 = vadd.f32 %v1724_v17, %v5660_v8  ;;  %v1766_v39 = vadd.f32 %v1765_v63, %v5661_v9  ;;  %v1726_v40 = vpop.f32.mrb[29].mxu0  ;;  %v1767_v42 = vpop.f32.mrb[29].mxu1 }
 0x594   :  { %v1727_v44 = vadd.f32 %v1726_v40, %v5662_v43  ;;  %v1768_v46 = vadd.f32 %v1767_v42, %v5663_v45  ;;  %v1728_v47 = vpop.f32.mrb[30].mxu0  ;;  %v1769_v48 = vpop.f32.mrb[30].mxu1  ;;  %v5666_v45 = vld [vmem:[#allocation21_spill] sm:$0xff] }
 0x595   :  { %v2771_v49 = vmul.f32 -1.442695, %v1725_v26  ;;  %v1729_v50 = vpop.f32.mrb[31].mxu0  ;;  %v1770_v0 = vpop.f32.mrb[31].mxu1  ;;  %v2773_v52 = vmul.f32 -1.442695, %v1766_v39 }
 0x596   :  { %v2772_v51 = vmul.f32 -1.442695, %v1727_v44  ;;  %v5668_v47 = vld [vmem:[#allocation23_spill] sm:$0xff]  ;;  %v5669_v48 = vld [vmem:[#allocation24_spill] sm:$0xff]  ;;  %v5671_v50 = vld [vmem:[#allocation26_spill] sm:$0xff] }
 0x597   :  { %3113 = vpow2.f32 %v2771_v49  ;;  %v5670_v49 = vld [vmem:[#allocation25_spill] sm:$0xff] }
 0x598   :  { %3115 = vpow2.f32 %v2772_v51 }
 0x599   :  { %3117 = vtanh.f32 %v1768_v46  ;;  %v5667_v46 = vld [vmem:[#allocation22_spill] sm:$0xff] }
 0x59a   :  { %3119 = vpow2.f32 %v2773_v52 }
 0x5a1   :  { %v3114_v13 = vpop.eup %3113 }
 0x5a2   :  { %v1781_v16 = vadd.f32 1.0, %v3114_v13  ;;  %v3116_v17 = vpop.eup %3115 }
 0x5a3   :  { %v1782_v63 = vadd.f32 1.0, %v3116_v17  ;;  %v3118_v8 = vpop.eup %3117  ;;  %v5672_v17 = vld [vmem:[#allocation27_spill] sm:$0xff] }
 0x5a4   :  { %3121 = vrcp.f32 %v1781_v16  ;;  %v3120_v9 = vpop.eup %3119  ;;  %v5665_v16 = vld [vmem:[#allocation20_spill] sm:$0xff] }
 0x5a5   :  { %3123 = vrcp.f32 %v1782_v63  ;;  %v1783_v26 = vadd.f32 1.0, %v3120_v9  ;;  %v5673_v63 = vld [vmem:[#allocation28_spill] sm:$0xff]  ;;  %v5675_v9 = vld [vmem:[#allocation30_spill] sm:$0xff] }
 0x5a7   :  { %3125 = vrcp.f32 %v1783_v26  ;;  %v5679_v26 = vld [vmem:[#allocation34_spill] sm:$0xff] }
 0x5ae   :  { %v3122_v40 = vpop.eup %3121 }
 0x5af   :  { %v1792_v42 = vmul.f32 %v3122_v40, %v3118_v8  ;;  %v3124_v43 = vpop.eup %3123  ;;  %v5674_v8 = vld [vmem:[#allocation29_spill] sm:$0xff]  ;;  %v5676_v40 = vld [vmem:[#allocation31_spill] sm:$0xff] }
 0x5b0   :  { %v1791_v0 = vmul.f32 %v3124_v43, %v4333_v36  ;;  %v5664_v36 = vld [vmem:[#allocation19_spill] sm:$0xff]  ;;  %v5678_v43 = vld [vmem:[#allocation33_spill] sm:$0xff] }
 0x5b1   :  { %v3126_v51 = vpop.eup %3125 }
 0x5b2   :  { %v4697_v44 = vadd.f32 %v1792_v42, %v1791_v0  ;;  %v5677_v42 = vld [vmem:[#allocation32_spill] sm:$0xff]  ;;  %v5680_v0 = vld [vmem:[#allocation35_spill] sm:$0xff] }
 0x5b4   :  { %3127 = vtanh.f32 %v4697_v44 }
 0x5be   :  { %v3128_v13 = vpop.eup %3127 }
 0x5bf   :  { %v1795_v39 = vmul.f32 %v3128_v13, %v3126_v51  ;;  %v5681_v51 = vld [vmem:[#allocation36_spill] sm:$0xff]  ;;  %v5682_v13 = vld [vmem:[#allocation37_spill] sm:$0xff] }
 0x5c1   :  { %v1796_v52 = vpack.c.bf16 %v1795_v39, %v1795_v39  ;;  %v5683_v39 = vld [vmem:[#allocation38_spill] sm:$0xff] }
 0x5c3   :  { %1830 = vmatmul.mubr.bf16.vlgmr.msra.gmra.mrb[32].mxu0 %v1796_v52  ;;  %1871 = vmatmul.mubr.bf16.vlgmr.msra.gmra.mrb[32].mxu1 %v1796_v52 }
 0x5c4   :  { %1940 = vmatprep.mubr.bf16.mxu0 %v1796_v52  ;;  %1981 = vmatprep.mubr.bf16.mxu1 %v1796_v52  ;;  %v5684_v52 = vld [vmem:[#allocation39_spill] sm:$0xff] }
 0x5c5   :  { %1909 = vmatpush1.bf16.msra.mxu0 %v4336_v19  ;;  %1950 = vmatpush1.bf16.msra.mxu1 %v4339_v18 }
 0x5c6   :  { %1910 = vmatprep.subr.bf16.mxu0 %v4342_v38  ;;  %1951 = vmatprep.subr.bf16.mxu1 %v4345_v35 }
 0x5c9   :  { %1911 = vmatpush1.bf16.msra.mxu0 %v4348_v20  ;;  %1952 = vmatpush1.bf16.msra.mxu1 %v4351_v53 }
 0x5ca   :  { %1912 = vmatprep.subr.bf16.mxu0 %v4354_v54  ;;  %1953 = vmatprep.subr.bf16.mxu1 %v4357_v55 }
 0x5cd   :  { %1913 = vmatpush1.bf16.msra.mxu0 %v4360_v56  ;;  %1954 = vmatpush1.bf16.msra.mxu1 %v4363_v57 }
 0x5ce   :  { %1914 = vmatprep.subr.bf16.mxu0 %v4366_v58  ;;  %1955 = vmatprep.subr.bf16.mxu1 %v4369_v59 }
 0x5d1   :  { %1915 = vmatpush1.bf16.msra.mxu0 %v4372_v60  ;;  %1956 = vmatpush1.bf16.msra.mxu1 %v4375_v61 }
 0x5d2   :  { %1916 = vmatprep.subr.bf16.mxu0 %v4378_v62  ;;  %1957 = vmatprep.subr.bf16.mxu1 %v4381_v3 }
 0x5d5   :  { %1917 = vmatpush1.bf16.msra.mxu0 %v4384_v4  ;;  %1958 = vmatpush1.bf16.msra.mxu1 %v4387_v5 }
 0x5d6   :  { %1918 = vmatprep.subr.bf16.mxu0 %v4390_v6  ;;  %1959 = vmatprep.subr.bf16.mxu1 %v4393_v7 }
 0x5d9   :  { %1919 = vmatpush1.bf16.msra.mxu0 %v4396_v10  ;;  %1960 = vmatpush1.bf16.msra.mxu1 %v4399_v11 }
 0x5da   :  { %1920 = vmatprep.subr.bf16.mxu0 %v4402_v14  ;;  %1961 = vmatprep.subr.bf16.mxu1 %v5664_v36 }
 0x5dd   :  { %1921 = vmatpush1.bf16.msra.mxu0 %v5665_v16  ;;  %1962 = vmatpush1.bf16.msra.mxu1 %v5666_v45 }
 0x5de   :  { %1922 = vmatprep.subr.bf16.mxu0 %v5667_v46  ;;  %1963 = vmatprep.subr.bf16.mxu1 %v5668_v47 }
 0x5e1   :  { %1923 = vmatpush1.bf16.msra.mxu0 %v5669_v48  ;;  %1964 = vmatpush1.bf16.msra.mxu1 %v5670_v49 }
 0x5e2   :  { %1924 = vmatprep.subr.bf16.mxu0 %v5671_v50  ;;  %1965 = vmatprep.subr.bf16.mxu1 %v5672_v17 }
 0x5e5   :  { %1925 = vmatpush1.bf16.msra.mxu0 %v5673_v63  ;;  %1966 = vmatpush1.bf16.msra.mxu1 %v5674_v8  ;;  %v5685_v8 = vld [vmem:[#allocation40_spill] sm:$0xff] }
 0x5e6   :  { %1926 = vmatprep.subr.bf16.mxu0 %v5675_v9  ;;  %1967 = vmatprep.subr.bf16.mxu1 %v5676_v40  ;;  %v5686_v9 = vld [vmem:[#allocation41_spill] sm:$0xff]  ;;  %v5687_v40 = vld [vmem:[#allocation42_spill] sm:$0xff] }
 0x5e9   :  { %1927 = vmatpush1.bf16.msra.mxu0 %v5677_v42  ;;  %1968 = vmatpush1.bf16.msra.mxu1 %v5678_v43  ;;  %v5688_v42 = vld [vmem:[#allocation43_spill] sm:$0xff]  ;;  %v5689_v43 = vld [vmem:[#allocation44_spill] sm:$0xff] }
 0x5ea   :  { %1928 = vmatprep.subr.bf16.mxu0 %v5679_v26  ;;  %1969 = vmatprep.subr.bf16.mxu1 %v5680_v0  ;;  %v5690_v26 = vld [vmem:[#allocation107_spill] sm:$0xff]  ;;  %v5691_v0 = vld [vmem:[#allocation45_spill] sm:$0xff] }
 0x5ed   :  { %1929 = vmatpush1.bf16.msra.mxu0 %v5681_v51  ;;  %1970 = vmatpush1.bf16.msra.mxu1 %v5682_v13  ;;  %v5692_v51 = vld [vmem:[#allocation46_spill] sm:$0xff]  ;;  %v5693_v13 = vld [vmem:[#allocation47_spill] sm:$0xff] }
 0x5ee   :  { %1930 = vmatprep.subr.bf16.mxu0 %v5683_v39  ;;  %1971 = vmatprep.subr.bf16.mxu1 %v5684_v52  ;;  %v5694_v39 = vld [vmem:[#allocation48_spill] sm:$0xff]  ;;  %v5695_v52 = vld [vmem:[#allocation49_spill] sm:$0xff] }
 0x5f1   :  { %1931 = vmatpush1.bf16.msra.mxu0 %v5685_v8  ;;  %1972 = vmatpush1.bf16.msra.mxu1 %v5686_v9  ;;  %v5696_v8 = vld [vmem:[#allocation50_spill] sm:$0xff]  ;;  %v5697_v9 = vld [vmem:[#allocation51_spill] sm:$0xff] }
 0x5f2   :  { %1932 = vmatprep.subr.bf16.mxu0 %v5687_v40  ;;  %1973 = vmatprep.subr.bf16.mxu1 %v5688_v42  ;;  %v5698_v40 = vld [vmem:[#allocation52_spill] sm:$0xff]  ;;  %v5699_v42 = vld [vmem:[#allocation53_spill] sm:$0xff] }
 0x5f5   :  { %1933 = vmatpush1.bf16.msra.mxu0 %v5689_v43  ;;  %1974 = vmatpush1.bf16.msra.mxu1 %v5690_v26  ;;  %v5700_v43 = vld [vmem:[#allocation54_spill] sm:$0xff]  ;;  %v5701_v26 = vld [vmem:[#allocation55_spill] sm:$0xff] }
 0x5f6   :  { %1934 = vmatprep.subr.bf16.mxu0 %v5691_v0  ;;  %1975 = vmatprep.subr.bf16.mxu1 %v5692_v51  ;;  %v5702_v0 = vld [vmem:[#allocation56_spill] sm:$0xff]  ;;  %v5703_v51 = vld [vmem:[#allocation57_spill] sm:$0xff] }
 0x5f9   :  { %1935 = vmatpush1.bf16.msra.mxu0 %v5693_v13  ;;  %1976 = vmatpush1.bf16.msra.mxu1 %v5694_v39  ;;  %v5704_v13 = vld [vmem:[#allocation58_spill] sm:$0xff] }
 0x5fa   :  { %1936 = vmatprep.subr.bf16.mxu0 %v5695_v52  ;;  %1977 = vmatprep.subr.bf16.mxu1 %v5696_v8 }
 0x5fd   :  { %1937 = vmatpush1.bf16.msra.mxu0 %v5697_v9  ;;  %1978 = vmatpush1.bf16.msra.mxu1 %v5698_v40 }
 0x5fe   :  { %1938 = vmatprep.subr.bf16.mxu0 %v5699_v42  ;;  %1979 = vmatprep.subr.bf16.mxu1 %v5700_v43 }
 0x601   :  { %1939 = vmatpush1.bf16.msra.mxu0 %v5701_v26  ;;  %1980 = vmatpush1.bf16.msra.mxu1 %v5702_v0 }
 0x602   :  { %2015 = vmatprep.subr.bf16.mxu0 %v5703_v51  ;;  %2056 = vmatprep.subr.bf16.mxu1 %v5704_v13 }
 0x696   :  { %v1831_v39 = vpop.f32.mrb[32].mxu0  ;;  %v1872_v52 = vpop.f32.mrb[32].mxu1 }
 0x697   :  { %v1832_v8 = vadd.f32 %v1831_v39, %v4239_v12  ;;  %v1833_v63 = vpop.f32.mrb[33].mxu0  ;;  %v1874_v9 = vpop.f32.mrb[33].mxu1  ;;  %v1873_v51 = vadd.f32 %v1872_v52, %v4249_v21  ;;  %v5708_v52 = vld [vmem:[#allocation63_spill] sm:$0xff] }
 0x698   :  { %v1834_v40 = vadd.f32 %v1833_v63, %v4243_v1  ;;  %v1835_v17 = vpop.f32.mrb[34].mxu0  ;;  %v1876_v42 = vpop.f32.mrb[34].mxu1  ;;  %v1875_v13 = vadd.f32 %v1874_v9, %v4253_v33 }
 0x699   :  { %v2774_v50 = vmul.f32 -1.442695, %v1832_v8  ;;  %v1836_v43 = vpop.f32.mrb[35].mxu0  ;;  %v1877_v49 = vpop.f32.mrb[35].mxu1  ;;  %v2776_v0 = vmul.f32 -1.442695, %v1873_v51 }
 0x69a   :  { %v2775_v26 = vmul.f32 -1.442695, %v1834_v40 }
 0x69b   :  { %3129 = vpow2.f32 %v2774_v50 }
 0x69c   :  { %3131 = vpow2.f32 %v2775_v26 }
 0x69d   :  { %3133 = vtanh.f32 %v1875_v13  ;;  %v5707_v13 = vld [vmem:[#allocation62_spill] sm:$0xff] }
 0x69e   :  { %3135 = vpow2.f32 %v2776_v0 }
 0x6a5   :  { %v3130_v48 = vpop.eup %3129 }
 0x6a6   :  { %v1888_v47 = vadd.f32 1.0, %v3130_v48  ;;  %v3132_v39 = vpop.eup %3131 }
 0x6a7   :  { %v1889_v63 = vadd.f32 1.0, %v3132_v39  ;;  %v3134_v17 = vpop.eup %3133  ;;  %v5709_v39 = vld [vmem:[#allocation64_spill] sm:$0xff] }
 0x6a8   :  { %3137 = vrcp.f32 %v1888_v47  ;;  %v3136_v8 = vpop.eup %3135  ;;  %v5706_v47 = vld [vmem:[#allocation61_spill] sm:$0xff] }
 0x6a9   :  { %3139 = vrcp.f32 %v1889_v63  ;;  %v1890_v50 = vadd.f32 1.0, %v3136_v8  ;;  %v5710_v63 = vld [vmem:[#allocation65_spill] sm:$0xff]  ;;  %v5712_v8 = vld [vmem:[#allocation67_spill] sm:$0xff] }
 0x6ab   :  { %3141 = vrcp.f32 %v1890_v50  ;;  %v5716_v50 = vld [vmem:[#allocation71_spill] sm:$0xff] }
 0x6b2   :  { %v3138_v42 = vpop.eup %3137 }
 0x6b3   :  { %v1899_v49 = vmul.f32 %v3138_v42, %v3134_v17  ;;  %v3140_v40 = vpop.eup %3139  ;;  %v5711_v17 = vld [vmem:[#allocation66_spill] sm:$0xff]  ;;  %v5713_v42 = vld [vmem:[#allocation68_spill] sm:$0xff] }
 0x6b4   :  { %v1898_v43 = vmul.f32 %v3140_v40, %v4533_v30  ;;  %v5705_v30 = vld [vmem:[#allocation60_spill] sm:$0xff]  ;;  %v5715_v40 = vld [vmem:[#allocation70_spill] sm:$0xff] }
 0x6b5   :  { %v3142_v48 = vpop.eup %3141 }
 0x6b6   :  { %v4769_v26 = vadd.f32 %v1899_v49, %v1898_v43  ;;  %v5714_v49 = vld [vmem:[#allocation69_spill] sm:$0xff]  ;;  %v5717_v43 = vld [vmem:[#allocation72_spill] sm:$0xff] }
 0x6b8   :  { %3143 = vtanh.f32 %v4769_v26 }
 0x6c2   :  { %v3144_v9 = vpop.eup %3143 }
 0x6c3   :  { %v1902_v51 = vmul.f32 %v3144_v9, %v3142_v48  ;;  %v5718_v48 = vld [vmem:[#allocation73_spill] sm:$0xff]  ;;  %v5719_v9 = vld [vmem:[#allocation74_spill] sm:$0xff] }
 0x6c5   :  { %v1907_v0 = vpack.c.bf16 %v1902_v51, %v1902_v51  ;;  %v5720_v51 = vld [vmem:[#allocation75_spill] sm:$0xff] }
 0x6c7   :  { %1941 = vmatmul.mubr.bf16.vlgmr.msra.gmra.mrb[36].mxu0 %v1907_v0  ;;  %1982 = vmatmul.mubr.bf16.vlgmr.msra.gmra.mrb[36].mxu1 %v1907_v0 }
 0x6c8   :  { %2047 = vmatprep.mubr.bf16.mxu0 %v1907_v0  ;;  %2088 = vmatprep.mubr.bf16.mxu1 %v1907_v0  ;;  %v5721_v0 = vld [vmem:[#allocation76_spill] sm:$0xff] }
 0x6c9   :  { %2016 = vmatpush1.bf16.msra.mxu0 %v4536_v15  ;;  %2057 = vmatpush1.bf16.msra.mxu1 %v4539_v29 }
 0x6ca   :  { %2017 = vmatprep.subr.bf16.mxu0 %v4542_v41  ;;  %2058 = vmatprep.subr.bf16.mxu1 %v4545_v27 }
 0x6cd   :  { %2018 = vmatpush1.bf16.msra.mxu0 %v4548_v28  ;;  %2059 = vmatpush1.bf16.msra.mxu1 %v4551_v31 }
 0x6ce   :  { %2019 = vmatprep.subr.bf16.mxu0 %v4554_v24  ;;  %2060 = vmatprep.subr.bf16.mxu1 %v4557_v23 }
 0x6d1   :  { %2020 = vmatpush1.bf16.msra.mxu0 %v4560_v32  ;;  %2061 = vmatpush1.bf16.msra.mxu1 %v4563_v25 }
 0x6d2   :  { %2021 = vmatprep.subr.bf16.mxu0 %v4566_v22  ;;  %2062 = vmatprep.subr.bf16.mxu1 %v5705_v30 }
 0x6d5   :  { %2022 = vmatpush1.bf16.msra.mxu0 %v5706_v47  ;;  %2063 = vmatpush1.bf16.msra.mxu1 %v5707_v13 }
 0x6d6   :  { %2023 = vmatprep.subr.bf16.mxu0 %v5708_v52  ;;  %2064 = vmatprep.subr.bf16.mxu1 %v5709_v39 }
 0x6d9   :  { %2024 = vmatpush1.bf16.msra.mxu0 %v5710_v63  ;;  %2065 = vmatpush1.bf16.msra.mxu1 %v5711_v17  ;;  %v5722_v17 = vld [vmem:[#allocation77_spill] sm:$0xff]  ;;  %v5758_v63 = vld [vmem:[#allocation119_spill] sm:$0xff] }
 0x6da   :  { %2025 = vmatprep.subr.bf16.mxu0 %v5712_v8  ;;  %2066 = vmatprep.subr.bf16.mxu1 %v5713_v42  ;;  %v5723_v8 = vld [vmem:[#allocation78_spill] sm:$0xff]  ;;  %v5724_v42 = vld [vmem:[#allocation79_spill] sm:$0xff] }
 0x6dd   :  { %2026 = vmatpush1.bf16.msra.mxu0 %v5714_v49  ;;  %2067 = vmatpush1.bf16.msra.mxu1 %v5715_v40  ;;  %v5725_v49 = vld [vmem:[#allocation80_spill] sm:$0xff]  ;;  %v5726_v40 = vld [vmem:[#allocation81_spill] sm:$0xff] }
 0x6de   :  { %2027 = vmatprep.subr.bf16.mxu0 %v5716_v50  ;;  %2068 = vmatprep.subr.bf16.mxu1 %v5717_v43  ;;  %v5727_v50 = vld [vmem:[#allocation82_spill] sm:$0xff]  ;;  %v5728_v43 = vld [vmem:[#allocation83_spill] sm:$0xff] }
 0x6e1   :  { %2028 = vmatpush1.bf16.msra.mxu0 %v5718_v48  ;;  %2069 = vmatpush1.bf16.msra.mxu1 %v5719_v9  ;;  %v5729_v48 = vld [vmem:[#allocation84_spill] sm:$0xff]  ;;  %v5730_v9 = vld [vmem:[#allocation85_spill] sm:$0xff] }
 0x6e2   :  { %2029 = vmatprep.subr.bf16.mxu0 %v5720_v51  ;;  %2070 = vmatprep.subr.bf16.mxu1 %v5721_v0  ;;  %v5731_v51 = vld [vmem:[#allocation86_spill] sm:$0xff]  ;;  %v5732_v0 = vld [vmem:[#allocation87_spill] sm:$0xff] }
 0x6e5   :  { %2030 = vmatpush1.bf16.msra.mxu0 %v5722_v17  ;;  %2071 = vmatpush1.bf16.msra.mxu1 %v5723_v8  ;;  %v5733_v17 = vld [vmem:[#allocation88_spill] sm:$0xff] }
 0x6e6   :  { %2031 = vmatprep.subr.bf16.mxu0 %v5724_v42  ;;  %2072 = vmatprep.subr.bf16.mxu1 %v5725_v49  ;;  %v5757_v42 = vld [vmem:[#allocation118_spill] sm:$0xff] }
 0x6e9   :  { %2032 = vmatpush1.bf16.msra.mxu0 %v5726_v40  ;;  %2073 = vmatpush1.bf16.msra.mxu1 %v5727_v50  ;;  %v5734_v40 = vld [vmem:[#allocation92_spill] sm:$0xff]  ;;  %v5735_v50 = vld [vmem:[#allocation93_spill] sm:$0xff] }
 0x6ea   :  { %2033 = vmatprep.subr.bf16.mxu0 %v5728_v43  ;;  %2074 = vmatprep.subr.bf16.mxu1 %v5729_v48  ;;  %v5736_v43 = vld [vmem:[#allocation94_spill] sm:$0xff] }
 0x6eb   :  { %v4818_v48 = vld [vmem:[#allocation10 + $0x184] ss:$16 sps:$4 sm:$0xff]  }
 0x6ec   :  { %5737 = vst [vmem:[#allocation95_spill] sm:$0xff] %v4818_v48 }
 0x6ed   :  { %2034 = vmatpush1.bf16.msra.mxu0 %v5730_v9  ;;  %2075 = vmatpush1.bf16.msra.mxu1 %v5731_v51  ;;  %v4821_v51 = vld [vmem:[#allocation10 + $0x18c] ss:$16 sps:$4 sm:$0xff]  }
 0x6ee   :  { %2035 = vmatprep.subr.bf16.mxu0 %v5732_v0  ;;  %2076 = vmatprep.subr.bf16.mxu1 %v5733_v17  ;;  %5738 = vst [vmem:[#allocation96_spill] sm:$0xff] %v4821_v51  ;;  %v4824_v17 = vld [vmem:[#allocation10 + $0x180] ss:$16 sps:$4 sm:$0xff]   ;;  %v5756_v0 = vld [vmem:[#allocation117_spill] sm:$0xff] }
 0x6ef   :  { %5739 = vst [vmem:[#allocation97_spill] sm:$0xff] %v4824_v17 }
 0x6f1   :  { %2036 = vmatpush1.bf16.msra.mxu0 %v4656_v37  ;;  %2077 = vmatpush1.bf16.msra.mxu1 %v4659_v2  ;;  %v4827_v2 = vld [vmem:[#allocation10 + $0x188] ss:$16 sps:$4 sm:$0xff]   ;;  %v5755_v37 = vld [vmem:[#allocation116_spill] sm:$0xff] }
 0x6f2   :  { %2037 = vmatprep.subr.bf16.mxu0 %v4662_v34  ;;  %2078 = vmatprep.subr.bf16.mxu1 %v5734_v40  ;;  %5740 = vst [vmem:[#allocation98_spill] sm:$0xff] %v4827_v2  ;;  %v4830_v40 = vld [vmem:[#allocation10 + $0x1a4] ss:$16 sps:$4 sm:$0xff]  }
 0x6f3   :  { %5741 = vst [vmem:[#allocation99_spill] sm:$0xff] %v4830_v40 }
 0x6f5   :  { %2038 = vmatpush1.bf16.msra.mxu0 %v5735_v50  ;;  %2079 = vmatpush1.bf16.msra.mxu1 %v5736_v43  ;;  %v4833_v43 = vld [vmem:[#allocation10 + $0x1ac] ss:$16 sps:$4 sm:$0xff]   ;;  %v5754_v50 = vld [vmem:[#allocation18_spill] sm:$0xff] }
 0x6f6   :  { %2039 = vmatprep.subr.bf16.mxu0 %v4818_v48  ;;  %2080 = vmatprep.subr.bf16.mxu1 %v4821_v51  ;;  %5742 = vst [vmem:[#allocation100_spill] sm:$0xff] %v4833_v43  ;;  %v4836_v48 = vld [vmem:[#allocation10 + $0x1a0] ss:$16 sps:$4 sm:$0xff]   ;;  %v4839_v51 = vld [vmem:[#allocation10 + $0x1a8] ss:$16 sps:$4 sm:$0xff]  }
 0x6f7   :  { %5743 = vst [vmem:[#allocation101_spill] sm:$0xff] %v4836_v48  ;;  %5744 = vst [vmem:[#allocation102_spill] sm:$0xff] %v4839_v51 }
 0x6f9   :  { %2040 = vmatpush1.bf16.msra.mxu0 %v4824_v17  ;;  %2081 = vmatpush1.bf16.msra.mxu1 %v4827_v2  ;;  %v4842_v17 = vld [vmem:[#allocation10 + $0x1c4] ss:$16 sps:$4 sm:$0xff]   ;;  %v4845_v2 = vld [vmem:[#allocation10 + $0x1cc] ss:$16 sps:$4 sm:$0xff]  }
 0x6fa   :  { %2041 = vmatprep.subr.bf16.mxu0 %v4830_v40  ;;  %2082 = vmatprep.subr.bf16.mxu1 %v4833_v43  ;;  %5745 = vst [vmem:[#allocation103_spill] sm:$0xff] %v4842_v17  ;;  %5746 = vst [vmem:[#allocation104_spill] sm:$0xff] %v4845_v2  ;;  %v4848_v40 = vld [vmem:[#allocation10 + $0x1c0] ss:$16 sps:$4 sm:$0xff]   ;;  %v4851_v43 = vld [vmem:[#allocation10 + $0x1c8] ss:$16 sps:$4 sm:$0xff]  }
 0x6fb   :  { %5747 = vst [vmem:[#allocation105_spill] sm:$0xff] %v4848_v40  ;;  %5748 = vst [vmem:[#allocation106_spill] sm:$0xff] %v4851_v43 }
 0x6fd   :  { %2042 = vmatpush1.bf16.msra.mxu0 %v4836_v48  ;;  %2083 = vmatpush1.bf16.msra.mxu1 %v4839_v51  ;;  %v4854_v48 = vld [vmem:[#allocation10 + $0x1e4] ss:$16 sps:$4 sm:$0xff]   ;;  %v4857_v51 = vld [vmem:[#allocation10 + $0x1ec] ss:$16 sps:$4 sm:$0xff]  }
 0x6fe   :  { %2043 = vmatprep.subr.bf16.mxu0 %v4842_v17  ;;  %2084 = vmatprep.subr.bf16.mxu1 %v4845_v2  ;;  %5749 = vst [vmem:[#allocation108_spill] sm:$0xff] %v4854_v48  ;;  %5750 = vst [vmem:[#allocation109_spill] sm:$0xff] %v4857_v51  ;;  %v4860_v17 = vld [vmem:[#allocation10 + $0x1e0] ss:$16 sps:$4 sm:$0xff]   ;;  %v4863_v2 = vld [vmem:[#allocation10 + $0x1e8] ss:$16 sps:$4 sm:$0xff]  }
 0x6ff   :  { %5751 = vst [vmem:[#allocation110_spill] sm:$0xff] %v4860_v17  ;;  %5752 = vst [vmem:[#allocation111_spill] sm:$0xff] %v4863_v2 }
 0x701   :  { %2044 = vmatpush1.bf16.msra.mxu0 %v4848_v40  ;;  %2085 = vmatpush1.bf16.msra.mxu1 %v4851_v43  ;;  %v5753_v40 = vld [vmem:[#allocation17_spill] sm:$0xff] }
 0x702   :  { %2045 = vmatprep.subr.bf16.mxu0 %v4854_v48  ;;  %2086 = vmatprep.subr.bf16.mxu1 %v4857_v51 }
 0x705   :  { %2046 = vmatpush1.bf16.msra.mxu0 %v4860_v17  ;;  %2087 = vmatpush1.bf16.msra.mxu1 %v4863_v2 }
 0x706   :  { %2126 = vmatprep.subr.bf16.mxu0 %v5753_v40  ;;  %2167 = vmatprep.subr.bf16.mxu1 %v5754_v50 }
 0x79a   :  { %v1942_v43 = vpop.f32.mrb[36].mxu0  ;;  %v1983_v34 = vpop.f32.mrb[36].mxu1 }
 0x79b   :  { %v1943_v48 = vadd.f32 %v1942_v43, %v5755_v37  ;;  %v1984_v9 = vadd.f32 %v1983_v34, %v5756_v0  ;;  %v1944_v49 = vpop.f32.mrb[37].mxu0  ;;  %v1985_v51 = vpop.f32.mrb[37].mxu1  ;;  %v5791_v0 = vld [vmem:[#allocation54_spill] sm:$0xff] }
 0x79c   :  { %v1945_v8 = vadd.f32 %v1944_v49, %v5757_v42  ;;  %v1986_v17 = vadd.f32 %v1985_v51, %v5758_v63  ;;  %v1946_v39 = vpop.f32.mrb[38].mxu0  ;;  %v1987_v52 = vpop.f32.mrb[38].mxu1  ;;  %v5790_v51 = vld [vmem:[#allocation53_spill] sm:$0xff] }
 0x79d   :  { %v2777_v13 = vmul.f32 -1.442695, %v1943_v48  ;;  %v1947_v2 = vpop.f32.mrb[39].mxu0  ;;  %v1988_v47 = vpop.f32.mrb[39].mxu1  ;;  %v2779_v50 = vmul.f32 -1.442695, %v1984_v9 }
 0x79e   :  { %v2778_v40 = vmul.f32 -1.442695, %v1945_v8  ;;  %v5788_v48 = vld [vmem:[#allocation51_spill] sm:$0xff]  ;;  %v5789_v9 = vld [vmem:[#allocation52_spill] sm:$0xff] }
 0x79f   :  { %3145 = vpow2.f32 %v2777_v13 }
 0x7a0   :  { %3147 = vpow2.f32 %v2778_v40  ;;  %v5792_v40 = vld [vmem:[#allocation55_spill] sm:$0xff] }
 0x7a1   :  { %3149 = vtanh.f32 %v1986_v17 }
 0x7a2   :  { %3151 = vpow2.f32 %v2779_v50  ;;  %v5793_v50 = vld [vmem:[#allocation56_spill] sm:$0xff] }
 0x7a9   :  { %v3146_v30 = vpop.eup %3145 }
 0x7aa   :  { %v1999_v22 = vadd.f32 1.0, %v3146_v30  ;;  %v3148_v37 = vpop.eup %3147 }
 0x7ab   :  { %v2000_v34 = vadd.f32 1.0, %v3148_v37  ;;  %v3150_v42 = vpop.eup %3149  ;;  %v5794_v37 = vld [vmem:[#allocation57_spill] sm:$0xff] }
 0x7ac   :  { %3153 = vrcp.f32 %v1999_v22  ;;  %v3152_v49 = vpop.eup %3151  ;;  %v5782_v22 = vld [vmem:[#allocation45_spill] sm:$0xff] }
 0x7ad   :  { %3155 = vrcp.f32 %v2000_v34  ;;  %v2001_v43 = vadd.f32 1.0, %v3152_v49  ;;  %v5795_v34 = vld [vmem:[#allocation58_spill] sm:$0xff] }
 0x7af   :  { %3157 = vrcp.f32 %v2001_v43 }
 0x7b6   :  { %v3154_v63 = vpop.eup %3153 }
 0x7b7   :  { %v2010_v39 = vmul.f32 %v3154_v63, %v3150_v42  ;;  %v3156_v52 = vpop.eup %3155 }
 0x7b8   :  { %v2009_v2 = vmul.f32 %v3156_v52, %v4697_v44  ;;  %v5783_v44 = vld [vmem:[#allocation46_spill] sm:$0xff] }
 0x7b9   :  { %v3158_v30 = vpop.eup %3157 }
 0x7ba   :  { %v4873_v47 = vadd.f32 %v2010_v39, %v2009_v2 }
 0x7bc   :  { %3159 = vtanh.f32 %v4873_v47 }
 0x7c6   :  { %v3160_v13 = vpop.eup %3159 }
 0x7c7   :  { %v2013_v17 = vmul.f32 %v3160_v13, %v3158_v30 }
 0x7c9   :  { %v2014_v8 = vpack.c.bf16 %v2013_v17, %v2013_v17 }
 0x7cb   :  { %2048 = vmatmul.mubr.bf16.vlgmr.msra.gmra.mrb[40].mxu0 %v2014_v8  ;;  %2089 = vmatmul.mubr.bf16.vlgmr.msra.gmra.mrb[40].mxu1 %v2014_v8 }
 0x7cc   :  { %2158 = vmatprep.mubr.bf16.mxu0 %v2014_v8  ;;  %2199 = vmatprep.mubr.bf16.mxu1 %v2014_v8 }
 0x7cd   :  { %2127 = vmatpush1.bf16.msra.mxu0 %v4336_v19  ;;  %2168 = vmatpush1.bf16.msra.mxu1 %v4339_v18  ;;  %v5759_v19 = vld [vmem:[#allocation23_spill] sm:$0xff]  ;;  %v5760_v18 = vld [vmem:[#allocation24_spill] sm:$0xff] }
 0x7ce   :  { %2128 = vmatprep.subr.bf16.mxu0 %v4342_v38  ;;  %2169 = vmatprep.subr.bf16.mxu1 %v4345_v35  ;;  %v5761_v38 = vld [vmem:[#allocation25_spill] sm:$0xff]  ;;  %v5762_v35 = vld [vmem:[#allocation26_spill] sm:$0xff] }
 0x7d1   :  { %2129 = vmatpush1.bf16.msra.mxu0 %v4348_v20  ;;  %2170 = vmatpush1.bf16.msra.mxu1 %v4351_v53  ;;  %v5763_v20 = vld [vmem:[#allocation27_spill] sm:$0xff]  ;;  %v5764_v53 = vld [vmem:[#allocation28_spill] sm:$0xff] }
 0x7d2   :  { %2130 = vmatprep.subr.bf16.mxu0 %v4354_v54  ;;  %2171 = vmatprep.subr.bf16.mxu1 %v4357_v55  ;;  %v5765_v54 = vld [vmem:[#allocation29_spill] sm:$0xff]  ;;  %v5766_v55 = vld [vmem:[#allocation30_spill] sm:$0xff] }
 0x7d5   :  { %2131 = vmatpush1.bf16.msra.mxu0 %v4360_v56  ;;  %2172 = vmatpush1.bf16.msra.mxu1 %v4363_v57  ;;  %v5767_v56 = vld [vmem:[#allocation31_spill] sm:$0xff]  ;;  %v5768_v57 = vld [vmem:[#allocation32_spill] sm:$0xff] }
 0x7d6   :  { %2132 = vmatprep.subr.bf16.mxu0 %v4366_v58  ;;  %2173 = vmatprep.subr.bf16.mxu1 %v4369_v59  ;;  %v5769_v58 = vld [vmem:[#allocation33_spill] sm:$0xff]  ;;  %v5770_v59 = vld [vmem:[#allocation34_spill] sm:$0xff] }
 0x7d9   :  { %2133 = vmatpush1.bf16.msra.mxu0 %v4372_v60  ;;  %2174 = vmatpush1.bf16.msra.mxu1 %v4375_v61  ;;  %v5771_v60 = vld [vmem:[#allocation35_spill] sm:$0xff]  ;;  %v5772_v61 = vld [vmem:[#allocation36_spill] sm:$0xff] }
 0x7da   :  { %2134 = vmatprep.subr.bf16.mxu0 %v4378_v62  ;;  %2175 = vmatprep.subr.bf16.mxu1 %v4381_v3  ;;  %v5773_v62 = vld [vmem:[#allocation37_spill] sm:$0xff]  ;;  %v5774_v3 = vld [vmem:[#allocation38_spill] sm:$0xff] }
 0x7dd   :  { %2135 = vmatpush1.bf16.msra.mxu0 %v4384_v4  ;;  %2176 = vmatpush1.bf16.msra.mxu1 %v4387_v5  ;;  %v5775_v4 = vld [vmem:[#allocation39_spill] sm:$0xff]  ;;  %v5776_v5 = vld [vmem:[#allocation40_spill] sm:$0xff] }
 0x7de   :  { %2136 = vmatprep.subr.bf16.mxu0 %v4390_v6  ;;  %2177 = vmatprep.subr.bf16.mxu1 %v4393_v7  ;;  %v5777_v6 = vld [vmem:[#allocation41_spill] sm:$0xff]  ;;  %v5778_v7 = vld [vmem:[#allocation42_spill] sm:$0xff] }
 0x7e1   :  { %2137 = vmatpush1.bf16.msra.mxu0 %v4396_v10  ;;  %2178 = vmatpush1.bf16.msra.mxu1 %v4399_v11  ;;  %v5779_v10 = vld [vmem:[#allocation43_spill] sm:$0xff]  ;;  %v5780_v11 = vld [vmem:[#allocation44_spill] sm:$0xff] }
 0x7e2   :  { %2138 = vmatprep.subr.bf16.mxu0 %v4402_v14  ;;  %2179 = vmatprep.subr.bf16.mxu1 %v5664_v36  ;;  %v5781_v14 = vld [vmem:[#allocation107_spill] sm:$0xff] }
 0x7e3   :  { %v5784_v36 = vld [vmem:[#allocation47_spill] sm:$0xff] }
 0x7e5   :  { %2139 = vmatpush1.bf16.msra.mxu0 %v5665_v16  ;;  %2180 = vmatpush1.bf16.msra.mxu1 %v5666_v45  ;;  %v5785_v16 = vld [vmem:[#allocation48_spill] sm:$0xff]  ;;  %v5786_v45 = vld [vmem:[#allocation49_spill] sm:$0xff] }
 0x7e6   :  { %2140 = vmatprep.subr.bf16.mxu0 %v5667_v46  ;;  %2181 = vmatprep.subr.bf16.mxu1 %v5759_v19  ;;  %v5787_v46 = vld [vmem:[#allocation50_spill] sm:$0xff] }
 0x7e9   :  { %2141 = vmatpush1.bf16.msra.mxu0 %v5760_v18  ;;  %2182 = vmatpush1.bf16.msra.mxu1 %v5761_v38 }
 0x7ea   :  { %2142 = vmatprep.subr.bf16.mxu0 %v5762_v35  ;;  %2183 = vmatprep.subr.bf16.mxu1 %v5763_v20 }
 0x7ed   :  { %2143 = vmatpush1.bf16.msra.mxu0 %v5764_v53  ;;  %2184 = vmatpush1.bf16.msra.mxu1 %v5765_v54 }
 0x7ee   :  { %2144 = vmatprep.subr.bf16.mxu0 %v5766_v55  ;;  %2185 = vmatprep.subr.bf16.mxu1 %v5767_v56 }
 0x7f1   :  { %2145 = vmatpush1.bf16.msra.mxu0 %v5768_v57  ;;  %2186 = vmatpush1.bf16.msra.mxu1 %v5769_v58 }
 0x7f2   :  { %2146 = vmatprep.subr.bf16.mxu0 %v5770_v59  ;;  %2187 = vmatprep.subr.bf16.mxu1 %v5771_v60 }
 0x7f5   :  { %2147 = vmatpush1.bf16.msra.mxu0 %v5772_v61  ;;  %2188 = vmatpush1.bf16.msra.mxu1 %v5773_v62 }
 0x7f6   :  { %2148 = vmatprep.subr.bf16.mxu0 %v5774_v3  ;;  %2189 = vmatprep.subr.bf16.mxu1 %v5775_v4 }
 0x7f9   :  { %2149 = vmatpush1.bf16.msra.mxu0 %v5776_v5  ;;  %2190 = vmatpush1.bf16.msra.mxu1 %v5777_v6 }
 0x7fa   :  { %2150 = vmatprep.subr.bf16.mxu0 %v5778_v7  ;;  %2191 = vmatprep.subr.bf16.mxu1 %v5779_v10  ;;  %v5807_v10 = vld [vmem:[#allocation70_spill] sm:$0xff] }
 0x7fd   :  { %2151 = vmatpush1.bf16.msra.mxu0 %v5780_v11  ;;  %2192 = vmatpush1.bf16.msra.mxu1 %v5781_v14  ;;  %v5808_v11 = vld [vmem:[#allocation71_spill] sm:$0xff]  ;;  %v5809_v14 = vld [vmem:[#allocation72_spill] sm:$0xff] }
 0x7fe   :  { %2152 = vmatprep.subr.bf16.mxu0 %v5782_v22  ;;  %2193 = vmatprep.subr.bf16.mxu1 %v5783_v44  ;;  %v5810_v22 = vld [vmem:[#allocation73_spill] sm:$0xff]  ;;  %v5811_v44 = vld [vmem:[#allocation74_spill] sm:$0xff] }
 0x801   :  { %2153 = vmatpush1.bf16.msra.mxu0 %v5784_v36  ;;  %2194 = vmatpush1.bf16.msra.mxu1 %v5785_v16  ;;  %v5812_v36 = vld [vmem:[#allocation75_spill] sm:$0xff]  ;;  %v5813_v16 = vld [vmem:[#allocation76_spill] sm:$0xff] }
 0x802   :  { %2154 = vmatprep.subr.bf16.mxu0 %v5786_v45  ;;  %2195 = vmatprep.subr.bf16.mxu1 %v5787_v46  ;;  %v5814_v45 = vld [vmem:[#allocation77_spill] sm:$0xff]  ;;  %v5815_v46 = vld [vmem:[#allocation78_spill] sm:$0xff] }
 0x805   :  { %2155 = vmatpush1.bf16.msra.mxu0 %v5788_v48  ;;  %2196 = vmatpush1.bf16.msra.mxu1 %v5789_v9  ;;  %v5816_v48 = vld [vmem:[#allocation79_spill] sm:$0xff]  ;;  %v5817_v9 = vld [vmem:[#allocation80_spill] sm:$0xff] }
 0x806   :  { %2156 = vmatprep.subr.bf16.mxu0 %v5790_v51  ;;  %2197 = vmatprep.subr.bf16.mxu1 %v5791_v0  ;;  %v5818_v51 = vld [vmem:[#allocation81_spill] sm:$0xff]  ;;  %v5819_v0 = vld [vmem:[#allocation82_spill] sm:$0xff] }
 0x809   :  { %2157 = vmatpush1.bf16.msra.mxu0 %v5792_v40  ;;  %2198 = vmatpush1.bf16.msra.mxu1 %v5793_v50  ;;  %v5820_v40 = vld [vmem:[#allocation83_spill] sm:$0xff]  ;;  %v5821_v50 = vld [vmem:[#allocation84_spill] sm:$0xff] }
 0x80a   :  { %2233 = vmatprep.subr.bf16.mxu0 %v5794_v37  ;;  %2274 = vmatprep.subr.bf16.mxu1 %v5795_v34  ;;  %v5822_v37 = vld [vmem:[#allocation85_spill] sm:$0xff]  ;;  %v5823_v34 = vld [vmem:[#allocation86_spill] sm:$0xff] }
 0x89e   :  { %v2049_v42 = vpop.f32.mrb[40].mxu0  ;;  %v2090_v49 = vpop.f32.mrb[40].mxu1 }
 0x89f   :  { %v2050_v63 = vadd.f32 %v2049_v42, %v4239_v12  ;;  %v2051_v39 = vpop.f32.mrb[41].mxu0  ;;  %v2092_v52 = vpop.f32.mrb[41].mxu1  ;;  %v2091_v18 = vadd.f32 %v2090_v49, %v4249_v21  ;;  %v5824_v42 = vld [vmem:[#allocation87_spill] sm:$0xff]  ;;  %v5825_v49 = vld [vmem:[#allocation88_spill] sm:$0xff] }
 0x8a0   :  { %v2052_v43 = vadd.f32 %v2051_v39, %v4243_v1  ;;  %v2053_v2 = vpop.f32.mrb[42].mxu0  ;;  %v2094_v30 = vpop.f32.mrb[42].mxu1  ;;  %v2093_v38 = vadd.f32 %v2092_v52, %v4253_v33  ;;  %v5827_v39 = vld [vmem:[#allocation90_spill] sm:$0xff]  ;;  %v5828_v52 = vld [vmem:[#allocation91_spill] sm:$0xff] }
 0x8a1   :  { %v2780_v13 = vmul.f32 -1.442695, %v2050_v63  ;;  %v2054_v17 = vpop.f32.mrb[43].mxu0  ;;  %v2095_v8 = vpop.f32.mrb[43].mxu1  ;;  %v2782_v35 = vmul.f32 -1.442695, %v2091_v18 }
 0x8a2   :  { %v2781_v19 = vmul.f32 -1.442695, %v2052_v43  ;;  %v5826_v63 = vld [vmem:[#allocation89_spill] sm:$0xff]  ;;  %v5829_v43 = vld [vmem:[#allocation92_spill] sm:$0xff]  ;;  %v5831_v30 = vld [vmem:[#allocation94_spill] sm:$0xff] }
 0x8a3   :  { %3161 = vpow2.f32 %v2780_v13  ;;  %v5830_v2 = vld [vmem:[#allocation93_spill] sm:$0xff]  ;;  %v5832_v13 = vld [vmem:[#allocation95_spill] sm:$0xff]  ;;  %v5833_v17 = vld [vmem:[#allocation96_spill] sm:$0xff] }
 0x8a4   :  { %3163 = vpow2.f32 %v2781_v19  ;;  %v5834_v8 = vld [vmem:[#allocation97_spill] sm:$0xff]  ;;  %v5835_v19 = vld [vmem:[#allocation98_spill] sm:$0xff]  ;;  %v5836_v18 = vld [vmem:[#allocation99_spill] sm:$0xff] }
 0x8a5   :  { %3165 = vtanh.f32 %v2093_v38  ;;  %v5837_v38 = vld [vmem:[#allocation100_spill] sm:$0xff] }
 0x8a6   :  { %3167 = vpow2.f32 %v2782_v35  ;;  %v5838_v35 = vld [vmem:[#allocation101_spill] sm:$0xff] }
 0x8ad   :  { %v3162_v20 = vpop.eup %3161 }
 0x8ae   :  { %v2106_v53 = vadd.f32 1.0, %v3162_v20  ;;  %v3164_v54 = vpop.eup %3163  ;;  %v5839_v20 = vld [vmem:[#allocation102_spill] sm:$0xff] }
 0x8af   :  { %v2107_v55 = vadd.f32 1.0, %v3164_v54  ;;  %v3166_v56 = vpop.eup %3165  ;;  %v5841_v54 = vld [vmem:[#allocation104_spill] sm:$0xff] }
 0x8b0   :  { %3169 = vrcp.f32 %v2106_v53  ;;  %v3168_v57 = vpop.eup %3167  ;;  %v5840_v53 = vld [vmem:[#allocation103_spill] sm:$0xff] }
 0x8b1   :  { %3171 = vrcp.f32 %v2107_v55  ;;  %v2108_v61 = vadd.f32 1.0, %v3168_v57  ;;  %v5842_v55 = vld [vmem:[#allocation105_spill] sm:$0xff]  ;;  %v5844_v57 = vld [vmem:[#allocation108_spill] sm:$0xff] }
 0x8b3   :  { %3173 = vrcp.f32 %v2108_v61  ;;  %v3369_v61 = vld [vmem:[#allocation9 + $0x4] ss:$16 sps:$4 sm:$0xff]  }
 0x8ba   :  { %v3170_v58 = vpop.eup %3169 }
 0x8bb   :  { %v2117_v59 = vmul.f32 %v3170_v58, %v3166_v56  ;;  %v3172_v60 = vpop.eup %3171  ;;  %v5843_v56 = vld [vmem:[#allocation106_spill] sm:$0xff]  ;;  %v5845_v58 = vld [vmem:[#allocation109_spill] sm:$0xff] }
 0x8bc   :  { %v2116_v62 = vmul.f32 %v3172_v60, %v4769_v26  ;;  %v5796_v26 = vld [vmem:[#allocation59_spill] sm:$0xff] }
 0x8bd   :  { %v3174_v4 = vpop.eup %3173  ;;  %v5847_v60 = vld [vmem:[#allocation111_spill] sm:$0xff] }
 0x8be   :  { %v4945_v3 = vadd.f32 %v2117_v59, %v2116_v62  ;;  %v5846_v59 = vld [vmem:[#allocation110_spill] sm:$0xff]  ;;  %v3370_v62 = vld [vmem:[#allocation9 + $0xc] ss:$16 sps:$4 sm:$0xff]  }
 0x8c0   :  { %3175 = vtanh.f32 %v4945_v3 }
 0x8ca   :  { %v3176_v5 = vpop.eup %3175 }
 0x8cb   :  { %v2120_v6 = vmul.f32 %v3176_v5, %v3174_v4 }
 0x8cd   :  { %v2125_v7 = vpack.c.bf16 %v2120_v6, %v2120_v6  ;;  %v5848_v6 = vld [vmem:[#allocation120_spill] sm:$0xff] }
 0x8cf   :  { %2159 = vmatmul.mubr.bf16.vlgmr.msra.gmra.mrb[44].mxu0 %v2125_v7  ;;  %2200 = vmatmul.mubr.bf16.vlgmr.msra.gmra.mrb[44].mxu1 %v2125_v7 }
 0x8d0   :  { %2265 = vmatprep.mubr.bf16.mxu0 %v2125_v7  ;;  %2306 = vmatprep.mubr.bf16.mxu1 %v2125_v7 }
 0x8d1   :  { %2234 = vmatpush1.bf16.msra.mxu0 %v4536_v15  ;;  %2275 = vmatpush1.bf16.msra.mxu1 %v4539_v29  ;;  %v5797_v15 = vld [vmem:[#allocation60_spill] sm:$0xff]  ;;  %v5798_v29 = vld [vmem:[#allocation61_spill] sm:$0xff] }
 0x8d2   :  { %2235 = vmatprep.subr.bf16.mxu0 %v4542_v41  ;;  %2276 = vmatprep.subr.bf16.mxu1 %v4545_v27  ;;  %v5799_v41 = vld [vmem:[#allocation62_spill] sm:$0xff]  ;;  %v5800_v27 = vld [vmem:[#allocation63_spill] sm:$0xff] }
 0x8d5   :  { %2236 = vmatpush1.bf16.msra.mxu0 %v4548_v28  ;;  %2277 = vmatpush1.bf16.msra.mxu1 %v4551_v31  ;;  %v5801_v28 = vld [vmem:[#allocation64_spill] sm:$0xff]  ;;  %v5802_v31 = vld [vmem:[#allocation65_spill] sm:$0xff] }
 0x8d6   :  { %2237 = vmatprep.subr.bf16.mxu0 %v4554_v24  ;;  %2278 = vmatprep.subr.bf16.mxu1 %v4557_v23  ;;  %v5803_v24 = vld [vmem:[#allocation66_spill] sm:$0xff]  ;;  %v5804_v23 = vld [vmem:[#allocation67_spill] sm:$0xff] }
 0x8d9   :  { %2238 = vmatpush1.bf16.msra.mxu0 %v4560_v32  ;;  %2279 = vmatpush1.bf16.msra.mxu1 %v4563_v25  ;;  %v5805_v32 = vld [vmem:[#allocation68_spill] sm:$0xff]  ;;  %v5806_v25 = vld [vmem:[#allocation69_spill] sm:$0xff] }
 0x8da   :  { %2239 = vmatprep.subr.bf16.mxu0 %v5796_v26  ;;  %2280 = vmatprep.subr.bf16.mxu1 %v5797_v15  ;;  %v5849_v26 = vld [vmem:[#allocation121_spill] sm:$0xff] }
 0x8dd   :  { %2240 = vmatpush1.bf16.msra.mxu0 %v5798_v29  ;;  %2281 = vmatpush1.bf16.msra.mxu1 %v5799_v41 }
 0x8de   :  { %2241 = vmatprep.subr.bf16.mxu0 %v5800_v27  ;;  %2282 = vmatprep.subr.bf16.mxu1 %v5801_v28  ;;  %v5850_v27 = vld [vmem:[#allocation122_spill] sm:$0xff] }
 0x8e1   :  { %2242 = vmatpush1.bf16.msra.mxu0 %v5802_v31  ;;  %2283 = vmatpush1.bf16.msra.mxu1 %v5803_v24  ;;  %v5851_v31 = vld [vmem:[#allocation123_spill] sm:$0xff] }
 0x8e2   :  { %2243 = vmatprep.subr.bf16.mxu0 %v5804_v23  ;;  %2284 = vmatprep.subr.bf16.mxu1 %v5805_v32 }
 0x8e5   :  { %2244 = vmatpush1.bf16.msra.mxu0 %v5806_v25  ;;  %2285 = vmatpush1.bf16.msra.mxu1 %v5807_v10 }
 0x8e6   :  { %2245 = vmatprep.subr.bf16.mxu0 %v5808_v11  ;;  %2286 = vmatprep.subr.bf16.mxu1 %v5809_v14 }
 0x8e9   :  { %2246 = vmatpush1.bf16.msra.mxu0 %v5810_v22  ;;  %2287 = vmatpush1.bf16.msra.mxu1 %v5811_v44 }
 0x8ea   :  { %2247 = vmatprep.subr.bf16.mxu0 %v5812_v36  ;;  %2288 = vmatprep.subr.bf16.mxu1 %v5813_v16 }
 0x8ed   :  { %2248 = vmatpush1.bf16.msra.mxu0 %v5814_v45  ;;  %2289 = vmatpush1.bf16.msra.mxu1 %v5815_v46 }
 0x8ee   :  { %2249 = vmatprep.subr.bf16.mxu0 %v5816_v48  ;;  %2290 = vmatprep.subr.bf16.mxu1 %v5817_v9 }
 0x8f1   :  { %2250 = vmatpush1.bf16.msra.mxu0 %v5818_v51  ;;  %2291 = vmatpush1.bf16.msra.mxu1 %v5819_v0 }
 0x8f2   :  { %2251 = vmatprep.subr.bf16.mxu0 %v5820_v40  ;;  %2292 = vmatprep.subr.bf16.mxu1 %v5821_v50 }
 0x8f5   :  { %2252 = vmatpush1.bf16.msra.mxu0 %v5822_v37  ;;  %2293 = vmatpush1.bf16.msra.mxu1 %v5823_v34 }
 0x8f6   :  { %2253 = vmatprep.subr.bf16.mxu0 %v5824_v42  ;;  %2294 = vmatprep.subr.bf16.mxu1 %v5825_v49 }
 0x8f9   :  { %2254 = vmatpush1.bf16.msra.mxu0 %v5826_v63  ;;  %2295 = vmatpush1.bf16.msra.mxu1 %v5827_v39  ;;  %v3371_v39 = vld [vmem:[#allocation9] ss:$16 sps:$4 sm:$0xff]  }
 0x8fa   :  { %2255 = vmatprep.subr.bf16.mxu0 %v5828_v52  ;;  %2296 = vmatprep.subr.bf16.mxu1 %v5829_v43  ;;  %v3372_v52 = vld [vmem:[#allocation9 + $0x8] ss:$16 sps:$4 sm:$0xff]   ;;  %v3373_v43 = vld [vmem:[#allocation9 + $0x24] ss:$16 sps:$4 sm:$0xff]  }
 0x8fd   :  { %2256 = vmatpush1.bf16.msra.mxu0 %v5830_v2  ;;  %2297 = vmatpush1.bf16.msra.mxu1 %v5831_v30  ;;  %v3375_v2 = vld [vmem:[#allocation9 + $0x20] ss:$16 sps:$4 sm:$0xff]   ;;  %v3376_v30 = vld [vmem:[#allocation9 + $0x28] ss:$16 sps:$4 sm:$0xff]  }
 0x8fe   :  { %2257 = vmatprep.subr.bf16.mxu0 %v5832_v13  ;;  %2298 = vmatprep.subr.bf16.mxu1 %v5833_v17 }
 0x901   :  { %2258 = vmatpush1.bf16.msra.mxu0 %v5834_v8  ;;  %2299 = vmatpush1.bf16.msra.mxu1 %v5835_v19 }
 0x902   :  { %2259 = vmatprep.subr.bf16.mxu0 %v5836_v18  ;;  %2300 = vmatprep.subr.bf16.mxu1 %v5837_v38 }
 0x905   :  { %2260 = vmatpush1.bf16.msra.mxu0 %v5838_v35  ;;  %2301 = vmatpush1.bf16.msra.mxu1 %v5839_v20 }
 0x906   :  { %2261 = vmatprep.subr.bf16.mxu0 %v5840_v53  ;;  %2302 = vmatprep.subr.bf16.mxu1 %v5841_v54 }
 0x909   :  { %2262 = vmatpush1.bf16.msra.mxu0 %v5842_v55  ;;  %2303 = vmatpush1.bf16.msra.mxu1 %v5843_v56 }
 0x90a   :  { %2263 = vmatprep.subr.bf16.mxu0 %v5844_v57  ;;  %2304 = vmatprep.subr.bf16.mxu1 %v5845_v58 }
 0x90d   :  { %2264 = vmatpush1.bf16.msra.mxu0 %v5846_v59  ;;  %2305 = vmatpush1.bf16.msra.mxu1 %v5847_v60 }
 0x90e   :  { %2344 = vmatprep.subr.bf16.mxu0 %v3369_v61  ;;  %2385 = vmatprep.subr.bf16.mxu1 %v3370_v62  ;;  %v3377_v61 = vld [vmem:[#allocation9 + $0x44] ss:$16 sps:$4 sm:$0xff]   ;;  %v3378_v62 = vld [vmem:[#allocation9 + $0x4c] ss:$16 sps:$4 sm:$0xff]  }
 0x9a2   :  { %v2160_v4 = vpop.f32.mrb[44].mxu0  ;;  %v2201_v5 = vpop.f32.mrb[44].mxu1 }
 0x9a3   :  { %v2161_v7 = vadd.f32 %v2160_v4, %v5848_v6  ;;  %v2202_v15 = vadd.f32 %v2201_v5, %v5849_v26  ;;  %v2162_v29 = vpop.f32.mrb[45].mxu0  ;;  %v2203_v41 = vpop.f32.mrb[45].mxu1  ;;  %v3379_v4 = vld [vmem:[#allocation9 + $0x40] ss:$16 sps:$4 sm:$0xff]   ;;  %v3380_v5 = vld [vmem:[#allocation9 + $0x48] ss:$16 sps:$4 sm:$0xff]  }
 0x9a4   :  { %v2163_v28 = vadd.f32 %v2162_v29, %v5850_v27  ;;  %v2204_v24 = vadd.f32 %v2203_v41, %v5851_v31  ;;  %v2164_v23 = vpop.f32.mrb[46].mxu0  ;;  %v2205_v32 = vpop.f32.mrb[46].mxu1  ;;  %v3381_v6 = vld [vmem:[#allocation9 + $0x64] ss:$16 sps:$4 sm:$0xff]   ;;  %v3383_v26 = vld [vmem:[#allocation9 + $0x60] ss:$16 sps:$4 sm:$0xff]  }
 0x9a5   :  { %v2783_v25 = vmul.f32 -1.442695, %v2161_v7  ;;  %v2165_v10 = vpop.f32.mrb[47].mxu0  ;;  %v2206_v11 = vpop.f32.mrb[47].mxu1  ;;  %v2785_v22 = vmul.f32 -1.442695, %v2202_v15 }
 0x9a6   :  { %v2784_v14 = vmul.f32 -1.442695, %v2163_v28  ;;  %v3382_v7 = vld [vmem:[#allocation9 + $0x6c] ss:$16 sps:$4 sm:$0xff]   ;;  %v3384_v15 = vld [vmem:[#allocation9 + $0x68] ss:$16 sps:$4 sm:$0xff]  }
 0x9a7   :  { %3177 = vpow2.f32 %v2783_v25  ;;  %v3385_v29 = vld [vmem:[#allocation9 + $0x84] ss:$16 sps:$4 sm:$0xff]   ;;  %v3386_v41 = vld [vmem:[#allocation9 + $0x8c] ss:$16 sps:$4 sm:$0xff]   ;;  %v3387_v27 = vld [vmem:[#allocation9 + $0x80] ss:$16 sps:$4 sm:$0xff]  }
 0x9a8   :  { %3179 = vpow2.f32 %v2784_v14  ;;  %v3388_v28 = vld [vmem:[#allocation9 + $0x88] ss:$16 sps:$4 sm:$0xff]   ;;  %v3389_v31 = vld [vmem:[#allocation9 + $0xa4] ss:$16 sps:$4 sm:$0xff]   ;;  %v3391_v23 = vld [vmem:[#allocation9 + $0xa0] ss:$16 sps:$4 sm:$0xff]  }
 0x9a9   :  { %3181 = vtanh.f32 %v2204_v24  ;;  %v3390_v24 = vld [vmem:[#allocation9 + $0xac] ss:$16 sps:$4 sm:$0xff]   ;;  %v3392_v32 = vld [vmem:[#allocation9 + $0xa8] ss:$16 sps:$4 sm:$0xff]   ;;  %v3393_v25 = vld [vmem:[#allocation9 + $0xc4] ss:$16 sps:$4 sm:$0xff]  }
 0x9aa   :  { %3183 = vpow2.f32 %v2785_v22  ;;  %v3394_v10 = vld [vmem:[#allocation9 + $0xcc] ss:$16 sps:$4 sm:$0xff]   ;;  %v3395_v11 = vld [vmem:[#allocation9 + $0xc0] ss:$16 sps:$4 sm:$0xff]   ;;  %v3396_v14 = vld [vmem:[#allocation9 + $0xc8] ss:$16 sps:$4 sm:$0xff]  }
 0x9ab   :  { %v3397_v22 = vld [vmem:[#allocation9 + $0xe4] ss:$16 sps:$4 sm:$0xff]  }
 0x9b1   :  { %v3178_v44 = vpop.eup %3177 }
 0x9b2   :  { %v2217_v36 = vadd.f32 1.0, %v3178_v44  ;;  %v3180_v16 = vpop.eup %3179  ;;  %v3398_v44 = vld [vmem:[#allocation9 + $0xec] ss:$16 sps:$4 sm:$0xff]  }
 0x9b3   :  { %v2218_v45 = vadd.f32 1.0, %v3180_v16  ;;  %v3182_v46 = vpop.eup %3181  ;;  %v3400_v16 = vld [vmem:[#allocation9 + $0xe8] ss:$16 sps:$4 sm:$0xff]  }
 0x9b4   :  { %3185 = vrcp.f32 %v2217_v36  ;;  %v3184_v48 = vpop.eup %3183  ;;  %v3399_v36 = vld [vmem:[#allocation9 + $0xe0] ss:$16 sps:$4 sm:$0xff]  }
 0x9b5   :  { %3187 = vrcp.f32 %v2218_v45  ;;  %v2219_v40 = vadd.f32 1.0, %v3184_v48  ;;  %v3401_v45 = vld [vmem:[#allocation9 + $0x104] ss:$16 sps:$4 sm:$0xff]   ;;  %v3403_v48 = vld [vmem:[#allocation9 + $0x100] ss:$16 sps:$4 sm:$0xff]  }
 0x9b7   :  { %3189 = vrcp.f32 %v2219_v40  ;;  %v3407_v40 = vld [vmem:[#allocation9 + $0x120] ss:$16 sps:$4 sm:$0xff]  }
 0x9be   :  { %v3186_v9 = vpop.eup %3185 }
 0x9bf   :  { %v2228_v51 = vmul.f32 %v3186_v9, %v3182_v46  ;;  %v3188_v0 = vpop.eup %3187  ;;  %v3402_v46 = vld [vmem:[#allocation9 + $0x10c] ss:$16 sps:$4 sm:$0xff]   ;;  %v3404_v9 = vld [vmem:[#allocation9 + $0x108] ss:$16 sps:$4 sm:$0xff]  }
 0x9c0   :  { %v2227_v50 = vmul.f32 %v3188_v0, %v4873_v47  ;;  %v3374_v47 = vld [vmem:[#allocation9 + $0x2c] ss:$16 sps:$4 sm:$0xff]  }
 0x9c1   :  { %v3190_v34 = vpop.eup %3189  ;;  %v3406_v0 = vld [vmem:[#allocation9 + $0x12c] ss:$16 sps:$4 sm:$0xff]  }
 0x9c2   :  { %v5015_v37 = vadd.f32 %v2228_v51, %v2227_v50  ;;  %v3405_v51 = vld [vmem:[#allocation9 + $0x124] ss:$16 sps:$4 sm:$0xff]   ;;  %v3408_v50 = vld [vmem:[#allocation9 + $0x128] ss:$16 sps:$4 sm:$0xff]  }
 0x9c4   :  { %3191 = vtanh.f32 %v5015_v37 }
 0x9ce   :  { %v3192_v42 = vpop.eup %3191 }
 0x9cf   :  { %v2231_v49 = vmul.f32 %v3192_v42, %v3190_v34  ;;  %v3409_v34 = vld [vmem:[#allocation9 + $0x144] ss:$16 sps:$4 sm:$0xff]   ;;  %v3410_v42 = vld [vmem:[#allocation9 + $0x14c] ss:$16 sps:$4 sm:$0xff]  }
 0x9d1   :  { %v2232_v63 = vpack.c.bf16 %v2231_v49, %v2231_v49  ;;  %v3411_v49 = vld [vmem:[#allocation9 + $0x140] ss:$16 sps:$4 sm:$0xff]  }
 0x9d3   :  { %2266 = vmatmul.mubr.bf16.vlgmr.msra.gmra.mrb[48].mxu0 %v2232_v63  ;;  %2307 = vmatmul.mubr.bf16.vlgmr.msra.gmra.mrb[48].mxu1 %v2232_v63 }
 0x9d4   :  { %2376 = vmatprep.mubr.bf16.mxu0 %v2232_v63  ;;  %2417 = vmatprep.mubr.bf16.mxu1 %v2232_v63  ;;  %v3412_v63 = vld [vmem:[#allocation9 + $0x148] ss:$16 sps:$4 sm:$0xff]  }
 0x9d5   :  { %2345 = vmatpush1.bf16.msra.mxu0 %v3371_v39  ;;  %2386 = vmatpush1.bf16.msra.mxu1 %v3372_v52  ;;  %v3413_v39 = vld [vmem:[#allocation9 + $0x164] ss:$16 sps:$4 sm:$0xff]   ;;  %v3414_v52 = vld [vmem:[#allocation9 + $0x16c] ss:$16 sps:$4 sm:$0xff]  }
 0x9d6   :  { %2346 = vmatprep.subr.bf16.mxu0 %v3373_v43  ;;  %2387 = vmatprep.subr.bf16.mxu1 %v3374_v47  ;;  %v3415_v43 = vld [vmem:[#allocation9 + $0x160] ss:$16 sps:$4 sm:$0xff]   ;;  %v3416_v47 = vld [vmem:[#allocation9 + $0x168] ss:$16 sps:$4 sm:$0xff]  }
 0x9d9   :  { %2347 = vmatpush1.bf16.msra.mxu0 %v3375_v2  ;;  %2388 = vmatpush1.bf16.msra.mxu1 %v3376_v30  ;;  %v3417_v2 = vld [vmem:[#allocation9 + $0x184] ss:$16 sps:$4 sm:$0xff]   ;;  %v3418_v30 = vld [vmem:[#allocation9 + $0x18c] ss:$16 sps:$4 sm:$0xff]  }
 0x9da   :  { %2348 = vmatprep.subr.bf16.mxu0 %v3377_v61  ;;  %2389 = vmatprep.subr.bf16.mxu1 %v3378_v62  ;;  %v3419_v61 = vld [vmem:[#allocation9 + $0x180] ss:$16 sps:$4 sm:$0xff]   ;;  %v3420_v62 = vld [vmem:[#allocation9 + $0x188] ss:$16 sps:$4 sm:$0xff]  }
 0x9dd   :  { %2349 = vmatpush1.bf16.msra.mxu0 %v3379_v4  ;;  %2390 = vmatpush1.bf16.msra.mxu1 %v3380_v5  ;;  %v3421_v4 = vld [vmem:[#allocation9 + $0x1a4] ss:$16 sps:$4 sm:$0xff]   ;;  %v3422_v5 = vld [vmem:[#allocation9 + $0x1ac] ss:$16 sps:$4 sm:$0xff]  }
 0x9de   :  { %2350 = vmatprep.subr.bf16.mxu0 %v3381_v6  ;;  %2391 = vmatprep.subr.bf16.mxu1 %v3382_v7  ;;  %v3423_v6 = vld [vmem:[#allocation9 + $0x1a0] ss:$16 sps:$4 sm:$0xff]   ;;  %v3424_v7 = vld [vmem:[#allocation9 + $0x1a8] ss:$16 sps:$4 sm:$0xff]  }
 0x9e1   :  { %2351 = vmatpush1.bf16.msra.mxu0 %v3383_v26  ;;  %2392 = vmatpush1.bf16.msra.mxu1 %v3384_v15  ;;  %v3425_v26 = vld [vmem:[#allocation9 + $0x1c4] ss:$16 sps:$4 sm:$0xff]   ;;  %v3426_v15 = vld [vmem:[#allocation9 + $0x1cc] ss:$16 sps:$4 sm:$0xff]  }
 0x9e2   :  { %2352 = vmatprep.subr.bf16.mxu0 %v3385_v29  ;;  %2393 = vmatprep.subr.bf16.mxu1 %v3386_v41  ;;  %v3427_v29 = vld [vmem:[#allocation9 + $0x1c0] ss:$16 sps:$4 sm:$0xff]   ;;  %v3428_v41 = vld [vmem:[#allocation9 + $0x1c8] ss:$16 sps:$4 sm:$0xff]  }
 0x9e5   :  { %2353 = vmatpush1.bf16.msra.mxu0 %v3387_v27  ;;  %2394 = vmatpush1.bf16.msra.mxu1 %v3388_v28  ;;  %v3429_v27 = vld [vmem:[#allocation9 + $0x1e4] ss:$16 sps:$4 sm:$0xff]   ;;  %v3430_v28 = vld [vmem:[#allocation9 + $0x1ec] ss:$16 sps:$4 sm:$0xff]  }
 0x9e6   :  { %2354 = vmatprep.subr.bf16.mxu0 %v3389_v31  ;;  %2395 = vmatprep.subr.bf16.mxu1 %v3390_v24  ;;  %v3431_v31 = vld [vmem:[#allocation9 + $0x1e0] ss:$16 sps:$4 sm:$0xff]   ;;  %v3432_v24 = vld [vmem:[#allocation9 + $0x1e8] ss:$16 sps:$4 sm:$0xff]  }
 0x9e9   :  { %2355 = vmatpush1.bf16.msra.mxu0 %v3391_v23  ;;  %2396 = vmatpush1.bf16.msra.mxu1 %v3392_v32  ;;  %v3433_v23 = vld [vmem:[#allocation10 + $0x4] ss:$16 sps:$4 sm:$0xff]   ;;  %v3434_v32 = vld [vmem:[#allocation10 + $0xc] ss:$16 sps:$4 sm:$0xff]  }
 0x9ea   :  { %2356 = vmatprep.subr.bf16.mxu0 %v3393_v25  ;;  %2397 = vmatprep.subr.bf16.mxu1 %v3394_v10 }
 0x9ed   :  { %2357 = vmatpush1.bf16.msra.mxu0 %v3395_v11  ;;  %2398 = vmatpush1.bf16.msra.mxu1 %v3396_v14 }
 0x9ee   :  { %2358 = vmatprep.subr.bf16.mxu0 %v3397_v22  ;;  %2399 = vmatprep.subr.bf16.mxu1 %v3398_v44 }
 0x9f1   :  { %2359 = vmatpush1.bf16.msra.mxu0 %v3399_v36  ;;  %2400 = vmatpush1.bf16.msra.mxu1 %v3400_v16 }
 0x9f2   :  { %2360 = vmatprep.subr.bf16.mxu0 %v3401_v45  ;;  %2401 = vmatprep.subr.bf16.mxu1 %v3402_v46 }
 0x9f5   :  { %2361 = vmatpush1.bf16.msra.mxu0 %v3403_v48  ;;  %2402 = vmatpush1.bf16.msra.mxu1 %v3404_v9 }
 0x9f6   :  { %2362 = vmatprep.subr.bf16.mxu0 %v3405_v51  ;;  %2403 = vmatprep.subr.bf16.mxu1 %v3406_v0 }
 0x9f9   :  { %2363 = vmatpush1.bf16.msra.mxu0 %v3407_v40  ;;  %2404 = vmatpush1.bf16.msra.mxu1 %v3408_v50 }
 0x9fa   :  { %2364 = vmatprep.subr.bf16.mxu0 %v3409_v34  ;;  %2405 = vmatprep.subr.bf16.mxu1 %v3410_v42 }
 0x9fd   :  { %2365 = vmatpush1.bf16.msra.mxu0 %v3411_v49  ;;  %2406 = vmatpush1.bf16.msra.mxu1 %v3412_v63 }
 0x9fe   :  { %2366 = vmatprep.subr.bf16.mxu0 %v3413_v39  ;;  %2407 = vmatprep.subr.bf16.mxu1 %v3414_v52 }
 0xa01   :  { %2367 = vmatpush1.bf16.msra.mxu0 %v3415_v43  ;;  %2408 = vmatpush1.bf16.msra.mxu1 %v3416_v47 }
 0xa02   :  { %2368 = vmatprep.subr.bf16.mxu0 %v3417_v2  ;;  %2409 = vmatprep.subr.bf16.mxu1 %v3418_v30 }
 0xa05   :  { %2369 = vmatpush1.bf16.msra.mxu0 %v3419_v61  ;;  %2410 = vmatpush1.bf16.msra.mxu1 %v3420_v62 }
 0xa06   :  { %2370 = vmatprep.subr.bf16.mxu0 %v3421_v4  ;;  %2411 = vmatprep.subr.bf16.mxu1 %v3422_v5 }
 0xa09   :  { %2371 = vmatpush1.bf16.msra.mxu0 %v3423_v6  ;;  %2412 = vmatpush1.bf16.msra.mxu1 %v3424_v7  ;;  %v3435_v7 = vld [vmem:[#allocation10] ss:$16 sps:$4 sm:$0xff]  }
 0xa0a   :  { %2372 = vmatprep.subr.bf16.mxu0 %v3425_v26  ;;  %2413 = vmatprep.subr.bf16.mxu1 %v3426_v15  ;;  %v3436_v26 = vld [vmem:[#allocation10 + $0x8] ss:$16 sps:$4 sm:$0xff]   ;;  %v3437_v15 = vld [vmem:[#allocation10 + $0x24] ss:$16 sps:$4 sm:$0xff]  }
 0xa0d   :  { %2373 = vmatpush1.bf16.msra.mxu0 %v3427_v29  ;;  %2414 = vmatpush1.bf16.msra.mxu1 %v3428_v41  ;;  %v3439_v29 = vld [vmem:[#allocation10 + $0x20] ss:$16 sps:$4 sm:$0xff]   ;;  %v3440_v41 = vld [vmem:[#allocation10 + $0x28] ss:$16 sps:$4 sm:$0xff]  }
 0xa0e   :  { %2374 = vmatprep.subr.bf16.mxu0 %v3429_v27  ;;  %2415 = vmatprep.subr.bf16.mxu1 %v3430_v28  ;;  %v3441_v27 = vld [vmem:[#allocation10 + $0x44] ss:$16 sps:$4 sm:$0xff]   ;;  %v3442_v28 = vld [vmem:[#allocation10 + $0x4c] ss:$16 sps:$4 sm:$0xff]  }
 0xa11   :  { %2375 = vmatpush1.bf16.msra.mxu0 %v3431_v31  ;;  %2416 = vmatpush1.bf16.msra.mxu1 %v3432_v24  ;;  %v3443_v31 = vld [vmem:[#allocation10 + $0x40] ss:$16 sps:$4 sm:$0xff]   ;;  %v3444_v24 = vld [vmem:[#allocation10 + $0x48] ss:$16 sps:$4 sm:$0xff]  }
 0xa12   :  { %2451 = vmatprep.subr.bf16.mxu0 %v3433_v23  ;;  %2492 = vmatprep.subr.bf16.mxu1 %v3434_v32  ;;  %v3445_v23 = vld [vmem:[#allocation10 + $0x64] ss:$16 sps:$4 sm:$0xff]   ;;  %v3446_v32 = vld [vmem:[#allocation10 + $0x6c] ss:$16 sps:$4 sm:$0xff]  }
 0xaa6   :  { %v2267_v25 = vpop.f32.mrb[48].mxu0  ;;  %v2308_v10 = vpop.f32.mrb[48].mxu1 }
 0xaa7   :  { %v2268_v11 = vadd.f32 %v2267_v25, %v4239_v12  ;;  %v2269_v14 = vpop.f32.mrb[49].mxu0  ;;  %v2310_v22 = vpop.f32.mrb[49].mxu1  ;;  %v2309_v51 = vadd.f32 %v2308_v10, %v4249_v21  ;;  %v3447_v25 = vld [vmem:[#allocation10 + $0x60] ss:$16 sps:$4 sm:$0xff]   ;;  %v3448_v10 = vld [vmem:[#allocation10 + $0x68] ss:$16 sps:$4 sm:$0xff]  }
 0xaa8   :  { %v2270_v44 = vadd.f32 %v2269_v14, %v4243_v1  ;;  %v2271_v36 = vpop.f32.mrb[50].mxu0  ;;  %v2312_v16 = vpop.f32.mrb[50].mxu1  ;;  %v2311_v0 = vadd.f32 %v2310_v22, %v4253_v33  ;;  %v3450_v14 = vld [vmem:[#allocation10 + $0x8c] ss:$16 sps:$4 sm:$0xff]   ;;  %v3451_v22 = vld [vmem:[#allocation10 + $0x80] ss:$16 sps:$4 sm:$0xff]  }
 0xaa9   :  { %v2786_v45 = vmul.f32 -1.442695, %v2268_v11  ;;  %v2272_v46 = vpop.f32.mrb[51].mxu0  ;;  %v2313_v48 = vpop.f32.mrb[51].mxu1  ;;  %v2788_v40 = vmul.f32 -1.442695, %v2309_v51 }
 0xaaa   :  { %v2787_v9 = vmul.f32 -1.442695, %v2270_v44  ;;  %v3449_v11 = vld [vmem:[#allocation10 + $0x84] ss:$16 sps:$4 sm:$0xff]   ;;  %v3452_v44 = vld [vmem:[#allocation10 + $0x88] ss:$16 sps:$4 sm:$0xff]  }
 0xaab   :  { %3193 = vpow2.f32 %v2786_v45  ;;  %v3453_v36 = vld [vmem:[#allocation10 + $0xa4] ss:$16 sps:$4 sm:$0xff]   ;;  %v3454_v16 = vld [vmem:[#allocation10 + $0xac] ss:$16 sps:$4 sm:$0xff]   ;;  %v3455_v45 = vld [vmem:[#allocation10 + $0xa0] ss:$16 sps:$4 sm:$0xff]  }
 0xaac   :  { %3195 = vpow2.f32 %v2787_v9  ;;  %v3456_v46 = vld [vmem:[#allocation10 + $0xa8] ss:$16 sps:$4 sm:$0xff]   ;;  %v3457_v48 = vld [vmem:[#allocation10 + $0xc4] ss:$16 sps:$4 sm:$0xff]   ;;  %v3458_v9 = vld [vmem:[#allocation10 + $0xcc] ss:$16 sps:$4 sm:$0xff]  }
 0xaad   :  { %3197 = vtanh.f32 %v2311_v0  ;;  %v3459_v51 = vld [vmem:[#allocation10 + $0xc0] ss:$16 sps:$4 sm:$0xff]   ;;  %v3460_v0 = vld [vmem:[#allocation10 + $0xc8] ss:$16 sps:$4 sm:$0xff]  }
 0xaae   :  { %3199 = vpow2.f32 %v2788_v40  ;;  %v3461_v40 = vld [vmem:[#allocation10 + $0xe4] ss:$16 sps:$4 sm:$0xff]  }
 0xab5   :  { %v3194_v50 = vpop.eup %3193 }
 0xab6   :  { %v2324_v34 = vadd.f32 1.0, %v3194_v50  ;;  %v3196_v42 = vpop.eup %3195  ;;  %v3462_v50 = vld [vmem:[#allocation10 + $0xec] ss:$16 sps:$4 sm:$0xff]  }
 0xab7   :  { %v2325_v49 = vadd.f32 1.0, %v3196_v42  ;;  %v3198_v63 = vpop.eup %3197  ;;  %v3464_v42 = vld [vmem:[#allocation10 + $0xe8] ss:$16 sps:$4 sm:$0xff]  }
 0xab8   :  { %3201 = vrcp.f32 %v2324_v34  ;;  %v3200_v39 = vpop.eup %3199  ;;  %v3463_v34 = vld [vmem:[#allocation10 + $0xe0] ss:$16 sps:$4 sm:$0xff]  }
 0xab9   :  { %3203 = vrcp.f32 %v2325_v49  ;;  %v2326_v2 = vadd.f32 1.0, %v3200_v39  ;;  %v3465_v49 = vld [vmem:[#allocation10 + $0x104] ss:$16 sps:$4 sm:$0xff]   ;;  %v3467_v39 = vld [vmem:[#allocation10 + $0x100] ss:$16 sps:$4 sm:$0xff]  }
 0xabb   :  { %3205 = vrcp.f32 %v2326_v2  ;;  %v3471_v2 = vld [vmem:[#allocation10 + $0x120] ss:$16 sps:$4 sm:$0xff]  }
 0xac2   :  { %v3202_v52 = vpop.eup %3201 }
 0xac3   :  { %v2335_v43 = vmul.f32 %v3202_v52, %v3198_v63  ;;  %v3204_v47 = vpop.eup %3203  ;;  %v3466_v63 = vld [vmem:[#allocation10 + $0x10c] ss:$16 sps:$4 sm:$0xff]   ;;  %v3468_v52 = vld [vmem:[#allocation10 + $0x108] ss:$16 sps:$4 sm:$0xff]  }
 0xac4   :  { %v2334_v30 = vmul.f32 %v3204_v47, %v4945_v3  ;;  %v3438_v3 = vld [vmem:[#allocation10 + $0x2c] ss:$16 sps:$4 sm:$0xff]  }
 0xac5   :  { %v3206_v62 = vpop.eup %3205  ;;  %v3470_v47 = vld [vmem:[#allocation10 + $0x12c] ss:$16 sps:$4 sm:$0xff]  }
 0xac6   :  { %v5023_v61 = vadd.f32 %v2335_v43, %v2334_v30  ;;  %v3469_v43 = vld [vmem:[#allocation10 + $0x124] ss:$16 sps:$4 sm:$0xff]   ;;  %v3472_v30 = vld [vmem:[#allocation10 + $0x128] ss:$16 sps:$4 sm:$0xff]  }
 0xac8   :  { %3207 = vtanh.f32 %v5023_v61 }
 0xad2   :  { %v3208_v4 = vpop.eup %3207 }
 0xad3   :  { %v2338_v5 = vmul.f32 %v3208_v4, %v3206_v62  ;;  %v3473_v62 = vld [vmem:[#allocation10 + $0x144] ss:$16 sps:$4 sm:$0xff]   ;;  %v3474_v4 = vld [vmem:[#allocation10 + $0x14c] ss:$16 sps:$4 sm:$0xff]  }
 0xad5   :  { %v2343_v6 = vpack.c.bf16 %v2338_v5, %v2338_v5  ;;  %v3475_v5 = vld [vmem:[#allocation10 + $0x140] ss:$16 sps:$4 sm:$0xff]  }
 0xad7   :  { %2377 = vmatmul.mubr.bf16.vlgmr.msra.gmra.mrb[52].mxu0 %v2343_v6  ;;  %2418 = vmatmul.mubr.bf16.vlgmr.msra.gmra.mrb[52].mxu1 %v2343_v6 }
 0xad8   :  { %2483 = vmatprep.mubr.bf16.mxu0 %v2343_v6  ;;  %2524 = vmatprep.mubr.bf16.mxu1 %v2343_v6  ;;  %v3476_v6 = vld [vmem:[#allocation10 + $0x148] ss:$16 sps:$4 sm:$0xff]  }
 0xad9   :  { %2452 = vmatpush1.bf16.msra.mxu0 %v3435_v7  ;;  %2493 = vmatpush1.bf16.msra.mxu1 %v3436_v26  ;;  %v3477_v7 = vld [vmem:[#allocation10 + $0x164] ss:$16 sps:$4 sm:$0xff]   ;;  %v3478_v26 = vld [vmem:[#allocation10 + $0x16c] ss:$16 sps:$4 sm:$0xff]  }
 0xada   :  { %2453 = vmatprep.subr.bf16.mxu0 %v3437_v15  ;;  %2494 = vmatprep.subr.bf16.mxu1 %v3438_v3  ;;  %v3479_v15 = vld [vmem:[#allocation10 + $0x160] ss:$16 sps:$4 sm:$0xff]   ;;  %v3480_v3 = vld [vmem:[#allocation10 + $0x168] ss:$16 sps:$4 sm:$0xff]  }
 0xadd   :  { %2454 = vmatpush1.bf16.msra.mxu0 %v3439_v29  ;;  %2495 = vmatpush1.bf16.msra.mxu1 %v3440_v41 }
 0xade   :  { %2455 = vmatprep.subr.bf16.mxu0 %v3441_v27  ;;  %2496 = vmatprep.subr.bf16.mxu1 %v3442_v28 }
 0xae1   :  { %2456 = vmatpush1.bf16.msra.mxu0 %v3443_v31  ;;  %2497 = vmatpush1.bf16.msra.mxu1 %v3444_v24 }
 0xae2   :  { %2457 = vmatprep.subr.bf16.mxu0 %v3445_v23  ;;  %2498 = vmatprep.subr.bf16.mxu1 %v3446_v32 }
 0xae5   :  { %2458 = vmatpush1.bf16.msra.mxu0 %v3447_v25  ;;  %2499 = vmatpush1.bf16.msra.mxu1 %v3448_v10 }
 0xae6   :  { %2459 = vmatprep.subr.bf16.mxu0 %v3449_v11  ;;  %2500 = vmatprep.subr.bf16.mxu1 %v3450_v14 }
 0xae9   :  { %2460 = vmatpush1.bf16.msra.mxu0 %v3451_v22  ;;  %2501 = vmatpush1.bf16.msra.mxu1 %v3452_v44 }
 0xaea   :  { %2461 = vmatprep.subr.bf16.mxu0 %v3453_v36  ;;  %2502 = vmatprep.subr.bf16.mxu1 %v3454_v16 }
 0xaed   :  { %2462 = vmatpush1.bf16.msra.mxu0 %v3455_v45  ;;  %2503 = vmatpush1.bf16.msra.mxu1 %v3456_v46 }
 0xaee   :  { %2463 = vmatprep.subr.bf16.mxu0 %v3457_v48  ;;  %2504 = vmatprep.subr.bf16.mxu1 %v3458_v9 }
 0xaf1   :  { %2464 = vmatpush1.bf16.msra.mxu0 %v3459_v51  ;;  %2505 = vmatpush1.bf16.msra.mxu1 %v3460_v0 }
 0xaf2   :  { %2465 = vmatprep.subr.bf16.mxu0 %v3461_v40  ;;  %2506 = vmatprep.subr.bf16.mxu1 %v3462_v50 }
 0xaf5   :  { %2466 = vmatpush1.bf16.msra.mxu0 %v3463_v34  ;;  %2507 = vmatpush1.bf16.msra.mxu1 %v3464_v42 }
 0xaf6   :  { %2467 = vmatprep.subr.bf16.mxu0 %v3465_v49  ;;  %2508 = vmatprep.subr.bf16.mxu1 %v3466_v63 }
 0xaf9   :  { %2468 = vmatpush1.bf16.msra.mxu0 %v3467_v39  ;;  %2509 = vmatpush1.bf16.msra.mxu1 %v3468_v52 }
 0xafa   :  { %2469 = vmatprep.subr.bf16.mxu0 %v3469_v43  ;;  %2510 = vmatprep.subr.bf16.mxu1 %v3470_v47 }
 0xafd   :  { %2470 = vmatpush1.bf16.msra.mxu0 %v3471_v2  ;;  %2511 = vmatpush1.bf16.msra.mxu1 %v3472_v30 }
 0xafe   :  { %2471 = vmatprep.subr.bf16.mxu0 %v3473_v62  ;;  %2512 = vmatprep.subr.bf16.mxu1 %v3474_v4 }
 0xb01   :  { %2472 = vmatpush1.bf16.msra.mxu0 %v3475_v5  ;;  %2513 = vmatpush1.bf16.msra.mxu1 %v3476_v6 }
 0xb02   :  { %2473 = vmatprep.subr.bf16.mxu0 %v3477_v7  ;;  %2514 = vmatprep.subr.bf16.mxu1 %v3478_v26 }
 0xb05   :  { %2474 = vmatpush1.bf16.msra.mxu0 %v3479_v15  ;;  %2515 = vmatpush1.bf16.msra.mxu1 %v3480_v3 }
 0xb06   :  { %2475 = vmatprep.subr.bf16.mxu0 %v5832_v13  ;;  %2516 = vmatprep.subr.bf16.mxu1 %v5833_v17 }
 0xb09   :  { %2476 = vmatpush1.bf16.msra.mxu0 %v5834_v8  ;;  %2517 = vmatpush1.bf16.msra.mxu1 %v5835_v19  ;;  %v5852_v8 = vld [vmem:[#allocation124_spill] sm:$0xff] }
 0xb0a   :  { %2477 = vmatprep.subr.bf16.mxu0 %v5836_v18  ;;  %2518 = vmatprep.subr.bf16.mxu1 %v5837_v38  ;;  %v5853_v18 = vld [vmem:[#allocation125_spill] sm:$0xff] }
 0xb0d   :  { %2478 = vmatpush1.bf16.msra.mxu0 %v5838_v35  ;;  %2519 = vmatpush1.bf16.msra.mxu1 %v5839_v20 }
 0xb0e   :  { %2479 = vmatprep.subr.bf16.mxu0 %v5840_v53  ;;  %2520 = vmatprep.subr.bf16.mxu1 %v5841_v54  ;;  %v5854_v53 = vld [vmem:[#allocation126_spill] sm:$0xff] }
 0xb11   :  { %2480 = vmatpush1.bf16.msra.mxu0 %v5842_v55  ;;  %2521 = vmatpush1.bf16.msra.mxu1 %v5843_v56  ;;  %v5855_v55 = vld [vmem:[#allocation127_spill] sm:$0xff] }
 0xb12   :  { %2481 = vmatprep.subr.bf16.mxu0 %v5844_v57  ;;  %2522 = vmatprep.subr.bf16.mxu1 %v5845_v58 }
 0xb15   :  { %2482 = vmatpush1.bf16.msra.mxu0 %v5846_v59  ;;  %2523 = vmatpush1.bf16.msra.mxu1 %v5847_v60 }
 0xbaa   :  { %v2378_v13 = vpop.f32.mrb[52].mxu0  ;;  %v2419_v17 = vpop.f32.mrb[52].mxu1 }
 0xbab   :  { %v2379_v19 = vadd.f32 %v2378_v13, %v5852_v8  ;;  %v2420_v38 = vadd.f32 %v2419_v17, %v5853_v18  ;;  %v2380_v35 = vpop.f32.mrb[53].mxu0  ;;  %v2421_v20 = vpop.f32.mrb[53].mxu1  ;;  %v2795_v17 = vld [vmem:[%s5072_s5] ss:$0 sm:$0xff] }
 0xbac   :  { %v2381_v54 = vadd.f32 %v2380_v35, %v5854_v53  ;;  %v2422_v56 = vadd.f32 %v2421_v20, %v5855_v55  ;;  %v2382_v29 = vpop.f32.mrb[54].mxu0  ;;  %v2423_v57 = vpop.f32.mrb[54].mxu1  ;;  %v2796_v18 = vld [vmem:[#allocation3] ss:$0 sm:$0xff] }
 0xbad   :  { %v2789_v41 = vmul.f32 -1.442695, %v2379_v19  ;;  %v2383_v58 = vpop.f32.mrb[55].mxu0  ;;  %v2424_v27 = vpop.f32.mrb[55].mxu1  ;;  %v2791_v60 = vmul.f32 -1.442695, %v2420_v38 }
 0xbae   :  { %v2790_v59 = vmul.f32 -1.442695, %v2381_v54 }
 0xbaf   :  { %3209 = vpow2.f32 %v2789_v41 }
 0xbb0   :  { %3211 = vpow2.f32 %v2790_v59 }
 0xbb1   :  { %3213 = vtanh.f32 %v2422_v56 }
 0xbb2   :  { %3215 = vpow2.f32 %v2791_v60 }
 0xbb9   :  { %v3210_v28 = vpop.eup %3209 }
 0xbba   :  { %v2435_v31 = vadd.f32 1.0, %v3210_v28  ;;  %v3212_v24 = vpop.eup %3211 }
 0xbbb   :  { %v2436_v23 = vadd.f32 1.0, %v3212_v24  ;;  %v3214_v32 = vpop.eup %3213 }
 0xbbc   :  { %3217 = vrcp.f32 %v2435_v31  ;;  %v3216_v25 = vpop.eup %3215 }
 0xbbd   :  { %3219 = vrcp.f32 %v2436_v23  ;;  %v2437_v22 = vadd.f32 1.0, %v3216_v25 }
 0xbbf   :  { %3221 = vrcp.f32 %v2437_v22 }
 0xbc6   :  { %v3218_v10 = vpop.eup %3217 }
 0xbc7   :  { %v2446_v11 = vmul.f32 %v3218_v10, %v3214_v32  ;;  %v3220_v14 = vpop.eup %3219 }
 0xbc8   :  { %v2445_v44 = vmul.f32 %v3220_v14, %v5015_v37 }
 0xbc9   :  { %v3222_v16 = vpop.eup %3221 }
 0xbca   :  { %v2447_v36 = vadd.f32 %v2446_v11, %v2445_v44 }
 0xbcc   :  { %3223 = vtanh.f32 %v2447_v36 }
 0xbd6   :  { %v3224_v45 = vpop.eup %3223 }
 0xbd7   :  { %v2449_v46 = vmul.f32 %v3224_v45, %v3222_v16 }
 0xbd9   :  { %v2450_v48 = vpack.c.bf16 %v2449_v46, %v2449_v46 }
 0xbdb   :  { %2484 = vmatmul.mubr.bf16.vlgmr.msra.gmra.mrb[56].mxu0 %v2450_v48  ;;  %2525 = vmatmul.mubr.bf16.vlgmr.msra.gmra.mrb[56].mxu1 %v2450_v48 }
 0xcae   :  { %v2485_v9 = vpop.f32.mrb[56].mxu0  ;;  %v2526_v51 = vpop.f32.mrb[56].mxu1 }
 0xcaf   :  { %v2486_v0 = vadd.f32 %v2485_v9, %v4239_v12  ;;  %v2487_v40 = vpop.f32.mrb[57].mxu0  ;;  %v2528_v50 = vpop.f32.mrb[57].mxu1  ;;  %v2527_v43 = vadd.f32 %v2526_v51, %v4249_v21 }
 0xcb0   :  { %v2488_v34 = vadd.f32 %v2487_v40, %v4243_v1  ;;  %v2489_v42 = vpop.f32.mrb[58].mxu0  ;;  %v2530_v49 = vpop.f32.mrb[58].mxu1  ;;  %v2529_v47 = vadd.f32 %v2528_v50, %v4253_v33 }
 0xcb1   :  { %v2792_v37 = vmul.f32 -1.442695, %v2486_v0  ;;  %v2490_v63 = vpop.f32.mrb[59].mxu0  ;;  %v2531_v39 = vpop.f32.mrb[59].mxu1  ;;  %v2794_v2 = vmul.f32 -1.442695, %v2527_v43 }
 0xcb2   :  { %v2793_v52 = vmul.f32 -1.442695, %v2488_v34 }
 0xcb3   :  { %3225 = vpow2.f32 %v2792_v37 }
 0xcb4   :  { %3227 = vpow2.f32 %v2793_v52 }
 0xcb5   :  { %3229 = vtanh.f32 %v2529_v47 }
 0xcb6   :  { %3231 = vpow2.f32 %v2794_v2 }
 0xcbd   :  { %v3226_v30 = vpop.eup %3225 }
 0xcbe   :  { %v2542_v62 = vadd.f32 1.0, %v3226_v30  ;;  %v3228_v12 = vpop.eup %3227 }
 0xcbf   :  { %v2543_v1 = vadd.f32 1.0, %v3228_v12  ;;  %v3230_v4 = vpop.eup %3229 }
 0xcc0   :  { %3233 = vrcp.f32 %v2542_v62  ;;  %v3232_v5 = vpop.eup %3231 }
 0xcc1   :  { %3235 = vrcp.f32 %v2543_v1  ;;  %v2544_v15 = vadd.f32 1.0, %v3232_v5 }
 0xcc3   :  { %3237 = vrcp.f32 %v2544_v15 }
 0xcca   :  { %v3234_v6 = vpop.eup %3233 }
 0xccb   :  { %v2553_v7 = vmul.f32 %v3234_v6, %v3230_v4  ;;  %v3236_v26 = vpop.eup %3235 }
 0xccc   :  { %v2552_v3 = vmul.f32 %v3236_v26, %v5023_v61 }
 0xccd   :  { %v3238_v33 = vpop.eup %3237 }
 0xcce   :  { %v2554_v21 = vadd.f32 %v2553_v7, %v2552_v3 }
 0xcd0   :  { %3239 = vtanh.f32 %v2554_v21 }
 0xcda   :  { %v3240_v13 = vpop.eup %3239 }
 0xcdb   :  { %v2556_v8 = vmul.f32 %v3240_v13, %v3238_v33 }
 0xcdd   :  { %v2564_v19 = vmul.f32 %v2795_v17, %v2556_v8 }
 0xcdf   :  { %2565 = vadd.xlane.f32.xlu0 %v2564_v19 }
 0xd6c   :  { %v2566_v38 = vpop.xlane.xlu0 %2565 }
 0xd6d   :  { %v2574_v35 = vadd.f32 %v2796_v18, %v2566_v38 }
 0xd6f   :  { %2577 = vperm.xlu0 %2808, %v2574_v35  }
 0xdee   :  { %v2578_v61 = vpop.permute.xlu0 %2577 }
 0xdef   :  { %2580 = vst [vmem:[#allocation12] sm:$0xff] %v2578_v61 }
 0xdf0   :  { %3580 = shalt.err (!%p3577_p8)
}
 0xdf1   :  { %s3581_s11 = scalar_lea.hbm %s5074_s7, 128 }
 0xdf2   :  { %p3582_p9 = scmp.ne.s32.totalorder %s5074_s7, %s3581_s11  ;;  %p3585_p10 = scmp.lt.u32.totalorder %s3581_s11, %s5074_s7 }
 0xdf4   :  { %p3587_p11 = pnand %p3585_p10, %p3582_p9 }
 0xdf6   :  { %3590 = shalt.err (!%p3587_p11)
}
 0xdf7   :  { %2590 = dma.vmem_to_hbm [thread:$0]  %s2588_s8, 128, %s5074_s7, [#allocation6]  }
 0xdf8   :  { %3597 = dma.done.wait [#allocation6], 128  }
 0xdf9   :  { %3598 = vsyncadd [#allocation6], 4294967168 }
 0xdfa   :  { %2594 = vsyncpa [#allocation5], 1 }
 0xdfb   :  { %2595 = vsyncpa [#allocation8], 1 }
 0xdfc   :  { %2596 = vsyncpa [#allocation11], 1 }
 0xdfd   :  { %2597 = vsyncpa [#allocation6], 1 }

</bundles_post_ra>
